<compile_context>
chip_gen: v5e
topology: v5e:2x2
jax: 0.10.0
libtpu: 0.0.40
codegen_flags: <defaults>
</compile_context>

<pallas_src>
import jax
import jax.numpy as jnp
from jax.experimental import pallas as pl
from jax.experimental.pallas import tpu as pltpu

# ----------------------------- "config" --------------------------------------
NUM_CLASSES = 5                 # class logits (incl. background)
CLS_POOL = 7                    # ROI pool size for cls head
GRID_POOL = 14                  # ROI pool size for grid head
GRID_PADDED = GRID_POOL + 2     # grid-head spatial layout incl. conv halo
ROI_AREA = GRID_PADDED * GRID_PADDED   # 256 lanes per ROI
HIDDEN = 32                     # cls head FC hidden dim
GRID_CH = 8                     # grid head conv channels
GRID_POINTS = 9                 # 3x3 grid points -> heatmap channels
SPATIAL_SCALE = 1.0             # feature-map coords == proposal coords here
LANE = 128                      # lane-dense cls output slab width
R_BLOCK = 8                     # ROIs per grid step (8 -> f32 sublane aligned)
HEAT_ROWS = 16                  # 9 heatmap rows padded to 16 sublanes


# ------------------------- the fused, ROI-tiled kernel ------------------------
def _grid_rcnn_kernel(
        pooled_cls_ref, w1_ref, b1_ref, w2_ref, b2_ref, wc_ref, bc_ref, cmask_ref,
        pooled_g_ref, mask_ref,
        gw1_ref, gb1_ref, gw2_ref, gb2_ref, gw3_ref, gb3_ref,
        ow_ref, ob_ref,
        logits_ref, probs_ref, grid_ref, x_ref):
    """One ROI block (R_BLOCK ROIs): cls head + softmax, grid head, Output_grid."""
    f32, bf16 = jnp.float32, jnp.bfloat16

    # ---- Head_cls (FC+ReLU x2) -> Output_cls -> softmax (cls_post_processor) ----
    xc = pooled_cls_ref[...]                                        # (R, 7*7*C) bf16
    h = jnp.maximum(
        jnp.dot(xc, w1_ref[...], preferred_element_type=f32) + b1_ref[...], 0.0)
    h = jnp.maximum(
        jnp.dot(h.astype(bf16), w2_ref[...], preferred_element_type=f32)
        + b2_ref[...], 0.0)
    logits = (jnp.dot(h.astype(bf16), wc_ref[...], preferred_element_type=f32)
              + bc_ref[...])                                        # (R, 128)
    logits_ref[...] = logits                    # pad lanes are exactly 0 (no -1e9)
    masked = logits - (1.0 - cmask_ref[...]) * 1e30        # kill pad lanes in softmax
    m = jnp.max(masked, axis=-1, keepdims=True)
    e = jnp.exp(masked - m)
    probs_ref[...] = e / jnp.sum(e, axis=-1, keepdims=True)

    # ---- Head_grid: 3x (3x3 conv + ReLU), channel-major (GRID_CH, S) ------------
    mask = mask_ref[...]                                            # (1, S) interior
    s = mask.shape[-1]
    feats = pooled_g_ref[...].astype(f32)       # (GRID_CH, S); halo columns are zero

    def conv3x3_relu(inp, w_ref, b_ref):
        # NOTE: circular rolls only contaminate halo columns (|off| <= 17 stays
        # inside each ROI's 256-lane block for interior positions); the interior
        # mask re-zeroes halos after every layer, so ROI/tile edges are safe.
        taps = []
        for dy in (-1, 0, 1):
            for dx in (-1, 0, 1):
                off = dy * GRID_PADDED + dx
                taps.append(inp if off == 0
                            else pltpu.roll(inp, shift=(-off) % s, axis=1))
        patches = jnp.concatenate(taps, axis=0).astype(bf16)        # im2col (72, S)
        out = (jnp.dot(w_ref[...], patches, preferred_element_type=f32)
               + b_ref[...])
        return jnp.maximum(out, 0.0) * mask

    h1 = conv3x3_relu(feats, gw1_ref, gb1_ref)
    xg = conv3x3_relu(h1, gw2_ref, gb2_ref)      # "x"
    xso = conv3x3_relu(xg, gw3_ref, gb3_ref)     # "x_so" (second-order branch)

    # ---- Output_grid: single fused dot on stacked [x; x_so]; exact f32 "x" out --
    x_ref[...] = xg
    stacked = jnp.concatenate([xg, xso], axis=0).astype(bf16)       # (16, S)
    grid_ref[...] = (jnp.dot(ow_ref[...], stacked, preferred_element_type=f32)
                     + ob_ref[...])


# ------------------ separable ROIAlign (tiny XLA glue, no dense matrix) -------
def _axis_weights(lo_coord, hi_coord, pool, size):
    """Per-ROI 1-D bilinear weights (N, pool, size); single center sample/bin."""
    # TODO(synk): boundary handling (coords < 0 / > size-1) and sampling_ratio
    # averaging differ slightly from torchvision ROIAlign.
    bin_sz = (hi_coord - lo_coord) / pool
    steps = jnp.arange(pool, dtype=jnp.float32) + 0.5
    centers = lo_coord[:, None] + steps[None, :] * bin_sz[:, None] - 0.5
    lo = jnp.clip(jnp.floor(centers), 0.0, size - 1.0)
    hi = jnp.clip(lo + 1.0, 0.0, size - 1.0)
    frac = centers - jnp.floor(centers)
    idx = jnp.arange(size, dtype=jnp.float32)
    w = ((idx[None, None, :] == lo[..., None]).astype(jnp.float32)
         * (1.0 - frac)[..., None]
         + (idx[None, None, :] == hi[..., None]).astype(jnp.float32)
         * frac[..., None])
    return w                                                        # (N, pool, size)


def _roi_align_separable(feats_nhwc, proposals, pool, scale):
    """pooled[n,p,q,c] = sum_{y,x} wy[n,p,y] wx[n,q,x] feat[b_n,y,x,c]."""
    _, height, width, _ = feats_nhwc.shape
    bidx = proposals[:, 0].astype(jnp.int32)
    x1 = proposals[:, 1] * scale
    y1 = proposals[:, 2] * scale
    x2 = proposals[:, 3] * scale
    y2 = proposals[:, 4] * scale
    wy = _axis_weights(y1, y2, pool, height)                        # (N, pool, H)
    wx = _axis_weights(x1, x2, pool, width)                         # (N, pool, W)
    froi = feats_nhwc[bidx]                                         # (N, H, W, C)
    tmp = jnp.einsum("nph,nhwc->npwc", wy, froi)
    return jnp.einsum("nqw,npwc->npqc", wx, tmp)                    # (N, pool, pool, C)


# --------------------------- parameter construction ---------------------------
def make_params(key, dim_in):
    d_cls = CLS_POOL * CLS_POOL * dim_in
    ks = jax.random.split(key, 12)

    def nrm(k, shape, scale=0.1):
        return (scale * jax.random.normal(k, shape)).astype(jnp.float32)

    return {
        # Head_cls (2 FC) + Output_cls
        "w1": nrm(ks[0], (d_cls, HIDDEN)), "b1": jnp.zeros((1, HIDDEN), jnp.float32),
        "w2": nrm(ks[1], (HIDDEN, HIDDEN)), "b2": jnp.zeros((1, HIDDEN), jnp.float32),
        "wc": nrm(ks[2], (HIDDEN, NUM_CLASSES)), "bc": jnp.zeros((1, NUM_CLASSES), jnp.float32),
        # Head_grid (3x 3x3 convs)
        "gw1": nrm(ks[3], (3, 3, dim_in, GRID_CH)), "gb1": jnp.zeros((1, GRID_CH), jnp.float32),
        "gw2": nrm(ks[4], (3, 3, GRID_CH, GRID_CH)), "gb2": jnp.zeros((1, GRID_CH), jnp.float32),
        "gw3": nrm(ks[5], (3, 3, GRID_CH, GRID_CH)), "gb3": jnp.zeros((1, GRID_CH), jnp.float32),
        # Output_grid (fused 1x1 convs over x and x_so)
        "ow1": nrm(ks[6], (GRID_CH, GRID_POINTS)),
        "ow2": nrm(ks[7], (GRID_CH, GRID_POINTS)),
        "ob": jnp.zeros((1, GRID_POINTS), jnp.float32),
    }


# ------------------------------ GridRCNN forward ------------------------------
@jax.jit
def grid_rcnn_forward(features_nchw, proposals, params):
    """Inference path of GridRCNN.forward (one ROI-tiled Pallas call).

    features_nchw: (B, C, H, W) float32
    proposals:     (N, 5) = (batch_idx, x1, y1, x2, y2)
    Returns (x, result, losses) with losses == {} (eval mode).
    """
    _, chans, _, _ = features_nchw.shape
    n = proposals.shape[0]
    bf16 = jnp.bfloat16

    # ---- pad ROI count to a multiple of the block size ----------------------
    n_pad = ((n + R_BLOCK - 1) // R_BLOCK) * R_BLOCK
    if n_pad > n:
        pad_rows = jnp.tile(jnp.array([[0.0, 0.0, 0.0, 8.0, 8.0]], jnp.float32),
                            (n_pad - n, 1))
        prop_pad = jnp.concatenate([proposals, pad_rows], axis=0)
    else:
        prop_pad = proposals

    feats_nhwc = jnp.transpose(features_nchw, (0, 2, 3, 1))         # (B, H, W, C)

    # ---- separable ROIAlign (tiny einsums, no dense interp matrix) ----------
    # TODO(synk): pooling could move fully in-kernel via a scalar-prefetched
    # batch index; kept in XLA glue (a few tens of KB) for lowering robustness.
    pooled_c = _roi_align_separable(feats_nhwc, prop_pad, CLS_POOL, SPATIAL_SCALE)
    pooled_c = pooled_c.reshape(n_pad, -1).astype(bf16)             # (Np, 7*7*C)
    d_cls = pooled_c.shape[1]

    pooled_g = _roi_align_separable(feats_nhwc, prop_pad, GRID_POOL, SPATIAL_SCALE)
    pooled_g = jnp.pad(pooled_g, ((0, 0), (1, 1), (1, 1), (0, 0)))  # zero conv halo
    s_total = n_pad * ROI_AREA
    pg_cm = jnp.transpose(pooled_g, (3, 0, 1, 2)).reshape(chans, s_total)
    pg_cm = jnp.pad(pg_cm, ((0, GRID_CH - chans), (0, 0))).astype(bf16)   # (8, S)

    interior = jnp.zeros((n_pad, GRID_PADDED, GRID_PADDED), jnp.float32)
    interior = interior.at[:, 1:-1, 1:-1].set(1.0).reshape(1, s_total)

    # ---- weights in kernel layout (bf16 MXU operands, f32 biases) -----------
    w1 = params["w1"].astype(bf16)
    w2 = params["w2"].astype(bf16)
    wc_slab = (jnp.zeros((HIDDEN, LANE), jnp.float32)
               .at[:, :NUM_CLASSES].set(params["wc"])).astype(bf16)
    bc_slab = jnp.zeros((1, LANE), jnp.float32).at[:, :NUM_CLASSES].set(params["bc"])
    cls_mask = jnp.zeros((1, LANE), jnp.float32).at[:, :NUM_CLASSES].set(1.0)

    def conv_w_t(w):  # (3, 3, Cin, GRID_CH) -> (GRID_CH, 9*GRID_CH), Cin padded
        cin = w.shape[2]
        wt = jnp.transpose(w, (3, 0, 1, 2)).reshape(GRID_CH, 9, cin)
        wt = jnp.pad(wt, ((0, 0), (0, 0), (0, GRID_CH - cin)))
        return wt.reshape(GRID_CH, 9 * GRID_CH).astype(bf16)

    gw1t, gw2t, gw3t = (conv_w_t(params["gw1"]), conv_w_t(params["gw2"]),
                        conv_w_t(params["gw3"]))
    gb1t = params["gb1"].reshape(GRID_CH, 1)
    gb2t = params["gb2"].reshape(GRID_CH, 1)
    gb3t = params["gb3"].reshape(GRID_CH, 1)

    # fused Output_grid weight: rows 0..8 = heatmaps from [x | x_so], rest zero
    ow_slab = (jnp.zeros((HEAT_ROWS, 2 * GRID_CH), jnp.float32)
               .at[:GRID_POINTS, :GRID_CH].set(params["ow1"].T)
               .at[:GRID_POINTS, GRID_CH:].set(params["ow2"].T)).astype(bf16)
    ob_slab = (jnp.zeros((HEAT_ROWS, 1), jnp.float32)
               .at[:GRID_POINTS, 0].set(params["ob"][0]))

    # ---- ROI-block-tiled Pallas call -----------------------------------------
    n_blocks = n_pad // R_BLOCK
    s_blk = R_BLOCK * ROI_AREA                                     # 2048 lanes/step

    rows = lambda i: (i, 0)
    cols = lambda i: (0, i)
    whole = lambda i: (0, 0)

    in_specs = [
        pl.BlockSpec((R_BLOCK, d_cls), rows),                      # pooled cls
        pl.BlockSpec(w1.shape, whole), pl.BlockSpec(params["b1"].shape, whole),
        pl.BlockSpec(w2.shape, whole), pl.BlockSpec(params["b2"].shape, whole),
        pl.BlockSpec(wc_slab.shape, whole), pl.BlockSpec(bc_slab.shape, whole),
        pl.BlockSpec(cls_mask.shape, whole),
        pl.BlockSpec((GRID_CH, s_blk), cols),                      # pooled grid
        pl.BlockSpec((1, s_blk), cols),                            # interior mask
        pl.BlockSpec(gw1t.shape, whole), pl.BlockSpec(gb1t.shape, whole),
        pl.BlockSpec(gw2t.shape, whole), pl.BlockSpec(gb2t.shape, whole),
        pl.BlockSpec(gw3t.shape, whole), pl.BlockSpec(gb3t.shape, whole),
        pl.BlockSpec(ow_slab.shape, whole), pl.BlockSpec(ob_slab.shape, whole),
    ]
    out_specs = (
        pl.BlockSpec((R_BLOCK, LANE), rows),                       # logits
        pl.BlockSpec((R_BLOCK, LANE), rows),                       # probs
        pl.BlockSpec((HEAT_ROWS, s_blk), cols),                    # grid heatmaps
        pl.BlockSpec((GRID_CH, s_blk), cols),                      # x pass-through
    )
    out_shape = (
        jax.ShapeDtypeStruct((n_pad, LANE), jnp.float32),
        jax.ShapeDtypeStruct((n_pad, LANE), jnp.float32),
        jax.ShapeDtypeStruct((HEAT_ROWS, s_total), jnp.float32),
        jax.ShapeDtypeStruct((GRID_CH, s_total), jnp.float32),
    )

    flops = int(2 * s_total * (3 * GRID_CH * 9 * GRID_CH + HEAT_ROWS * 2 * GRID_CH)
                + 2 * n_pad * (d_cls * HIDDEN + HIDDEN * HIDDEN + HIDDEN * LANE))
    bytes_acc = int(pooled_c.size * 2 + pg_cm.size * 2 + interior.size * 4
                    + 2 * n_pad * LANE * 4 + (HEAT_ROWS + GRID_CH) * s_total * 4
                    + 8192)

    logits_slab, probs_slab, grid_slab, x_slab = pl.pallas_call(
        _grid_rcnn_kernel,
        grid=(n_blocks,),
        in_specs=in_specs,
        out_specs=out_specs,
        out_shape=out_shape,
        compiler_params=pltpu.CompilerParams(
            dimension_semantics=("parallel",)),
        cost_estimate=pl.CostEstimate(
            flops=flops, transcendentals=int(n_pad * LANE),
            bytes_accessed=bytes_acc),
    )(pooled_c, w1, params["b1"], w2, params["b2"], wc_slab, bc_slab, cls_mask,
      pg_cm, interior,
      gw1t, gb1t, gw2t, gb2t, gw3t, gb3t,
      ow_slab, ob_slab)

    # ---- post-processing (cls_post_processor / grid unpack) -------------------
    class_logits = logits_slab[:n, :NUM_CLASSES]
    class_probs = probs_slab[:n, :NUM_CLASSES]
    scores = jnp.max(class_probs[:, 1:], axis=-1)
    labels = jnp.argmax(class_probs[:, 1:], axis=-1) + 1
    # TODO(synk): cls_post_processor NMS / score-threshold filtering omitted
    # (dynamic output shapes); all proposals are kept.

    grid4 = grid_slab.reshape(HEAT_ROWS, n_pad, GRID_PADDED, GRID_PADDED)
    grid_logits = jnp.transpose(grid4[:GRID_POINTS, :n, 1:-1, 1:-1], (1, 0, 2, 3))
    x4 = x_slab.reshape(GRID_CH, n_pad, GRID_PADDED, GRID_PADDED)
    x_feat = jnp.transpose(x4[:, :n, 1:-1, 1:-1], (1, 0, 2, 3))
    # TODO(synk): grid_post_processor heatmap->box decoding omitted; raw grid
    # heatmaps are returned in the result dict instead.

    result = {
        "boxes": proposals,
        "class_logits": class_logits,
        "scores": scores,
        "labels": labels,
        "grid_logits": grid_logits,
    }
    return x_feat, result, {}


# ------------------------------------ main ------------------------------------
if __name__ == "__main__":
    key = jax.random.PRNGKey(0)
    k_feat, k_prop, k_param = jax.random.split(key, 3)

    B, C, H, W = 2, 4, 16, 16
    features = jax.random.normal(k_feat, (B, C, H, W), dtype=jnp.float32)

    # 16 deterministic proposals: (batch_idx, x1, y1, x2, y2) in image coords.
    N = 16
    kx, ky, kw, kh = jax.random.split(k_prop, 4)
    bidx = (jnp.arange(N) % B).astype(jnp.float32)
    x1 = jax.random.uniform(kx, (N,), minval=0.0, maxval=5.0)
    y1 = jax.random.uniform(ky, (N,), minval=0.0, maxval=5.0)
    bw = jax.random.uniform(kw, (N,), minval=5.0, maxval=10.0)
    bh = jax.random.uniform(kh, (N,), minval=5.0, maxval=10.0)
    proposals = jnp.stack(
        [bidx, x1, y1, jnp.minimum(x1 + bw, 15.0), jnp.minimum(y1 + bh, 15.0)],
        axis=1)

    params = make_params(k_param, C)

    x, result, losses = grid_rcnn_forward(features, proposals, params)
    jax.block_until_ready((x, result))

    assert x.shape == (N, GRID_CH, GRID_POOL, GRID_POOL)
    assert result["class_logits"].shape == (N, NUM_CLASSES)
    assert result["grid_logits"].shape == (N, GRID_POINTS, GRID_POOL, GRID_POOL)
    assert result["scores"].shape == (N,)
    assert bool(jnp.all(jnp.isfinite(result["class_logits"])))
    assert bool(jnp.all(jnp.isfinite(result["grid_logits"])))
    assert bool(jnp.all(jnp.isfinite(x)))
    assert losses == {}
    print("KERNEL_OK")
</pallas_src>

<mosaic_0001>
module attributes {stable_mosaic.version = 11 : i64} {
  func.func @_grid_rcnn_kernel(%arg0: i32, %arg1: memref<8x196xbf16, #tpu.memory_space<vmem>>, %arg2: memref<196x32xbf16, #tpu.memory_space<vmem>>, %arg3: memref<1x32xf32, #tpu.memory_space<vmem>>, %arg4: memref<32x32xbf16, #tpu.memory_space<vmem>>, %arg5: memref<1x32xf32, #tpu.memory_space<vmem>>, %arg6: memref<32x128xbf16, #tpu.memory_space<vmem>>, %arg7: memref<1x128xf32, #tpu.memory_space<vmem>>, %arg8: memref<1x128xf32, #tpu.memory_space<vmem>>, %arg9: memref<8x2048xbf16, #tpu.memory_space<vmem>>, %arg10: memref<1x2048xf32, #tpu.memory_space<vmem>>, %arg11: memref<8x72xbf16, #tpu.memory_space<vmem>>, %arg12: memref<8x1xf32, #tpu.memory_space<vmem>>, %arg13: memref<8x72xbf16, #tpu.memory_space<vmem>>, %arg14: memref<8x1xf32, #tpu.memory_space<vmem>>, %arg15: memref<8x72xbf16, #tpu.memory_space<vmem>>, %arg16: memref<8x1xf32, #tpu.memory_space<vmem>>, %arg17: memref<16x16xbf16, #tpu.memory_space<vmem>>, %arg18: memref<16x1xf32, #tpu.memory_space<vmem>>, %arg19: memref<8x128xf32, #tpu.memory_space<vmem>>, %arg20: memref<8x128xf32, #tpu.memory_space<vmem>>, %arg21: memref<16x2048xf32, #tpu.memory_space<vmem>>, %arg22: memref<8x2048xf32, #tpu.memory_space<vmem>>) attributes {dimension_semantics = [#tpu.dimension_semantics<parallel>], iteration_bounds = array<i64: 2>, scalar_prefetch = 0 : i64, scratch_operands = 0 : i64, tpu.core_type = #tpu.core_type<tc>, window_params = [{transform_indices = @transform_0, window_bounds = array<i64: 8, 196>}, {pipeline_mode = #tpu.pipeline_mode<synchronous>, transform_indices = @transform_1, window_bounds = array<i64: 196, 32>}, {pipeline_mode = #tpu.pipeline_mode<synchronous>, transform_indices = @transform_2, window_bounds = array<i64: 1, 32>}, {pipeline_mode = #tpu.pipeline_mode<synchronous>, transform_indices = @transform_3, window_bounds = array<i64: 32, 32>}, {pipeline_mode = #tpu.pipeline_mode<synchronous>, transform_indices = @transform_4, window_bounds = array<i64: 1, 32>}, {pipeline_mode = #tpu.pipeline_mode<synchronous>, transform_indices = @transform_5, window_bounds = array<i64: 32, 128>}, {pipeline_mode = #tpu.pipeline_mode<synchronous>, transform_indices = @transform_6, window_bounds = array<i64: 1, 128>}, {pipeline_mode = #tpu.pipeline_mode<synchronous>, transform_indices = @transform_7, window_bounds = array<i64: 1, 128>}, {transform_indices = @transform_8, window_bounds = array<i64: 8, 2048>}, {transform_indices = @transform_9, window_bounds = array<i64: 1, 2048>}, {pipeline_mode = #tpu.pipeline_mode<synchronous>, transform_indices = @transform_10, window_bounds = array<i64: 8, 72>}, {pipeline_mode = #tpu.pipeline_mode<synchronous>, transform_indices = @transform_11, window_bounds = array<i64: 8, 1>}, {pipeline_mode = #tpu.pipeline_mode<synchronous>, transform_indices = @transform_12, window_bounds = array<i64: 8, 72>}, {pipeline_mode = #tpu.pipeline_mode<synchronous>, transform_indices = @transform_13, window_bounds = array<i64: 8, 1>}, {pipeline_mode = #tpu.pipeline_mode<synchronous>, transform_indices = @transform_14, window_bounds = array<i64: 8, 72>}, {pipeline_mode = #tpu.pipeline_mode<synchronous>, transform_indices = @transform_15, window_bounds = array<i64: 8, 1>}, {pipeline_mode = #tpu.pipeline_mode<synchronous>, transform_indices = @transform_16, window_bounds = array<i64: 16, 16>}, {pipeline_mode = #tpu.pipeline_mode<synchronous>, transform_indices = @transform_17, window_bounds = array<i64: 16, 1>}, {transform_indices = @transform_18, window_bounds = array<i64: 8, 128>}, {transform_indices = @transform_19, window_bounds = array<i64: 8, 128>}, {transform_indices = @transform_20, window_bounds = array<i64: 16, 2048>}, {transform_indices = @transform_21, window_bounds = array<i64: 8, 2048>}]} {
    %c0 = arith.constant 0 : index
    %c0_0 = arith.constant 0 : index
    %0 = vector.load %arg1[%c0, %c0_0] : memref<8x196xbf16, #tpu.memory_space<vmem>>, vector<8x196xbf16>
    %c0_1 = arith.constant 0 : index
    %c0_2 = arith.constant 0 : index
    %1 = vector.load %arg2[%c0_1, %c0_2] : memref<196x32xbf16, #tpu.memory_space<vmem>>, vector<196x32xbf16>
    %cst = arith.constant dense<0.000000e+00> : vector<8x32xf32>
    %2 = tpu.matmul %0, %1, %cst {dimension_numbers = #tpu.dot_dimension_numbers<[1], [0], [0], [1], [0, 0, 1, 1], [], []>} : vector<8x196xbf16>, vector<196x32xbf16>, vector<8x32xf32> -> vector<8x32xf32>
    %c0_3 = arith.constant 0 : index
    %c0_4 = arith.constant 0 : index
    %3 = vector.load %arg3[%c0_3, %c0_4] : memref<1x32xf32, #tpu.memory_space<vmem>>, vector<1x32xf32>
    %4 = vector.broadcast %3 : vector<1x32xf32> to vector<8x32xf32>
    %5 = arith.addf %2, %4 : vector<8x32xf32>
    %cst_5 = arith.constant 0.000000e+00 : f32
    %6 = vector.broadcast %cst_5 : f32 to vector<8x32xf32>
    %7 = arith.maximumf %5, %6 : vector<8x32xf32>
    %8 = arith.truncf %7 : vector<8x32xf32> to vector<8x32xbf16>
    %c0_6 = arith.constant 0 : index
    %c0_7 = arith.constant 0 : index
    %9 = vector.load %arg4[%c0_6, %c0_7] : memref<32x32xbf16, #tpu.memory_space<vmem>>, vector<32x32xbf16>
    %cst_8 = arith.constant dense<0.000000e+00> : vector<8x32xf32>
    %10 = tpu.matmul %8, %9, %cst_8 {dimension_numbers = #tpu.dot_dimension_numbers<[1], [0], [0], [1], [0, 0, 1, 1], [], []>} : vector<8x32xbf16>, vector<32x32xbf16>, vector<8x32xf32> -> vector<8x32xf32>
    %c0_9 = arith.constant 0 : index
    %c0_10 = arith.constant 0 : index
    %11 = vector.load %arg5[%c0_9, %c0_10] : memref<1x32xf32, #tpu.memory_space<vmem>>, vector<1x32xf32>
    %12 = vector.broadcast %11 : vector<1x32xf32> to vector<8x32xf32>
    %13 = arith.addf %10, %12 : vector<8x32xf32>
    %cst_11 = arith.constant 0.000000e+00 : f32
    %14 = vector.broadcast %cst_11 : f32 to vector<8x32xf32>
    %15 = arith.maximumf %13, %14 : vector<8x32xf32>
    %16 = arith.truncf %15 : vector<8x32xf32> to vector<8x32xbf16>
    %c0_12 = arith.constant 0 : index
    %c0_13 = arith.constant 0 : index
    %17 = vector.load %arg6[%c0_12, %c0_13] : memref<32x128xbf16, #tpu.memory_space<vmem>>, vector<32x128xbf16>
    %cst_14 = arith.constant dense<0.000000e+00> : vector<8x128xf32>
    %18 = tpu.matmul %16, %17, %cst_14 {dimension_numbers = #tpu.dot_dimension_numbers<[1], [0], [0], [1], [0, 0, 1, 1], [], []>} : vector<8x32xbf16>, vector<32x128xbf16>, vector<8x128xf32> -> vector<8x128xf32>
    %c0_15 = arith.constant 0 : index
    %c0_16 = arith.constant 0 : index
    %19 = vector.load %arg7[%c0_15, %c0_16] : memref<1x128xf32, #tpu.memory_space<vmem>>, vector<1x128xf32>
    %20 = vector.broadcast %19 : vector<1x128xf32> to vector<8x128xf32>
    %21 = arith.addf %18, %20 : vector<8x128xf32>
    %c0_17 = arith.constant 0 : index
    %c0_18 = arith.constant 0 : index
    %22 = vector.load %arg19[%c0_17, %c0_18] : memref<8x128xf32, #tpu.memory_space<vmem>>, vector<8x128xf32>
    tpu.vector_store %arg19[%c0_17, %c0_18], %21 {strides = array<i32>} : memref<8x128xf32, #tpu.memory_space<vmem>>, vector<8x128xf32>,
    %c0_19 = arith.constant 0 : index
    %c0_20 = arith.constant 0 : index
    %23 = vector.load %arg8[%c0_19, %c0_20] : memref<1x128xf32, #tpu.memory_space<vmem>>, vector<1x128xf32>
    %cst_21 = arith.constant 1.000000e+00 : f32
    %24 = vector.broadcast %cst_21 : f32 to vector<1x128xf32>
    %25 = arith.subf %24, %23 : vector<1x128xf32>
    %cst_22 = arith.constant 1.000000e+30 : f32
    %26 = vector.broadcast %cst_22 : f32 to vector<1x128xf32>
    %27 = arith.mulf %25, %26 : vector<1x128xf32>
    %28 = vector.broadcast %27 : vector<1x128xf32> to vector<8x128xf32>
    %29 = arith.subf %21, %28 : vector<8x128xf32>
    %cst_23 = arith.constant dense<0xFF800000> : vector<8xf32>
    %30 = vector.multi_reduction <maximumf>, %29, %cst_23 [1] : vector<8x128xf32> to vector<8xf32>
    %31 = vector.shape_cast %30 : vector<8xf32> to vector<8x1xf32>
    %32 = vector.broadcast %31 : vector<8x1xf32> to vector<8x128xf32>
    %33 = arith.subf %29, %32 : vector<8x128xf32>
    %34 = math.exp %33 : vector<8x128xf32>
    %cst_24 = arith.constant dense<0.000000e+00> : vector<8xf32>
    %35 = vector.multi_reduction <add>, %34, %cst_24 [1] : vector<8x128xf32> to vector<8xf32>
    %36 = vector.shape_cast %35 : vector<8xf32> to vector<8x1xf32>
    %37 = vector.broadcast %36 : vector<8x1xf32> to vector<8x128xf32>
    %38 = arith.divf %34, %37 : vector<8x128xf32>
    %c0_25 = arith.constant 0 : index
    %c0_26 = arith.constant 0 : index
    %39 = vector.load %arg20[%c0_25, %c0_26] : memref<8x128xf32, #tpu.memory_space<vmem>>, vector<8x128xf32>
    tpu.vector_store %arg20[%c0_25, %c0_26], %38 {strides = array<i32>} : memref<8x128xf32, #tpu.memory_space<vmem>>, vector<8x128xf32>,
    %c0_27 = arith.constant 0 : index
    %c0_28 = arith.constant 0 : index
    %40 = vector.load %arg10[%c0_27, %c0_28] : memref<1x2048xf32, #tpu.memory_space<vmem>>, vector<1x2048xf32>
    %c0_29 = arith.constant 0 : index
    %c0_30 = arith.constant 0 : index
    %41 = vector.load %arg9[%c0_29, %c0_30] : memref<8x2048xbf16, #tpu.memory_space<vmem>>, vector<8x2048xbf16>
    %42 = arith.extf %41 : vector<8x2048xbf16> to vector<8x2048xf32>
    %c17_i32 = arith.constant 17 : i32
    %43 = tpu.dynamic_rotate %42 by %c17_i32 dim 1 : vector<8x2048xf32>, i32 -> vector<8x2048xf32>
    %c16_i32 = arith.constant 16 : i32
    %44 = tpu.dynamic_rotate %42 by %c16_i32 dim 1 : vector<8x2048xf32>, i32 -> vector<8x2048xf32>
    %c15_i32 = arith.constant 15 : i32
    %45 = tpu.dynamic_rotate %42 by %c15_i32 dim 1 : vector<8x2048xf32>, i32 -> vector<8x2048xf32>
    %c1_i32 = arith.constant 1 : i32
    %46 = tpu.dynamic_rotate %42 by %c1_i32 dim 1 : vector<8x2048xf32>, i32 -> vector<8x2048xf32>
    %c2047_i32 = arith.constant 2047 : i32
    %47 = tpu.dynamic_rotate %42 by %c2047_i32 dim 1 : vector<8x2048xf32>, i32 -> vector<8x2048xf32>
    %c2033_i32 = arith.constant 2033 : i32
    %48 = tpu.dynamic_rotate %42 by %c2033_i32 dim 1 : vector<8x2048xf32>, i32 -> vector<8x2048xf32>
    %c2032_i32 = arith.constant 2032 : i32
    %49 = tpu.dynamic_rotate %42 by %c2032_i32 dim 1 : vector<8x2048xf32>, i32 -> vector<8x2048xf32>
    %c2031_i32 = arith.constant 2031 : i32
    %50 = tpu.dynamic_rotate %42 by %c2031_i32 dim 1 : vector<8x2048xf32>, i32 -> vector<8x2048xf32>
    %51 = tpu.concatenate %43, %44, %45, %46, %42, %47, %48, %49, %50 in 0 : vector<8x2048xf32>, vector<8x2048xf32>, vector<8x2048xf32>, vector<8x2048xf32>, vector<8x2048xf32>, vector<8x2048xf32>, vector<8x2048xf32>, vector<8x2048xf32>, vector<8x2048xf32> -> vector<72x2048xf32>
    %52 = arith.truncf %51 : vector<72x2048xf32> to vector<72x2048xbf16>
    %c0_31 = arith.constant 0 : index
    %c0_32 = arith.constant 0 : index
    %53 = vector.load %arg11[%c0_31, %c0_32] : memref<8x72xbf16, #tpu.memory_space<vmem>>, vector<8x72xbf16>
    %cst_33 = arith.constant dense<0.000000e+00> : vector<8x2048xf32>
    %54 = tpu.matmul %53, %52, %cst_33 {dimension_numbers = #tpu.dot_dimension_numbers<[1], [0], [0], [1], [0, 0, 1, 1], [], []>} : vector<8x72xbf16>, vector<72x2048xbf16>, vector<8x2048xf32> -> vector<8x2048xf32>
    %c0_34 = arith.constant 0 : index
    %c0_35 = arith.constant 0 : index
    %55 = vector.load %arg12[%c0_34, %c0_35] : memref<8x1xf32, #tpu.memory_space<vmem>>, vector<8x1xf32>
    %56 = vector.broadcast %55 : vector<8x1xf32> to vector<8x2048xf32>
    %57 = arith.addf %54, %56 : vector<8x2048xf32>
    %cst_36 = arith.constant 0.000000e+00 : f32
    %58 = vector.broadcast %cst_36 : f32 to vector<8x2048xf32>
    %59 = arith.maximumf %57, %58 : vector<8x2048xf32>
    %60 = vector.broadcast %40 : vector<1x2048xf32> to vector<8x2048xf32>
    %61 = arith.mulf %59, %60 : vector<8x2048xf32>
    %c17_i32_37 = arith.constant 17 : i32
    %62 = tpu.dynamic_rotate %61 by %c17_i32_37 dim 1 : vector<8x2048xf32>, i32 -> vector<8x2048xf32>
    %c16_i32_38 = arith.constant 16 : i32
    %63 = tpu.dynamic_rotate %61 by %c16_i32_38 dim 1 : vector<8x2048xf32>, i32 -> vector<8x2048xf32>
    %c15_i32_39 = arith.constant 15 : i32
    %64 = tpu.dynamic_rotate %61 by %c15_i32_39 dim 1 : vector<8x2048xf32>, i32 -> vector<8x2048xf32>
    %c1_i32_40 = arith.constant 1 : i32
    %65 = tpu.dynamic_rotate %61 by %c1_i32_40 dim 1 : vector<8x2048xf32>, i32 -> vector<8x2048xf32>
    %c2047_i32_41 = arith.constant 2047 : i32
    %66 = tpu.dynamic_rotate %61 by %c2047_i32_41 dim 1 : vector<8x2048xf32>, i32 -> vector<8x2048xf32>
    %c2033_i32_42 = arith.constant 2033 : i32
    %67 = tpu.dynamic_rotate %61 by %c2033_i32_42 dim 1 : vector<8x2048xf32>, i32 -> vector<8x2048xf32>
    %c2032_i32_43 = arith.constant 2032 : i32
    %68 = tpu.dynamic_rotate %61 by %c2032_i32_43 dim 1 : vector<8x2048xf32>, i32 -> vector<8x2048xf32>
    %c2031_i32_44 = arith.constant 2031 : i32
    %69 = tpu.dynamic_rotate %61 by %c2031_i32_44 dim 1 : vector<8x2048xf32>, i32 -> vector<8x2048xf32>
    %70 = tpu.concatenate %62, %63, %64, %65, %61, %66, %67, %68, %69 in 0 : vector<8x2048xf32>, vector<8x2048xf32>, vector<8x2048xf32>, vector<8x2048xf32>, vector<8x2048xf32>, vector<8x2048xf32>, vector<8x2048xf32>, vector<8x2048xf32>, vector<8x2048xf32> -> vector<72x2048xf32>
    %71 = arith.truncf %70 : vector<72x2048xf32> to vector<72x2048xbf16>
    %c0_45 = arith.constant 0 : index
    %c0_46 = arith.constant 0 : index
    %72 = vector.load %arg13[%c0_45, %c0_46] : memref<8x72xbf16, #tpu.memory_space<vmem>>, vector<8x72xbf16>
    %cst_47 = arith.constant dense<0.000000e+00> : vector<8x2048xf32>
    %73 = tpu.matmul %72, %71, %cst_47 {dimension_numbers = #tpu.dot_dimension_numbers<[1], [0], [0], [1], [0, 0, 1, 1], [], []>} : vector<8x72xbf16>, vector<72x2048xbf16>, vector<8x2048xf32> -> vector<8x2048xf32>
    %c0_48 = arith.constant 0 : index
    %c0_49 = arith.constant 0 : index
    %74 = vector.load %arg14[%c0_48, %c0_49] : memref<8x1xf32, #tpu.memory_space<vmem>>, vector<8x1xf32>
    %75 = vector.broadcast %74 : vector<8x1xf32> to vector<8x2048xf32>
    %76 = arith.addf %73, %75 : vector<8x2048xf32>
    %cst_50 = arith.constant 0.000000e+00 : f32
    %77 = vector.broadcast %cst_50 : f32 to vector<8x2048xf32>
    %78 = arith.maximumf %76, %77 : vector<8x2048xf32>
    %79 = vector.broadcast %40 : vector<1x2048xf32> to vector<8x2048xf32>
    %80 = arith.mulf %78, %79 : vector<8x2048xf32>
    %c17_i32_51 = arith.constant 17 : i32
    %81 = tpu.dynamic_rotate %80 by %c17_i32_51 dim 1 : vector<8x2048xf32>, i32 -> vector<8x2048xf32>
    %c16_i32_52 = arith.constant 16 : i32
    %82 = tpu.dynamic_rotate %80 by %c16_i32_52 dim 1 : vector<8x2048xf32>, i32 -> vector<8x2048xf32>
    %c15_i32_53 = arith.constant 15 : i32
    %83 = tpu.dynamic_rotate %80 by %c15_i32_53 dim 1 : vector<8x2048xf32>, i32 -> vector<8x2048xf32>
    %c1_i32_54 = arith.constant 1 : i32
    %84 = tpu.dynamic_rotate %80 by %c1_i32_54 dim 1 : vector<8x2048xf32>, i32 -> vector<8x2048xf32>
    %c2047_i32_55 = arith.constant 2047 : i32
    %85 = tpu.dynamic_rotate %80 by %c2047_i32_55 dim 1 : vector<8x2048xf32>, i32 -> vector<8x2048xf32>
    %c2033_i32_56 = arith.constant 2033 : i32
    %86 = tpu.dynamic_rotate %80 by %c2033_i32_56 dim 1 : vector<8x2048xf32>, i32 -> vector<8x2048xf32>
    %c2032_i32_57 = arith.constant 2032 : i32
    %87 = tpu.dynamic_rotate %80 by %c2032_i32_57 dim 1 : vector<8x2048xf32>, i32 -> vector<8x2048xf32>
    %c2031_i32_58 = arith.constant 2031 : i32
    %88 = tpu.dynamic_rotate %80 by %c2031_i32_58 dim 1 : vector<8x2048xf32>, i32 -> vector<8x2048xf32>
    %89 = tpu.concatenate %81, %82, %83, %84, %80, %85, %86, %87, %88 in 0 : vector<8x2048xf32>, vector<8x2048xf32>, vector<8x2048xf32>, vector<8x2048xf32>, vector<8x2048xf32>, vector<8x2048xf32>, vector<8x2048xf32>, vector<8x2048xf32>, vector<8x2048xf32> -> vector<72x2048xf32>
    %90 = arith.truncf %89 : vector<72x2048xf32> to vector<72x2048xbf16>
    %c0_59 = arith.constant 0 : index
    %c0_60 = arith.constant 0 : index
    %91 = vector.load %arg15[%c0_59, %c0_60] : memref<8x72xbf16, #tpu.memory_space<vmem>>, vector<8x72xbf16>
    %cst_61 = arith.constant dense<0.000000e+00> : vector<8x2048xf32>
    %92 = tpu.matmul %91, %90, %cst_61 {dimension_numbers = #tpu.dot_dimension_numbers<[1], [0], [0], [1], [0, 0, 1, 1], [], []>} : vector<8x72xbf16>, vector<72x2048xbf16>, vector<8x2048xf32> -> vector<8x2048xf32>
    %c0_62 = arith.constant 0 : index
    %c0_63 = arith.constant 0 : index
    %93 = vector.load %arg16[%c0_62, %c0_63] : memref<8x1xf32, #tpu.memory_space<vmem>>, vector<8x1xf32>
    %94 = vector.broadcast %93 : vector<8x1xf32> to vector<8x2048xf32>
    %95 = arith.addf %92, %94 : vector<8x2048xf32>
    %cst_64 = arith.constant 0.000000e+00 : f32
    %96 = vector.broadcast %cst_64 : f32 to vector<8x2048xf32>
    %97 = arith.maximumf %95, %96 : vector<8x2048xf32>
    %98 = vector.broadcast %40 : vector<1x2048xf32> to vector<8x2048xf32>
    %99 = arith.mulf %97, %98 : vector<8x2048xf32>
    %c0_65 = arith.constant 0 : index
    %c0_66 = arith.constant 0 : index
    %100 = vector.load %arg22[%c0_65, %c0_66] : memref<8x2048xf32, #tpu.memory_space<vmem>>, vector<8x2048xf32>
    tpu.vector_store %arg22[%c0_65, %c0_66], %80 {strides = array<i32>} : memref<8x2048xf32, #tpu.memory_space<vmem>>, vector<8x2048xf32>,
    %101 = tpu.concatenate %80, %99 in 0 : vector<8x2048xf32>, vector<8x2048xf32> -> vector<16x2048xf32>
    %102 = arith.truncf %101 : vector<16x2048xf32> to vector<16x2048xbf16>
    %c0_67 = arith.constant 0 : index
    %c0_68 = arith.constant 0 : index
    %103 = vector.load %arg17[%c0_67, %c0_68] : memref<16x16xbf16, #tpu.memory_space<vmem>>, vector<16x16xbf16>
    %cst_69 = arith.constant dense<0.000000e+00> : vector<16x2048xf32>
    %104 = tpu.matmul %103, %102, %cst_69 {dimension_numbers = #tpu.dot_dimension_numbers<[1], [0], [0], [1], [0, 0, 1, 1], [], []>} : vector<16x16xbf16>, vector<16x2048xbf16>, vector<16x2048xf32> -> vector<16x2048xf32>
    %c0_70 = arith.constant 0 : index
    %c0_71 = arith.constant 0 : index
    %105 = vector.load %arg18[%c0_70, %c0_71] : memref<16x1xf32, #tpu.memory_space<vmem>>, vector<16x1xf32>
    %106 = vector.broadcast %105 : vector<16x1xf32> to vector<16x2048xf32>
    %107 = arith.addf %104, %106 : vector<16x2048xf32>
    %c0_72 = arith.constant 0 : index
    %c0_73 = arith.constant 0 : index
    %108 = vector.load %arg21[%c0_72, %c0_73] : memref<16x2048xf32, #tpu.memory_space<vmem>>, vector<16x2048xf32>
    tpu.vector_store %arg21[%c0_72, %c0_73], %107 {strides = array<i32>} : memref<16x2048xf32, #tpu.memory_space<vmem>>, vector<16x2048xf32>,
    return
  }
  func.func @transform_0(%arg0: i32) -> (i32, i32) {
    %c0_i32 = arith.constant 0 : i32
    %c0_i32_0 = arith.constant 0 : i32
    return %arg0, %c0_i32 : i32, i32
  }
  func.func @transform_1(%arg0: i32) -> (i32, i32) {
    %c0_i32 = arith.constant 0 : i32
    %c0_i32_0 = arith.constant 0 : i32
    %c0_i32_1 = arith.constant 0 : i32
    return %c0_i32, %c0_i32_0 : i32, i32
  }
  func.func @transform_2(%arg0: i32) -> (i32, i32) {
    %c0_i32 = arith.constant 0 : i32
    %c0_i32_0 = arith.constant 0 : i32
    %c0_i32_1 = arith.constant 0 : i32
    return %c0_i32, %c0_i32_0 : i32, i32
  }
  func.func @transform_3(%arg0: i32) -> (i32, i32) {
    %c0_i32 = arith.constant 0 : i32
    %c0_i32_0 = arith.constant 0 : i32
    %c0_i32_1 = arith.constant 0 : i32
    return %c0_i32, %c0_i32_0 : i32, i32
  }
  func.func @transform_4(%arg0: i32) -> (i32, i32) {
    %c0_i32 = arith.constant 0 : i32
    %c0_i32_0 = arith.constant 0 : i32
    %c0_i32_1 = arith.constant 0 : i32
    return %c0_i32, %c0_i32_0 : i32, i32
  }
  func.func @transform_5(%arg0: i32) -> (i32, i32) {
    %c0_i32 = arith.constant 0 : i32
    %c0_i32_0 = arith.constant 0 : i32
    %c0_i32_1 = arith.constant 0 : i32
    return %c0_i32, %c0_i32_0 : i32, i32
  }
  func.func @transform_6(%arg0: i32) -> (i32, i32) {
    %c0_i32 = arith.constant 0 : i32
    %c0_i32_0 = arith.constant 0 : i32
    %c0_i32_1 = arith.constant 0 : i32
    return %c0_i32, %c0_i32_0 : i32, i32
  }
  func.func @transform_7(%arg0: i32) -> (i32, i32) {
    %c0_i32 = arith.constant 0 : i32
    %c0_i32_0 = arith.constant 0 : i32
    %c0_i32_1 = arith.constant 0 : i32
    return %c0_i32, %c0_i32_0 : i32, i32
  }
  func.func @transform_8(%arg0: i32) -> (i32, i32) {
    %c0_i32 = arith.constant 0 : i32
    %c0_i32_0 = arith.constant 0 : i32
    return %c0_i32, %arg0 : i32, i32
  }
  func.func @transform_9(%arg0: i32) -> (i32, i32) {
    %c0_i32 = arith.constant 0 : i32
    %c0_i32_0 = arith.constant 0 : i32
    return %c0_i32, %arg0 : i32, i32
  }
  func.func @transform_10(%arg0: i32) -> (i32, i32) {
    %c0_i32 = arith.constant 0 : i32
    %c0_i32_0 = arith.constant 0 : i32
    %c0_i32_1 = arith.constant 0 : i32
    return %c0_i32, %c0_i32_0 : i32, i32
  }
  func.func @transform_11(%arg0: i32) -> (i32, i32) {
    %c0_i32 = arith.constant 0 : i32
    %c0_i32_0 = arith.constant 0 : i32
    %c0_i32_1 = arith.constant 0 : i32
    return %c0_i32, %c0_i32_0 : i32, i32
  }
  func.func @transform_12(%arg0: i32) -> (i32, i32) {
    %c0_i32 = arith.constant 0 : i32
    %c0_i32_0 = arith.constant 0 : i32
    %c0_i32_1 = arith.constant 0 : i32
    return %c0_i32, %c0_i32_0 : i32, i32
  }
  func.func @transform_13(%arg0: i32) -> (i32, i32) {
    %c0_i32 = arith.constant 0 : i32
    %c0_i32_0 = arith.constant 0 : i32
    %c0_i32_1 = arith.constant 0 : i32
    return %c0_i32, %c0_i32_0 : i32, i32
  }
  func.func @transform_14(%arg0: i32) -> (i32, i32) {
    %c0_i32 = arith.constant 0 : i32
    %c0_i32_0 = arith.constant 0 : i32
    %c0_i32_1 = arith.constant 0 : i32
    return %c0_i32, %c0_i32_0 : i32, i32
  }
  func.func @transform_15(%arg0: i32) -> (i32, i32) {
    %c0_i32 = arith.constant 0 : i32
    %c0_i32_0 = arith.constant 0 : i32
    %c0_i32_1 = arith.constant 0 : i32
    return %c0_i32, %c0_i32_0 : i32, i32
  }
  func.func @transform_16(%arg0: i32) -> (i32, i32) {
    %c0_i32 = arith.constant 0 : i32
    %c0_i32_0 = arith.constant 0 : i32
    %c0_i32_1 = arith.constant 0 : i32
    return %c0_i32, %c0_i32_0 : i32, i32
  }
  func.func @transform_17(%arg0: i32) -> (i32, i32) {
    %c0_i32 = arith.constant 0 : i32
    %c0_i32_0 = arith.constant 0 : i32
    %c0_i32_1 = arith.constant 0 : i32
    return %c0_i32, %c0_i32_0 : i32, i32
  }
  func.func @transform_18(%arg0: i32) -> (i32, i32) {
    %c0_i32 = arith.constant 0 : i32
    %c0_i32_0 = arith.constant 0 : i32
    return %arg0, %c0_i32 : i32, i32
  }
  func.func @transform_19(%arg0: i32) -> (i32, i32) {
    %c0_i32 = arith.constant 0 : i32
    %c0_i32_0 = arith.constant 0 : i32
    return %arg0, %c0_i32 : i32, i32
  }
  func.func @transform_20(%arg0: i32) -> (i32, i32) {
    %c0_i32 = arith.constant 0 : i32
    %c0_i32_0 = arith.constant 0 : i32
    return %c0_i32, %arg0 : i32, i32
  }
  func.func @transform_21(%arg0: i32) -> (i32, i32) {
    %c0_i32 = arith.constant 0 : i32
    %c0_i32_0 = arith.constant 0 : i32
    return %c0_i32, %arg0 : i32, i32
  }
}

</mosaic_0001>

<bundles_post_ra>
// kernel: grid_rcnn_forward.1
= control target key start
LH: loop header
LB: loop body
LE: loop exit
PB: predicated region body
PF: predicated region fallthrough
CT: control target
= control target key end

     0   :  { %s9376_s0 = inlined_call_operand.vmem [shape: bf16[16,196], index: 0, kind: input, shape index: {}]   ;;  %s9377_s1 = inlined_call_operand.vmem [shape: bf16[196,32], index: 1, kind: input, shape index: {}]   ;;  %s9378_s2 = inlined_call_operand.vmem [shape: f32[1,32], index: 2, kind: input, shape index: {}]   ;;  %s9379_s3 = inlined_call_operand.vmem [shape: bf16[32,32], index: 3, kind: input, shape index: {}]   ;;  %s9380_s4 = inlined_call_operand.vmem [shape: f32[1,32], index: 4, kind: input, shape index: {}]   ;;  %s9381_s5 = inlined_call_operand.vmem [shape: bf16[32,128], index: 5, kind: input, shape index: {}]   ;;  %s9382_s6 = inlined_call_operand.vmem [shape: f32[1,128], index: 6, kind: input, shape index: {}]   ;;  %s9383_s7 = inlined_call_operand.vmem [shape: f32[1,128], index: 7, kind: input, shape index: {}]   ;;  %s9384_s8 = inlined_call_operand.vmem [shape: bf16[8,4096], index: 8, kind: input, shape index: {}]   ;;  %s9385_s9 = inlined_call_operand.vmem [shape: f32[1,4096], index: 9, kind: input, shape index: {}]   ;;  %s9386_s10 = inlined_call_operand.vmem [shape: bf16[8,72], index: 10, kind: input, shape index: {}]   ;;  %s9387_s11 = inlined_call_operand.vmem [shape: f32[8,1], index: 11, kind: input, shape index: {}]   ;;  %s9388_s12 = inlined_call_operand.vmem [shape: bf16[8,72], index: 12, kind: input, shape index: {}]   ;;  %s9389_s13 = inlined_call_operand.vmem [shape: f32[8,1], index: 13, kind: input, shape index: {}]   ;;  %s9390_s14 = inlined_call_operand.vmem [shape: bf16[8,72], index: 14, kind: input, shape index: {}]   ;;  %s9391_s15 = inlined_call_operand.vmem [shape: f32[8,1], index: 15, kind: input, shape index: {}]   ;;  %s9392_s16 = inlined_call_operand.vmem [shape: bf16[16,16], index: 16, kind: input, shape index: {}]   ;;  %s9393_s17 = inlined_call_operand.vmem [shape: f32[16,1], index: 17, kind: input, shape index: {}]   ;;  %s9394_s18 = inlined_call_operand.vmem [shape: f32[16,128], index: 18, kind: output, shape index: {0}]   ;;  %s9395_s19 = inlined_call_operand.vmem [shape: f32[16,128], index: 19, kind: output, shape index: {1}]   ;;  %s9396_s20 = inlined_call_operand.vmem [shape: f32[16,4096], index: 20, kind: output, shape index: {2}]   ;;  %s9397_s21 = inlined_call_operand.vmem [shape: f32[8,4096], index: 21, kind: output, shape index: {3}]  }
   0x1   :  { %9686 = sst [smem:[#allocation66_spill]] %s9376_s0 }
   0x2   :  { %9687 = sst [smem:[#allocation67_spill]] %s9377_s1 }
   0x3   :  { %9688 = sst [smem:[#allocation68_spill]] %s9378_s2 }
   0x4   :  { %9689 = sst [smem:[#allocation69_spill]] %s9379_s3 }
   0x5   :  { %9690 = sst [smem:[#allocation70_spill]] %s9380_s4 }
   0x6   :  { %9691 = sst [smem:[#allocation71_spill]] %s9381_s5 }
   0x7   :  { %9692 = sst [smem:[#allocation72_spill]] %s9382_s6 }
   0x8   :  { %9693 = sst [smem:[#allocation73_spill]] %s9383_s7 }
   0x9   :  { %9694 = sst [smem:[#allocation74_spill]] %s9384_s8 }
   0xa   :  { %9695 = sst [smem:[#allocation75_spill]] %s9385_s9 }
   0xb   :  { %s5242_s2 = smov 0   ;;  %s5244_s25 = smov 0  }
   0xc   :  { %s5246_s26 = smov 0  }
   0xd LB: > { %9696 = sst [smem:[#allocation3_spill]] %s5117_s25  ;;  %s5255_s27 = sadd.s32 4294967295, %s5121_s26   ;;  %s5121_s26 = sphi %s5246_s26, %s10200_s26   ;;  %s5117_s25 = sphi %s5244_s25, %s10202_s25   ;;  %s5113_s2 = sphi %s5242_s2, %s10201_s2  }
   0xe   : > { %s5257_s3 = sadd.s32 1, %s5121_s26   ;;  %s484_s29 = sadd.s32 1, %s5117_s25 }
   0xf   : > { %9697 = sst [smem:[#allocation4_spill]] %s5257_s3  ;;  %s481_s28 = ssub.s32 %s5121_s26, %s5257_s3 }
  0x10   : > { %p482_p0 = scmp.eq.s32.totalorder %s481_s28, 0  ;;  %p494_p1 = scmp.ne.s32.totalorder %s5117_s25, %s5113_s2 }
  0x11   : > { %p495_p2 = scmp.eq.s32.totalorder %s5255_s27, 1  ;;  %p3910_p3 = scmp.ge.s32.totalorder %s5121_s26, 1 }
  0x12   : > { %s5265_s0 = scalar_select %p482_p0, %s5117_s25, %s484_s29  }
  0x13   : > { %p5267_p4 = por %p495_p2, %p494_p1  ;;  %p615_p5 = scmp.lt.s32.totalorder %s5121_s26, 3 }
  0x14   : > { %9698 = sst [smem:[#allocation5_spill]] %s5265_s0 }
  0x15   : > { %p616_p6 = pnand %p3910_p3, %p615_p5 }
  0x17   : > { %619 = sbr.rel (%p616_p6) target bundleno = 1584 (0x630), region = 92 }
  0x1c   : > { %s9700_s22 = sld [smem:[#allocation67_spill]]  ;;  %s3914_s23 = sshll.u32 %s5255_s27, 4  ;;  %vm843_vm0 = vcmask 1041408   ;;  %vm839_vm1 = vcmask 556032   ;;  %vm895_vm2 = vcmask 261120   ;;  %vm1492_vm8 = vcmask 1043456  }
  0x1d   : > { %p702_p7 = scmp.lt.s32.totalorder %s3914_s23, 31  ;;  %p696_p8 = scmp.lt.s32.totalorder %s5255_s27, 1  ;;  %vm1488_vm12 = vcmask 588800  }
  0x1e   : > { %s9701_s8 = sld [smem:[#allocation74_spill]]  ;;  %s9406_s29 = smov 17  }
  0x1f   : > { %s10204_s23 = smov (!%p702_p7, %s3914_s23), 31  ;;  %s9706_s1 = sld [smem:[#allocation66_spill]] }
  0x20   : > { %s3915_s26 = sshll.u32 %s10204_s23, 2  ;;  %s9490_s0 = smov 1  }
  0x21   : > { %s697_s30 = scalar_select %p696_p8, %s5255_s27, 1 }
  0x22   : > { %v4069_v0 = vld [vmem:[%s9700_s22 + $0x38] sm:$0xff]  ;;  %v753_v1 = vld [vmem:[%s9700_s22 + $0x60] sm:$0x3]  ;;  %v4068_v2 = vld [vmem:[%s9700_s22 + $0x30] sm:$0xff]  ;;  %s9430_s25 = smov 127   ;;  %s9428_s3 = smov 113  }
  0x23   : > { %847 = vmatpush.bf16.msra.mxu0 %v4069_v0  ;;  %v813_v3 = vunpack.c.l.b16 %v753_v1  ;;  %v4067_v5 = vld [vmem:[%s9700_s22 + $0x28] sm:$0xff]  ;;  %v4073_v7 = vld [vmem:[%s9700_s22 + $0x58] sm:$0xff]  ;;  %v4066_v20 = vld [vmem:[%s9700_s22 + $0x20] sm:$0xff]  ;;  %s5340_s24 = sshll.u32 %s697_s30, 3  ;;  %s9711_s30 = sld [smem:[#allocation69_spill]] }
  0x24   : > { %s5291_s28 = scalar_lea.vmem %s9701_s8, %s3915_s26  ;;  %v4072_v23 = vld [vmem:[%s9700_s22 + $0x50] sm:$0xff]  ;;  %v4065_v28 = vld [vmem:[%s9700_s22 + $0x18] sm:$0xff]  ;;  %v4071_v29 = vld [vmem:[%s9700_s22 + $0x48] sm:$0xff]  ;;  %s9404_s26 = smov 16  }
  0x25   : > { %v826_v4 = vpack.c.b16 %v813_v3, %v813_v3  ;;  %v987_v8 = vld [vmem:[%s5291_s28 + $0x20] sm:$0xff]  ;;  %v5298_v9 = vld [vmem:[%s5291_s28 + $0x10] sm:$0xff]  ;;  %v986_v17 = vld [vmem:[%s5291_s28 + $0x18] sm:$0xff]  ;;  %s700_s8 = scalar_lea.vmem %s9706_s1, %s5340_s24  ;;  %s9715_s1 = sld [smem:[#allocation68_spill]] }
  0x26   : > { %v5301_v10 = vld [vmem:[%s5291_s28] sm:$0xff]  ;;  %v5306_v11 = vunpack.c.l.bf16 %v987_v8  ;;  %v5308_v12 = vunpack.c.h.bf16 %v987_v8  ;;  %v9418_v13 = vunpack.c.l.bf16 %v5298_v9  ;;  %v9420_v14 = vunpack.c.h.bf16 %v5298_v9  ;;  %v5329_v21 = vld [vmem:[%s5291_s28 + $0x8] sm:$0xff]  ;;  %v5375_v32 = vld [vmem:[%s5291_s28 + $0x30] sm:$0xff]  ;;  %s9877_s9 = sld [smem:[#allocation75_spill]]  ;;  %s715_s5 = scalar_lea.vmem %s9394_s18, %s5340_s24 }
  0x27   : > { %848 = vmatpush.bf16.msra.mxu0 %v4068_v2  ;;  %v845_v6 = vsel %vm843_vm0, %v826_v4, 0  ;;  %v9425_v15 = vunpack.c.l.bf16 %v5301_v10  ;;  %v9424_v16 = vunpack.c.h.bf16 %v5301_v10  ;;  %9704 = vst [vmem:[#allocation8_spill] sm:$0xff] %v5329_v21  ;;  %v5346_v24 = vunpack.c.l.bf16 %v986_v17  ;;  %v728_v33 = vld [vmem:[%s700_s8] sm:$0xff]  ;;  %v4064_v34 = vld [vmem:[%s9700_s22 + $0x10] sm:$0xff]  ;;  %v5381_v35 = vld [vmem:[%s5291_s28 + $0x28] sm:$0xff]  ;;  %s9484_s8 = smov 112  }
  0x28   : > { %863 = vmatpush.bf16.msra.mxu1 %v845_v6  ;;  %9702 = vst [vmem:[#allocation6_spill] sm:$0xff] %v5306_v11  ;;  %v5317_v18 = vpack.i.bf16 %v5308_v12, %v5306_v11  ;;  %v5323_v19 = vpack.i.bf16 %v9420_v14, %v9418_v13  ;;  %v5348_v25 = vunpack.c.h.bf16 %v986_v17  ;;  %v9427_v26 = vunpack.c.l.bf16 %v5329_v21  ;;  %v4070_v37 = vld [vmem:[%s9700_s22 + $0x40] sm:$0xff]  ;;  %v4063_v42 = vld [vmem:[%s9700_s22 + $0x8] sm:$0xff]  ;;  %v5415_v48 = vld [vmem:[%s5291_s28 + $0x38] sm:$0xff]  ;;  %s9488_s28 = smov 15   ;;  %s9878_s6 = sld [smem:[#allocation72_spill]] }
  0x29   : > { %9703 = vst [vmem:[#allocation7_spill] sm:$0xff] %v5308_v12  ;;  %v5335_v22 = vpack.i.bf16 %v9424_v16, %v9425_v15  ;;  %v9419_v27 = vunpack.c.h.bf16 %v5329_v21  ;;  %v760_v36 = vunpack.c.h.b16 %v728_v33  ;;  %v9411_v38 = vunpack.c.l.bf16 %v5375_v32  ;;  %v4062_v47 = vld [vmem:[%s9700_s22] sm:$0xff]  ;;  %v4075_v59 = vld [vmem:[%s9711_s30 + $0x8] sm:$0xff]  ;;  %s9910_s7 = sld [smem:[#allocation73_spill]] }
  0x2a   : > { %4134 = vrot.lane.b32.xlu0 %v5317_v18, %s9406_s29  ;;  %4124 = vrot.lane.b32.xlu2 %v5323_v19, %s9406_s29  ;;  %9705 = vst [vmem:[#allocation9_spill] sm:$0xff] %v5348_v25  ;;  %v5366_v30 = vpack.i.bf16 %v5348_v25, %v5346_v24  ;;  %v9415_v39 = vunpack.c.h.bf16 %v5375_v32  ;;  %v9416_v40 = vunpack.c.l.bf16 %v5381_v35  ;;  %v9413_v41 = vunpack.c.h.bf16 %v5381_v35  ;;  %v4074_v60 = vld [vmem:[%s9711_s30] sm:$0xff] }
  0x2b   : > { %849 = vmatpush.bf16.msra.mxu0 %v4067_v5  ;;  %4114 = vrot.lane.b32.xlu1 %v5335_v22, %s9406_s29  ;;  %v5372_v31 = vpack.i.bf16 %v9419_v27, %v9427_v26  ;;  %9707 = vst [vmem:[#allocation10_spill] sm:$0xff] %v5375_v32  ;;  %v762_v43 = vpack.c.b16 %v760_v36, %v760_v36  ;;  %v759_v46 = vunpack.c.l.b16 %v728_v33  ;;  %v9414_v50 = vunpack.c.l.bf16 %v5415_v48  ;;  %v5076_v8 = vld [vmem:[%s9715_s1] ss:$0 sm:$0xff]  ;;  %s9735_s1 = sld [smem:[#allocation71_spill]] }
  0x2c   : > { %864 = vmatpush.bf16.msra.mxu1 %v4073_v7  ;;  %9708 = vst [vmem:[#allocation11_spill] sm:$0xff] %v5381_v35  ;;  %v5403_v44 = vpack.i.bf16 %v9415_v39, %v9411_v38  ;;  %v5409_v45 = vpack.i.bf16 %v9413_v41, %v9416_v40  ;;  %v9408_v51 = vunpack.c.h.bf16 %v5415_v48  ;;  %905 = vmatpush.bf16.msra.mxu2 %v4075_v59 }
  0x2d   : > { %9709 = vst [vmem:[#allocation12_spill] sm:$0xff] %v5415_v48  ;;  %v761_v49 = vpack.c.b16 %v759_v46, %v759_v46  ;;  %v4408_v3 = vpack.i.bf16 %v5306_v11, %v5348_v25 }
  0x2e   : > { %v5429_v52 = vpack.i.bf16 %v9408_v51, %v9414_v50 }
  0x2f   : > { %850 = vmatpush.bf16.msra.mxu0 %v4066_v20 }
  0x30   : > { %865 = vmatpush.bf16.msra.mxu1 %v4072_v23  ;;  %906 = vmatpush.bf16.msra.mxu2 %v4074_v60 }
  0x31   : > { %v4077_v26 = vld [vmem:[%s9735_s1 + $0x8] sm:$0xff] }
  0x32   : > { %4169 = vrot.lane.b32.xlu0 %v5366_v30, %s9404_s26  ;;  %4129 = vrot.lane.b32.xlu2 %v5366_v30, %s9406_s29 }
  0x33   : > { %851 = vmatpush.bf16.msra.mxu0 %v4065_v28  ;;  %4119 = vrot.lane.b32.xlu1 %v5372_v31, %s9406_s29 }
  0x34   : > { %866 = vmatpush.bf16.msra.mxu1 %v4071_v29  ;;  %943 = vmatpush.bf16.msra.mxu3 %v4077_v26 }
  0x37   : > { %852 = vmatpush.bf16.msra.mxu0 %v4064_v34 }
  0x38   : > { %867 = vmatpush.bf16.msra.mxu1 %v4070_v37 }
  0x3a   : > { %4184 = vrot.lane.b32.xlu0 %v5403_v44, %s9404_s26  ;;  %4144 = vrot.lane.b32.xlu2 %v5403_v44, %s9406_s29 }
  0x3b   : > { %853 = vmatpush.bf16.msra.mxu0 %v4063_v42  ;;  %3969 = vmatmul.msk.bf16.vlgmr.msra.gmra.mxu1 %vm839_vm1, %v762_v43  ;;  %v1039_v43 = vlaneseq  ;;  %vm3390_vm1 = vcmask 130048  }
  0x3c   : > { %4139 = vrot.lane.b32.xlu1 %v5409_v45, %s9406_s29 }
  0x3f   : > { %854 = vmatpush.bf16.msra.mxu0 %v4062_v47 }
  0x42   : > { %855 = vmatmul.bf16.vlgmr.msra.gmra.mxu0 %v761_v49  ;;  %4199 = vrot.lane.b32.xlu0 %v5372_v31, %s9488_s28 }
  0x43   : > { %4154 = vrot.lane.b32.xlu2 %v5335_v22, %s9404_s26 }
  0x44   : > { %4149 = vrot.lane.b32.xlu1 %v5429_v52, %s9406_s29  ;;  %s9486_s29 = smov 111  }
  0x4a   : > { %4214 = vrot.lane.b32.xlu0 %v5317_v18, %s9488_s28 }
  0x4b   : > { %4164 = vrot.lane.b32.xlu2 %v5323_v19, %s9404_s26 }
  0x4c   : > { %4159 = vrot.lane.b32.xlu1 %v5372_v31, %s9404_s26 }
  0x52   : > { %4229 = vrot.lane.b32.xlu0 %v5429_v52, %s9488_s28 }
  0x53   : > { %4179 = vrot.lane.b32.xlu2 %v5409_v45, %s9404_s26 }
  0x54   : > { %4174 = vrot.lane.b32.xlu1 %v5317_v18, %s9404_s26 }
  0x5a   : > { %4244 = vrot.lane.b32.xlu0 %v5323_v19, %s9490_s0 }
  0x5b   : > { %4194 = vrot.lane.b32.xlu2 %v5335_v22, %s9488_s28 }
  0x5c   : > { %4189 = vrot.lane.b32.xlu1 %v5429_v52, %s9404_s26  ;;  %s9905_s26 = smov 127  }
  0x62   : > { %4259 = vrot.lane.b32.xlu0 %v5409_v45, %s9490_s0 }
  0x63   : > { %4209 = vrot.lane.b32.xlu2 %v5366_v30, %s9488_s28 }
  0x64   : > { %4204 = vrot.lane.b32.xlu1 %v5323_v19, %s9488_s28 }
  0x6a   : > { %4274 = vrot.lane.b32.xlu0 %v5335_v22, %s9430_s25 }
  0x6b   : > { %4224 = vrot.lane.b32.xlu2 %v5403_v44, %s9488_s28 }
  0x6c   : > { %4219 = vrot.lane.b32.xlu1 %v5409_v45, %s9488_s28  ;;  %s9884_s28 = smov 15  }
  0x72   : > { %4289 = vrot.lane.b32.xlu0 %v5366_v30, %s9430_s25 }
  0x73   : > { %4239 = vrot.lane.b32.xlu2 %v5372_v31, %s9490_s0 }
  0x74   : > { %4234 = vrot.lane.b32.xlu1 %v5335_v22, %s9490_s0 }
  0x7a   : > { %4304 = vrot.lane.b32.xlu0 %v5403_v44, %s9430_s25 }
  0x7b   : > { %4254 = vrot.lane.b32.xlu2 %v5317_v18, %s9490_s0 }
  0x7c   : > { %4249 = vrot.lane.b32.xlu1 %v5366_v30, %s9490_s0 }
  0x82   : > { %4319 = vrot.lane.b32.xlu0 %v5372_v31, %s9428_s3 }
  0x83   : > { %4269 = vrot.lane.b32.xlu2 %v5429_v52, %s9490_s0 }
  0x84   : > { %4264 = vrot.lane.b32.xlu1 %v5403_v44, %s9490_s0  ;;  %v5485_v53 = vpop.permute.xlu2 %4124 }
  0x8a   : > { %4334 = vrot.lane.b32.xlu0 %v5317_v18, %s9428_s3 }
  0x8b   : > { %4284 = vrot.lane.b32.xlu2 %v5323_v19, %s9430_s25 }
  0x8c   : > { %4279 = vrot.lane.b32.xlu1 %v5372_v31, %s9430_s25  ;;  %v5493_v54 = vpop.permute.xlu2 %4129 }
  0x92   : > { %4349 = vrot.lane.b32.xlu0 %v5429_v52, %s9428_s3 }
  0x93   : > { %4299 = vrot.lane.b32.xlu2 %v5409_v45, %s9430_s25 }
  0x94   : > { %4294 = vrot.lane.b32.xlu1 %v5317_v18, %s9430_s25  ;;  %v5501_v55 = vpop.permute.xlu2 %4144 }
  0x95   : > { %9710 = vst [vmem:[#allocation13_spill] sm:$0xff] %v5501_v55 }
  0x9a   : > { %4364 = vrot.lane.b32.xlu0 %v5323_v19, %s9484_s8 }
  0x9b   : > { %4314 = vrot.lane.b32.xlu2 %v5335_v22, %s9428_s3 }
  0x9c   : > { %4309 = vrot.lane.b32.xlu1 %v5429_v52, %s9430_s25  ;;  %v5509_v56 = vpop.permute.xlu0 %4134  ;;  %s9779_s25 = sld [smem:[#allocation70_spill]] }
  0x9d   : > { %v5511_v57 = vpop.permute.xlu2 %4154  ;;  %v5513_v58 = vpop.permute.xlu1 %4114 }
  0xa2   : > { %4379 = vrot.lane.b32.xlu0 %v5409_v45, %s9484_s8 }
  0xa3   : > { %4329 = vrot.lane.b32.xlu2 %v5366_v30, %s9428_s3 }
  0xa4   : > { %4324 = vrot.lane.b32.xlu1 %v5323_v19, %s9428_s3  ;;  %v5527_v61 = vpop.permute.xlu0 %4169 }
  0xa5   : > { %v5529_v62 = vpop.permute.xlu2 %4164  ;;  %v5531_v63 = vpop.permute.xlu1 %4119 }
  0xaa   : > { %4394 = vrot.lane.b32.xlu0 %v5403_v44, %s9484_s8 }
  0xab   : > { %4344 = vrot.lane.b32.xlu2 %v5403_v44, %s9428_s3 }
  0xac   : > { %4339 = vrot.lane.b32.xlu1 %v5409_v45, %s9428_s3  ;;  %v5541_v1 = vpop.permute.xlu0 %4184  ;;  %s6509_s3 = scalar_lea.vmem %s9877_s9, %s10204_s23  ;;  %s3920_s9 = sshll.u32 %s10204_s23, 3 }
  0xad   : > { %v5539_v0 = vpop.permute.xlu2 %4179  ;;  %9713 = vst [vmem:[#allocation15_spill] sm:$0xff] %v5541_v1 }
  0xae   : > { %9712 = vst [vmem:[#allocation14_spill] sm:$0xff] %v5539_v0  ;;  %v5543_v2 = vpop.permute.xlu1 %4139 }
  0xb2   : > { %4409 = vrot.lane.b32.xlu0 %v4408_v3, %s9486_s29 }
  0xb3   : > { %4359 = vrot.lane.b32.xlu2 %v5372_v31, %s9484_s8 }
  0xb4   : > { %4354 = vrot.lane.b32.xlu1 %v5335_v22, %s9484_s8  ;;  %v5556_v7 = vpop.permute.xlu0 %4199 }
  0xb5   : > { %v5552_v4 = vpop.permute.xlu2 %4194 }
  0xb6   : > { %v5554_v5 = vpop.permute.xlu1 %4149 }
  0xb7   : > { %9714 = vst [vmem:[#allocation16_spill] sm:$0xff] %v5554_v5  ;;  %v9409_v47 = vunpack.i.l.bf16 %v5554_v5 }
  0xb8   : > { %v869_v6 = vpop.f32.mrf.mxu1 }
  0xba   : > { %4424 = vrot.lane.b32.xlu0 %v5403_v44, %s9486_s29 }
  0xbb   : > { %4374 = vrot.lane.b32.xlu2 %v5317_v18, %s9484_s8 }
  0xbc   : > { %4369 = vrot.lane.b32.xlu1 %v5366_v30, %s9484_s8  ;;  %v5569_v34 = vpop.permute.xlu0 %4214 }
  0xbd   : > { %v5565_v17 = vpop.permute.xlu2 %4209 }
  0xbe   : > { %v5567_v20 = vpop.permute.xlu1 %4159 }
  0xbf   : > { %v856_v23 = vpop.f32.mrf.mxu0 }
  0xc0   : > { %v857_v28 = vadd.f32 %v5076_v8, %v856_v23  ;;  %v871_v29 = vpop.f32.mrf.mxu1 }
  0xc2   : > { %v870_v33 = vadd.f32 %v869_v6, %v857_v28  ;;  %v4413_v6 = vpack.i.bf16 %v5346_v24, %v5308_v12 }
  0xc3   : > { %4389 = vrot.lane.b32.xlu2 %v5372_v31, %s9486_s29  ;;  %v5586_v31 = vand.u32 127, %v1039_v43 }
  0xc4   : > { %v873_v36 = vmax.f32 %v870_v33, 0.0  ;;  %4384 = vrot.lane.b32.xlu1 %v5335_v22, %s9486_s29  ;;  %v5582_v46 = vpop.permute.xlu0 %4229  ;;  %v9426_v22 = vunpack.i.h.bf16 %v5554_v5 }
  0xc5   : > { %v5575_v30 = vpop.permute.xlu2 %4224  ;;  %vm1041_vm3 = vcmp.lt.s32.totalorder %v5586_v31, 17  ;;  %vm1090_vm4 = vcmp.lt.s32.totalorder %v5586_v31, 16  ;;  %v9422_v33 = vunpack.i.h.bf16 %v5582_v46  ;;  %vm1139_vm5 = vcmp.lt.s32.totalorder %v5586_v31, 15 }
  0xc6   : > { %v874_v18 = vpack.c.bf16 %v873_v36, %v873_v36  ;;  %9716 = vst [vmem:[#allocation17_spill] sm:$0xff] %v5575_v30  ;;  %v5577_v37 = vpop.permute.xlu1 %4174  ;;  %v9412_v36 = vunpack.i.l.bf16 %v5582_v46  ;;  %vm1188_vm6 = vcmp.lt.s32.totalorder %v5586_v31, 1  ;;  %vm1384_vm7 = vcmp.lt.s32.totalorder %v5586_v31, 111 }
  0xc7   : > { %9717 = vst [vmem:[#allocation18_spill] sm:$0xff] %v5577_v37  ;;  %v858_v42 = vpop.f32.mrf.mxu0  ;;  %vm1286_vm9 = vcmp.lt.s32.totalorder %v5586_v31, 113  ;;  %vm1335_vm10 = vcmp.lt.s32.totalorder %v5586_v31, 112  ;;  %vm1237_vm11 = vcmp.lt.s32.totalorder %v5586_v31, 127 }
  0xc8   : > { %3978 = vmatmul.msk.bf16.vlgmr.msra.gmra.mxu2 %vm895_vm2, %v874_v18 }
  0xcb   : > { %4404 = vrot.lane.b32.xlu2 %v5429_v52, %s9484_s8  ;;  %s9885_s8 = smov 17  }
  0xcc   : > { %4399 = vrot.lane.b32.xlu1 %v5323_v19, %s9486_s29  ;;  %v5608_v19 = vsel %vm1041_vm3, %v9409_v47, %v9426_v22  ;;  %v5623_v28 = vpop.permute.xlu0 %4244 }
  0xcd   : > { %v5590_v49 = vpop.permute.xlu2 %4239  ;;  %9719 = vst [vmem:[#allocation20_spill] sm:$0xff] %v5608_v19  ;;  %v4076_v19 = vld [vmem:[%s9735_s1] sm:$0xff]  ;;  %s7987_s1 = scalar_lea.vmem %s9397_s21, %s3920_s9 }
  0xce   : > { %v5592_v59 = vpop.permute.xlu1 %4189  ;;  %944 = vmatpush.bf16.msra.mxu3 %v4076_v19 }
  0xcf   : > { %9718 = vst [vmem:[#allocation19_spill] sm:$0xff] %v5592_v59  ;;  %v9423_v60 = vunpack.i.h.bf16 %v5592_v59  ;;  %v9410_v3 = vunpack.i.l.bf16 %v5592_v59 }
  0xd1   : > { %v5616_v8 = vsel %vm1090_vm4, %v9410_v3, %v9423_v60 }
  0xd2   : > { %9720 = vst [vmem:[#allocation21_spill] sm:$0xff] %v5616_v8 }
  0xd3   : > { %4419 = vrot.lane.b32.xlu2 %v5409_v45, %s9486_s29  ;;  %v5647_v45 = vsel %vm1139_vm5, %v9412_v36, %v9422_v33 }
  0xd4   : > { %4414 = vrot.lane.b32.xlu1 %v4413_v6, %s9486_s29  ;;  %9723 = vst [vmem:[#allocation24_spill] sm:$0xff] %v5647_v45 }
  0xd5   : > { %v5621_v44 = vpop.permute.xlu2 %4254 }
  0xd6   : > { %9721 = vst [vmem:[#allocation22_spill] sm:$0xff] %v5621_v44  ;;  %v5625_v29 = vpop.permute.xlu1 %4204 }
  0xdc   : > { %4429 = vrot.lane.b32.xlu1 %v5429_v52, %s9486_s29  ;;  %v5649_v52 = vpop.permute.xlu0 %4259  ;;  %s9886_s29 = smov 16  }
  0xdd   : > { %v5633_v18 = vpop.permute.xlu2 %4269  ;;  %9724 = vst [vmem:[#allocation25_spill] sm:$0xff] %v5649_v52 }
  0xde   : > { %v9421_v42 = vunpack.i.h.bf16 %v5633_v18  ;;  %v9417_v43 = vunpack.i.l.bf16 %v5633_v18  ;;  %v5637_v6 = vpop.permute.xlu1 %4219 }
  0xdf   : > { %9722 = vst [vmem:[#allocation23_spill] sm:$0xff] %v5637_v6  ;;  %v9473_v6 = vunpack.i.l.bf16 %v5511_v57 }
  0xe0   : > { %v5657_v23 = vsel %vm1188_vm6, %v9417_v43, %v9421_v42 }
  0xe1   : > { %9725 = vst [vmem:[#allocation26_spill] sm:$0xff] %v5657_v23 }
  0xe4   : > { %v5665_v38 = vpop.permute.xlu0 %4274 }
  0xe5   : > { %v5661_v47 = vpop.permute.xlu2 %4284  ;;  %9726 = vst [vmem:[#allocation27_spill] sm:$0xff] %v5665_v38 }
  0xe6   : > { %v5663_v3 = vpop.permute.xlu1 %4234 }
  0xec   : > { %v5671_v50 = vpop.permute.xlu0 %4289 }
  0xed   : > { %v5667_v36 = vpop.permute.xlu2 %4299 }
  0xee   : > { %9727 = vst [vmem:[#allocation28_spill] sm:$0xff] %v5667_v36  ;;  %v5669_v41 = vpop.permute.xlu1 %4249 }
  0xf4   : > { %v5679_v13 = vpop.permute.xlu0 %4304 }
  0xf5   : > { %v5673_v39 = vpop.permute.xlu2 %4314  ;;  %9729 = vst [vmem:[#allocation30_spill] sm:$0xff] %v5679_v13 }
  0xf6   : > { %v5675_v40 = vpop.permute.xlu1 %4264  ;;  %v9743_v13 = vunpack.i.l.bf16 %v5673_v39 }
  0xf7   : > { %9728 = vst [vmem:[#allocation29_spill] sm:$0xff] %v5675_v40 }
  0xfc   : > { %v5687_v42 = vpop.permute.xlu0 %4319 }
  0xfd   : > { %v5677_v43 = vpop.permute.xlu2 %4329  ;;  %v9450_v26 = vunpack.i.h.bf16 %v5687_v42  ;;  %v9451_v1 = vunpack.i.l.bf16 %v5687_v42 }
  0xfe   : > { %v5681_v51 = vpop.permute.xlu1 %4279 }
  0xff   : > { %v1299_v55 = vsel %vm1286_vm9, %v9451_v1, %v9450_v26  ;;  %v9463_v1 = vunpack.i.l.bf16 %v5556_v7  ;;  %v9742_v26 = vunpack.c.l.bf16 %v5329_v21 }
 0x104   : > { %v5693_v16 = vpop.permute.xlu0 %4334 }
 0x105   : > { %v5683_v27 = vpop.permute.xlu2 %4344  ;;  %9733 = vst [vmem:[#allocation34_spill] sm:$0xff] %v5693_v16 }
 0x106   : > { %9730 = vst [vmem:[#allocation31_spill] sm:$0xff] %v5683_v27  ;;  %v5685_v14 = vpop.permute.xlu1 %4294 }
 0x107   : > { %9731 = vst [vmem:[#allocation32_spill] sm:$0xff] %v5685_v14 }
 0x10c   : > { %v5705_v8 = vpop.permute.xlu0 %4349 }
 0x10d   : > { %v5689_v33 = vpop.permute.xlu2 %4359  ;;  %9736 = vst [vmem:[#allocation36_spill] sm:$0xff] %v5705_v8 }
 0x10e   : > { %v5691_v60 = vpop.permute.xlu1 %4309  ;;  %v9738_v40 = vunpack.i.h.bf16 %v5689_v33 }
 0x10f   : > { %9732 = vst [vmem:[#allocation33_spill] sm:$0xff] %v5691_v60  ;;  %v9739_v60 = vunpack.i.l.bf16 %v5689_v33 }
 0x114   : > { %v5746_v0 = vpop.permute.xlu0 %4364 }
 0x115   : > { %v5695_v15 = vpop.permute.xlu2 %4374 }
 0x116   : > { %9734 = vst [vmem:[#allocation35_spill] sm:$0xff] %v5695_v15  ;;  %v5697_v22 = vpop.permute.xlu1 %4324 }
 0x11d   : > { %v5708_v23 = vpop.permute.xlu2 %4389 }
 0x11e   : > { %v9445_v48 = vunpack.i.h.bf16 %v5708_v23  ;;  %v9446_v32 = vunpack.i.l.bf16 %v5708_v23  ;;  %v5713_v30 = vpop.permute.xlu1 %4339 }
 0x11f   : > { %9737 = vst [vmem:[#allocation37_spill] sm:$0xff] %v5713_v30  ;;  %v9755_v30 = vunpack.i.l.bf16 %v5708_v23 }
 0x120   : > { %v1397_v19 = vsel %vm1384_vm7, %v9446_v32, %v9445_v48  ;;  %v1348_v48 = vsel %vm1335_vm10, %v9739_v60, %v9738_v40  ;;  %v9457_v32 = vunpack.i.h.bf16 %v5681_v51  ;;  %v5802_v40 = vpop.permute.xlu0 %4379 }
 0x121   : > { %v1467_v45 = vpack.c.bf16 %v1397_v19, %v1397_v19  ;;  %v1451_v27 = vpack.c.bf16 %v1348_v48, %v1299_v55  ;;  %v9741_v55 = vunpack.i.l.bf16 %v5681_v51  ;;  %9752 = vst [vmem:[#allocation41_spill] sm:$0xff] %v5802_v40  ;;  %v9758_v40 = vunpack.i.l.bf16 %v5529_v62 }
 0x123   : > { %v1500_v19 = vsel %vm1492_vm8, %v1467_v45, 0  ;;  %v9744_v45 = vunpack.i.h.bf16 %v5705_v8 }
 0x124   : > { %1570 = vmatpush.bf16.msrb.mxu1 %v1500_v19  ;;  %v1250_v19 = vsel %vm1237_vm11, %v9741_v55, %v9457_v32  ;;  %v9748_v32 = vunpack.i.l.bf16 %v5590_v49 }
 0x125   : > { %v5742_v11 = vpop.permute.xlu2 %4404  ;;  %v1435_v25 = vpack.c.bf16 %v1250_v19, %v9742_v26  ;;  %v5770_v35 = vsel %vm1286_vm9, %v9744_v45, %v9743_v13  ;;  %v9749_v26 = vunpack.i.h.bf16 %v5663_v3  ;;  %v4157_v13 = vunpack.i.h.bf16 %v5511_v57 }
 0x126   : > { %9740 = vst [vmem:[#allocation38_spill] sm:$0xff] %v5742_v11  ;;  %v5749_v60 = vpop.permute.xlu1 %4354  ;;  %v9746_v12 = vunpack.i.h.bf16 %v5742_v11  ;;  %v9468_v45 = vunpack.i.l.bf16 %v5531_v63 }
 0x127   : > { %v4356_v48 = vunpack.i.l.bf16 %v5749_v60  ;;  %9745 = vst [vmem:[#allocation39_spill] sm:$0xff] %v5770_v35  ;;  %v1202_v19 = vsel %vm1188_vm6, %v9749_v26, %v9748_v32  ;;  %v4117_v32 = vunpack.i.h.bf16 %v5513_v58  ;;  %v9751_v26 = vunpack.i.l.bf16 %v5567_v20 }
 0x128   : > { %1571 = vmatpush.bf16.msrb.mxu1 %v1451_v27  ;;  %v4357_v44 = vunpack.i.h.bf16 %v5749_v60  ;;  %v5864_v15 = vpop.permute.xlu0 %4394 }
 0x129   : > { %v5776_v27 = vsel %vm1335_vm10, %v9746_v12, %v4356_v48  ;;  %v9750_v12 = vunpack.i.h.bf16 %v5552_v4  ;;  %v1055_v35 = vsel %vm1041_vm3, %v4117_v32, %v9468_v45  ;;  %9757 = vst [vmem:[#allocation43_spill] sm:$0xff] %v5864_v15  ;;  %v9760_v15 = vunpack.i.l.bf16 %v5689_v33 }
 0x12a   : > { %9747 = vst [vmem:[#allocation40_spill] sm:$0xff] %v5776_v27  ;;  %v4131_v27 = vunpack.i.l.bf16 %v5493_v54 }
 0x12b   : > { %v1153_v55 = vsel %vm1139_vm5, %v9750_v12, %v9463_v1  ;;  %v4127_v12 = vunpack.i.h.bf16 %v5485_v53  ;;  %v1349_v16 = vsel %vm1335_vm10, %v4357_v44, %v9760_v15  ;;  %v9762_v15 = vunpack.i.l.bf16 %v5673_v39 }
 0x12c   : > { %1572 = vmatpush.bf16.msrb.mxu1 %v1435_v25  ;;  %v1419_v8 = vpack.c.bf16 %v1202_v19, %v1153_v55  ;;  %v1104_v25 = vsel %vm1090_vm4, %v4157_v13, %v9751_v26  ;;  %v4126_v55 = vunpack.i.l.bf16 %v5485_v53  ;;  %v4132_v19 = vunpack.i.h.bf16 %v5493_v54 }
 0x12d   : > { %v1403_v1 = vpack.c.bf16 %v1104_v25, %v1055_v35  ;;  %v5821_v35 = vld [vmem:[%s9386_s10] sm:$0xf]  ;;  %v4136_v54 = vunpack.i.l.bf16 %v5509_v56  ;;  %v5838_v26 = vsel %vm1090_vm4, %v9473_v6, %v4157_v13  ;;  %v5842_v37 = vsel %vm1041_vm3, %v4127_v12, %v4131_v27 }
 0x12e   : > { %v5795_v11 = vpop.permute.xlu1 %4369  ;;  %v5825_v53 = vsel %vm1041_vm3, %v4126_v55, %v4127_v12  ;;  %v5846_v14 = vsel %vm1041_vm3, %v4131_v27, %v4132_v19  ;;  %v9756_v6 = vunpack.i.l.bf16 %v5513_v58  ;;  %v4317_v27 = vunpack.i.h.bf16 %v5673_v39 }
 0x130   : > { %1573 = vmatpush.bf16.msrb.mxu1 %v1419_v8  ;;  %v4167_v8 = vunpack.i.h.bf16 %v5529_v62  ;;  %v5861_v12 = vsel %vm1041_vm3, %v9756_v6, %v4117_v32  ;;  %v5880_v32 = vsel %vm1041_vm3, %v4132_v19, %v4136_v54 }
 0x131   : > { %9759 = vst [vmem:[#allocation44_spill] sm:$0xff] %v5880_v32 }
 0x134   : > { %1574 = vmatpush.bf16.msrb.mxu1 %v1403_v1  ;;  %v4171_v1 = vunpack.i.l.bf16 %v5527_v61 }
 0x136   : > { %v5816_v52 = vpop.permute.xlu1 %4384  ;;  %v5876_v6 = vsel %vm1090_vm4, %v4167_v8, %v4171_v1 }
 0x137   : > { %9753 = vst [vmem:[#allocation42_spill] sm:$0xff] %v5816_v52  ;;  %v4387_v25 = vunpack.i.h.bf16 %v5816_v52  ;;  %3990 = vmatmul.msk.bf16.vlgmr.msrb.gmra.mxu1 %vm1488_vm12, %v5821_v35  ;;  %v9754_v36 = vunpack.i.l.bf16 %v5816_v52 }
 0x139   : > { %v1399_v60 = vsel %vm1384_vm7, %v9754_v36, %v4387_v25  ;;  %v1398_v13 = vsel %vm1384_vm7, %v4387_v25, %v9755_v30  ;;  %v5870_v36 = vsel %vm1090_vm4, %v9758_v40, %v4167_v8  ;;  %v4122_v30 = vunpack.i.h.bf16 %v5531_v63 }
 0x13a   : > { %v1465_v45 = vpack.c.bf16 %v1399_v60, %v1399_v60  ;;  %v1466_v52 = vpack.c.bf16 %v1398_v13, %v1398_v13  ;;  %v4277_v25 = vunpack.i.h.bf16 %v5665_v38  ;;  %v1350_v40 = vsel %vm1335_vm10, %v4356_v48, %v4357_v44 }
 0x13b   : > { %v1301_v44 = vsel %vm1286_vm9, %v9762_v15, %v4317_v27  ;;  %v5922_v39 = vsel %vm1041_vm3, %v4122_v30, %v4126_v55  ;;  %v4196_v15 = vunpack.i.l.bf16 %v5552_v4  ;;  %v4236_v8 = vunpack.i.l.bf16 %v5663_v3 }
 0x13c   : > { %v1494_v60 = vsel %vm1492_vm8, %v1465_v45, 0  ;;  %v1497_v13 = vsel %vm1492_vm8, %v1466_v52, 0  ;;  %v9761_v52 = vunpack.i.h.bf16 %v5527_v61  ;;  %v1449_v19 = vpack.c.bf16 %v1350_v40, %v1301_v44 }
 0x13d   : > { %1544 = vmatpush.bf16.msrb.mxu2 %v1494_v60  ;;  %1557 = vmatpush.bf16.msrb.mxu3 %v1497_v13  ;;  %v9763_v60 = vunpack.i.l.bf16 %v5687_v42  ;;  %v9767_v55 = vunpack.i.h.bf16 %v5509_v56  ;;  %v9771_v45 = vunpack.c.h.bf16 %v5301_v10 }
 0x13e   : > { %v5899_v48 = vsel %vm1090_vm4, %v4171_v1, %v9761_v52  ;;  %v5902_v32 = vpop.permute.xlu1 %4399  ;;  %v9764_v52 = vunpack.i.l.bf16 %v5531_v63 }
 0x13f   : > { %v1300_v13 = vsel %vm1286_vm9, %v4317_v27, %v9763_v60  ;;  %v9765_v27 = vunpack.i.l.bf16 %v5665_v38  ;;  %v4401_v60 = vunpack.i.l.bf16 %v5902_v32  ;;  %v9774_v38 = vunpack.i.h.bf16 %v5582_v46 }
 0x140   : > { %v1450_v1 = vpack.c.bf16 %v1349_v16, %v1300_v13  ;;  %v5918_v21 = vsel %vm1041_vm3, %v9764_v52, %v4122_v30  ;;  %v9766_v16 = vunpack.i.l.bf16 %v5681_v51  ;;  %v5940_v30 = vsel %vm1041_vm3, %v4136_v54, %v9767_v55 }
 0x141   : > { %v1252_v40 = vsel %vm1237_vm11, %v9765_v27, %v4277_v25  ;;  %1545 = vmatpush.bf16.msrb.mxu2 %v1449_v19  ;;  %v9768_v19 = vunpack.i.l.bf16 %v5513_v58  ;;  %v9770_v55 = vunpack.c.l.bf16 %v5301_v10  ;;  %v9772_v27 = vunpack.i.l.bf16 %v5511_v57 }
 0x142   : > { %v1251_v63 = vsel %vm1237_vm11, %v4277_v25, %v9766_v16  ;;  %1558 = vmatpush.bf16.msrb.mxu3 %v1450_v1  ;;  %v5947_v16 = vpop.permute.xlu0 %4409  ;;  %v9769_v1 = vunpack.i.h.bf16 %v5554_v5  ;;  %v9773_v25 = vunpack.i.h.bf16 %v5592_v59  ;;  %v9776_v10 = vunpack.i.h.bf16 %v5552_v4 }
 0x143   : > { %v1433_v13 = vpack.c.bf16 %v1252_v40, %v9770_v55  ;;  %v1434_v52 = vpack.c.bf16 %v1251_v63, %v9771_v45  ;;  %v9777_v45 = vunpack.i.h.bf16 %v5663_v3  ;;  %v9778_v55 = vunpack.i.h.bf16 %v5708_v23  ;;  %v5077_v23 = vld [vmem:[%s9779_s25] ss:$0 sm:$0xff]  ;;  %s9899_s25 = smov 111  }
 0x144   : > { %v1057_v44 = vsel %vm1041_vm3, %v9769_v1, %v9768_v19  ;;  %v1106_v58 = vsel %vm1090_vm4, %v9773_v25, %v9772_v27  ;;  %v1155_v19 = vsel %vm1139_vm5, %v9774_v38, %v4196_v15  ;;  %v9775_v1 = vunpack.i.h.bf16 %v5633_v18 }
 0x145   : > { %v1154_v57 = vsel %vm1139_vm5, %v4196_v15, %v9776_v10  ;;  %v1203_v63 = vsel %vm1188_vm6, %v4236_v8, %v9777_v45  ;;  %v4402_v25 = vunpack.i.h.bf16 %v5902_v32  ;;  %1546 = vmatpush.bf16.msrb.mxu2 %v1433_v13  ;;  %v9482_v38 = vunpack.i.l.bf16 %v5947_v16 }
 0x146   : > { %v1204_v40 = vsel %vm1188_vm6, %v9775_v1, %v4236_v8  ;;  %1559 = vmatpush.bf16.msrb.mxu3 %v1434_v52  ;;  %v1396_v4 = vsel %vm1384_vm7, %v9778_v55, %v4401_v60  ;;  %v5992_v8 = vpop.permute.xlu1 %4414  ;;  %v1401_v10 = vpack.c.bf16 %v1106_v58, %v1057_v44  ;;  %v1418_v45 = vpack.c.bf16 %v1203_v63, %v1154_v57 }
 0x147   : > { %v4417_v13 = vunpack.i.h.bf16 %v5992_v8  ;;  %v1417_v52 = vpack.c.bf16 %v1204_v40, %v1155_v19  ;;  %v4291_v55 = vunpack.i.l.bf16 %v5671_v50  ;;  %v4331_v3 = vunpack.i.l.bf16 %v5677_v43 }
 0x148   : > { %v1468_v1 = vpack.c.bf16 %v1396_v4, %v1396_v4  ;;  %v4371_v44 = vunpack.i.l.bf16 %v5795_v11  ;;  %v4366_v40 = vunpack.i.l.bf16 %v5746_v0  ;;  %v4326_v57 = vunpack.i.l.bf16 %v5697_v22 }
 0x149   : > { %1547 = vmatpush.bf16.msrb.mxu2 %v1417_v52  ;;  %v1394_v58 = vsel %vm1384_vm7, %v4402_v25, %v4417_v13  ;;  %v1393_v19 = vsel %vm1384_vm7, %v4417_v13, %v9482_v38  ;;  %v4367_v54 = vunpack.i.h.bf16 %v5746_v0  ;;  %v4327_v52 = vunpack.i.h.bf16 %v5697_v22 }
 0x14a   : > { %1560 = vmatpush.bf16.msrb.mxu3 %v1418_v45  ;;  %v1470_v4 = vpack.c.bf16 %v1394_v58, %v1394_v58  ;;  %v1471_v32 = vpack.c.bf16 %v1393_v19, %v1393_v19  ;;  %v1395_v15 = vsel %vm1384_vm7, %v4401_v60, %v4402_v25  ;;  %v4287_v27 = vunpack.i.h.bf16 %v5661_v47 }
 0x14b   : > { %v908_v63 = vpop.f32.mrf.mxu2  ;;  %v1503_v38 = vsel %vm1492_vm8, %v1468_v1, 0  ;;  %v4286_v59 = vunpack.i.l.bf16 %v5661_v47  ;;  %v9780_v0 = vpack.c.bf16 %v5838_v26, %v5861_v12  ;;  %v1345_v22 = vsel %vm1335_vm10, %v4367_v54, %v4371_v44 }
 0x14c   : > { %v909_v45 = vadd.f32 %v5077_v23, %v908_v63  ;;  %v1509_v5 = vsel %vm1492_vm8, %v1470_v4, 0  ;;  %v1512_v13 = vsel %vm1492_vm8, %v1471_v32, 0  ;;  %v9781_v60 = vunpack.i.h.bf16 %v5795_v11  ;;  %v6046_v63 = vpop.permute.xlu2 %4419 }
 0x14d   : > { %1548 = vmatpush.bf16.msrb.mxu2 %v1401_v10  ;;  %v4292_v32 = vunpack.i.h.bf16 %v5671_v50  ;;  %1609 = vmatpush.bf16.msrb.mxu0 %v1509_v5  ;;  %v9782_v47 = vunpack.i.h.bf16 %v5687_v42  ;;  %v9783_v26 = vunpack.i.h.bf16 %v5689_v33  ;;  %v1469_v10 = vpack.c.bf16 %v1395_v15, %v1395_v15 }
 0x14e   : > { %v912_v58 = vmax.f32 %v909_v45, 0.0  ;;  %1561 = vmatpush.bf16.msrb.mxu3 %v9780_v0  ;;  %v1344_v25 = vsel %vm1335_vm10, %v4371_v44, %v9781_v60  ;;  %1622 = vmatpush.bf16.msra.mxu1 %v1512_v13  ;;  %v4251_v23 = vunpack.i.l.bf16 %v5669_v41  ;;  %v1296_v44 = vsel %vm1286_vm9, %v4327_v52, %v4331_v3 }
 0x14f   : > { %v1298_v1 = vsel %vm1286_vm9, %v9782_v47, %v4326_v57  ;;  %v1347_v12 = vsel %vm1335_vm10, %v9783_v26, %v4366_v40  ;;  %v9784_v5 = vunpack.i.h.bf16 %v5677_v43  ;;  %v1454_v33 = vpack.c.bf16 %v1345_v22, %v1296_v44 }
 0x150   : > { %v913_v19 = vpack.c.bf16 %v912_v58, %v912_v58  ;;  %3988 = vmatmul.msk.bf16.vlgmr.msrb.gmra.mxu2 %vm1488_vm12, %v5821_v35  ;;  %v1247_v15 = vsel %vm1237_vm11, %v4287_v27, %v4291_v55  ;;  %v1452_v45 = vpack.c.bf16 %v1347_v12, %v1298_v1  ;;  %v1297_v58 = vsel %vm1286_vm9, %v4326_v57, %v4327_v52 }
 0x151   : > { %1583 = vmatpush.bf16.msra.mxu2 %v1503_v38  ;;  %v1295_v42 = vsel %vm1286_vm9, %v4331_v3, %v9784_v5  ;;  %v1246_v38 = vsel %vm1237_vm11, %v4291_v55, %v4292_v32  ;;  %v9785_v3 = vunpack.i.h.bf16 %v5681_v51  ;;  %v1346_v0 = vsel %vm1335_vm10, %v4366_v40, %v4367_v54  ;;  %1610 = vmatpush.bf16.msrb.mxu0 %v1454_v33 }
 0x152   : > { %v1455_v4 = vpack.c.bf16 %v1344_v25, %v1295_v42  ;;  %3987 = vmatmul.msk.bf16.vlgmr.msra.gmra.mxu3 %vm895_vm2, %v913_v19  ;;  %v4416_v22 = vunpack.i.l.bf16 %v5992_v8  ;;  %v1506_v55 = vsel %vm1492_vm8, %v1469_v10, 0  ;;  %v4422_v60 = vunpack.i.h.bf16 %v6046_v63 }
 0x153   : > { %v1249_v13 = vsel %vm1237_vm11, %v9785_v3, %v4286_v59  ;;  %v4421_v25 = vunpack.i.l.bf16 %v6046_v63  ;;  %v910_v51 = vpop.f32.mrf.mxu2  ;;  %v4412_v47 = vunpack.i.h.bf16 %v5947_v16  ;;  %1596 = vmatpush.bf16.msra.mxu3 %v1506_v55  ;;  %v9786_v57 = vunpack.i.h.bf16 %v5556_v7  ;;  %v9797_v55 = vld [vmem:[#allocation8_spill] sm:$0xff] }
 0x154   : > { %1623 = vmatpush.bf16.msra.mxu1 %v1455_v4  ;;  %v9787_v52 = vunpack.i.l.bf16 %v5556_v7  ;;  %v9788_v40 = vunpack.i.h.bf16 %v5567_v20  ;;  %v9789_v1 = vunpack.i.l.bf16 %v5567_v20  ;;  %v9790_v12 = vunpack.i.l.bf16 %v5529_v62 }
 0x155   : > { %1584 = vmatpush.bf16.msra.mxu2 %v1452_v45  ;;  %v9792_v44 = vunpack.c.h.bf16 %v5298_v9  ;;  %v1439_v42 = vpack.c.bf16 %v1246_v38, %v5346_v24  ;;  %v9793_v33 = vunpack.i.h.bf16 %v5623_v28  ;;  %v9794_v4 = vunpack.i.l.bf16 %v5623_v28 }
 0x156   : > { %v1152_v54 = vsel %vm1139_vm5, %v9787_v52, %v9786_v57  ;;  %v1103_v26 = vsel %vm1090_vm4, %v9789_v1, %v9788_v40  ;;  %v9791_v10 = vmov %v9788_v40  ;;  %v9795_v62 = vunpack.i.h.bf16 %v5590_v49 }
 0x157   : > { %v6088_v19 = vsel %vm1090_vm4, %v9791_v10, %v9790_v12  ;;  %v1438_v5 = vpack.c.bf16 %v1247_v15, %v9792_v44  ;;  %v1199_v45 = vsel %vm1188_vm6, %v9794_v4, %v9793_v33  ;;  %v9796_v20 = vunpack.i.l.bf16 %v5590_v49 }
 0x158   : > { %v9798_v51 = vunpack.c.h.bf16 %v9797_v55  ;;  %v1453_v15 = vpack.c.bf16 %v1346_v0, %v1297_v58  ;;  %v9799_v24 = vunpack.i.h.bf16 %v5625_v29  ;;  %v9800_v38 = vunpack.i.l.bf16 %v5625_v29  ;;  %1624 = vmatpush.bf16.msra.mxu1 %v1439_v42 }
 0x159   : > { %v1201_v3 = vsel %vm1188_vm6, %v9796_v20, %v9795_v62  ;;  %v9801_v40 = vmov %v9793_v33  ;;  %v4216_v12 = vunpack.i.l.bf16 %v5569_v34  ;;  %1611 = vmatpush.bf16.msrb.mxu0 %v1438_v5  ;;  %v1390_v58 = vsel %vm1384_vm7, %v4416_v22, %v4421_v25 }
 0x15a   : > { %v1436_v57 = vpack.c.bf16 %v1249_v13, %v9798_v51  ;;  %v1150_v52 = vsel %vm1139_vm5, %v9800_v38, %v9799_v24  ;;  %v1198_v1 = vsel %vm1188_vm6, %v9801_v40, %v4251_v23  ;;  %v1248_v13 = vsel %vm1237_vm11, %v4286_v59, %v4287_v27  ;;  %1597 = vmatpush.bf16.msra.mxu3 %v1453_v15 }
 0x15b   : > { %v1389_v0 = vsel %vm1384_vm7, %v4421_v25, %v4422_v60  ;;  %v4212_v10 = vunpack.i.h.bf16 %v5565_v17  ;;  %v9802_v44 = vunpack.i.l.bf16 %v5565_v17  ;;  %v9803_v5 = vmov %v9799_v24 }
 0x15c   : > { %1585 = vmatpush.bf16.msra.mxu2 %v1436_v57  ;;  %v1404_v27 = vpack.c.bf16 %v1103_v26, %v5918_v21  ;;  %v9804_v42 = vunpack.i.l.bf16 %v5947_v16  ;;  %v1422_v4 = vpack.c.bf16 %v1199_v45, %v1150_v52  ;;  %v1420_v62 = vpack.c.bf16 %v1201_v3, %v1152_v54  ;;  %v9810_v54 = vld [vmem:[#allocation34_spill] sm:$0xff] }
 0x15d   : > { %v1149_v59 = vsel %vm1139_vm5, %v9803_v5, %v9802_v44  ;;  %v9805_v20 = vunpack.i.l.bf16 %v5623_v28  ;;  %v9806_v55 = vunpack.i.h.bf16 %v5590_v49  ;;  %v9807_v57 = vunpack.c.l.bf16 %v5298_v9  ;;  %v9811_v28 = vld [vmem:[#allocation41_spill] sm:$0xff]  ;;  %v9812_v49 = vld [vmem:[#allocation35_spill] sm:$0xff] }
 0x15e   : > { %v1392_v33 = vsel %vm1384_vm7, %v9804_v42, %v4412_v47  ;;  %v1423_v25 = vpack.c.bf16 %v1198_v1, %v1149_v59  ;;  %v9808_v21 = vmov %v9800_v38  ;;  %v9809_v16 = vunpack.i.h.bf16 %v5556_v7  ;;  %1612 = vmatpush.bf16.msrb.mxu0 %v1422_v4  ;;  %v9813_v1 = vld [vmem:[#allocation37_spill] sm:$0xff] }
 0x15f   : > { %v1200_v51 = vsel %vm1188_vm6, %v9806_v55, %v9805_v20  ;;  %v1437_v15 = vpack.c.bf16 %v1248_v13, %v9807_v57  ;;  %v1474_v45 = vpack.c.bf16 %v1390_v58, %v1390_v58  ;;  %v1475_v24 = vpack.c.bf16 %v1389_v0, %v1389_v0  ;;  %v1482_v13 = vld [vmem:[%s9387_s11] sm:$0xff]  ;;  %v9814_v58 = vld [vmem:[#allocation28_spill] sm:$0xff] }
 0x160   : > { %v1151_v26 = vsel %vm1139_vm5, %v9809_v16, %v9808_v21  ;;  %v4337_v3 = vunpack.i.h.bf16 %v9810_v54  ;;  %v4381_v38 = vunpack.i.l.bf16 %v9811_v28  ;;  %v4377_v52 = vunpack.i.h.bf16 %v9812_v49  ;;  %1625 = vmatpush.bf16.msra.mxu1 %v1423_v25  ;;  %1586 = vmatpush.bf16.msra.mxu2 %v1420_v62 }
 0x161   : > { %v1472_v40 = vpack.c.bf16 %v1392_v33, %v1392_v33  ;;  %v4382_v9 = vunpack.i.h.bf16 %v9811_v28  ;;  %v4342_v29 = vunpack.i.h.bf16 %v9813_v1  ;;  %v4341_v7 = vunpack.i.l.bf16 %v9813_v1  ;;  %1598 = vmatpush.bf16.msra.mxu3 %v1437_v15  ;;  %v9815_v33 = vld [vmem:[#allocation32_spill] sm:$0xff]  ;;  %v9846_v1 = vld [vmem:[#allocation29_spill] sm:$0xff] }
 0x162   : > { %v4302_v0 = vunpack.i.h.bf16 %v9814_v58  ;;  %v4301_v44 = vunpack.i.l.bf16 %v9814_v58  ;;  %v4376_v5 = vunpack.i.l.bf16 %v9812_v49  ;;  %v1421_v59 = vpack.c.bf16 %v1200_v51, %v1151_v26  ;;  %3989 = vmatmul.msk.bf16.vlgmr.msrb.gmra.mxu3 %vm1488_vm12, %v5821_v35 }
 0x163   : > { %v5131_v42 = vmov 0   ;;  %v4297_v4 = vunpack.i.h.bf16 %v9815_v33  ;;  %v1521_v25 = vsel %vm1492_vm8, %v1474_v45, 0  ;;  %v1524_v62 = vsel %vm1492_vm8, %v1475_v24, 0  ;;  %v9821_v45 = vld [vmem:[#allocation22_spill] sm:$0xff] }
 0x164   : > { %4433 = vset.pattern.permute.xlu2 %v5131_v42  ;;  %4754 = vset.pattern.permute.xlu1 %v5131_v42  ;;  %v1391_v20 = vsel %vm1384_vm7, %v4412_v47, %v4416_v22  ;;  %v4336_v55 = vunpack.i.l.bf16 %v9810_v54  ;;  %v9816_v51 = vpack.c.bf16 %v5870_v36, %v5825_v53  ;;  %v9817_v57 = vpack.c.bf16 %v5876_v6, %v5842_v37  ;;  %v9818_v6 = vld [vmem:[#allocation18_spill] sm:$0xff] }
 0x165   : > { %1485 = vperm.xlu2 %4433, %v1482_v13   ;;  %5075 = vset.pattern.permute.xlu0 %v5131_v42  ;;  %v1515_v15 = vsel %vm1492_vm8, %v1472_v40, 0  ;;  %v1405_v8 = vpack.c.bf16 %v6088_v19, %v5922_v39  ;;  %v1341_v22 = vsel %vm1335_vm10, %v4377_v52, %v4381_v38  ;;  %v4296_v47 = vunpack.i.l.bf16 %v9815_v33  ;;  %v9819_v19 = vld [vmem:[#allocation25_spill] sm:$0xff]  ;;  %v9822_v13 = vld [vmem:[#allocation23_spill] sm:$0xff] }
 0x166   : > { %1613 = vmatpush.bf16.msrb.mxu0 %v9816_v51  ;;  %1626 = vmatpush.bf16.msra.mxu1 %v9817_v57  ;;  %v1292_v37 = vsel %vm1286_vm9, %v4337_v3, %v4341_v7  ;;  %v1291_v53 = vsel %vm1286_vm9, %v4341_v7, %v4342_v29  ;;  %v1340_v36 = vsel %vm1335_vm10, %v4381_v38, %v4382_v9  ;;  %v4177_v39 = vunpack.i.h.bf16 %v9818_v6  ;;  %v6220_v7 = vpop.permute.xlu0 %4424 }
 0x167   : > { %1587 = vmatpush.bf16.msra.mxu2 %v1404_v27  ;;  %1599 = vmatpush.bf16.msra.mxu3 %v1421_v59  ;;  %v4261_v27 = vunpack.i.l.bf16 %v9819_v19  ;;  %v9820_v21 = vunpack.i.h.bf16 %v5795_v11  ;;  %v1473_v26 = vpack.c.bf16 %v1391_v20, %v1391_v20  ;;  %v4257_v24 = vunpack.i.h.bf16 %v9821_v45 }
 0x168   : > { %v4256_v40 = vunpack.i.l.bf16 %v9821_v45  ;;  %v1243_v38 = vsel %vm1237_vm11, %v4297_v4, %v4301_v44  ;;  %v1242_v11 = vsel %vm1237_vm11, %v4301_v44, %v4302_v0  ;;  %v4221_v59 = vunpack.i.l.bf16 %v9822_v13  ;;  %v6232_v44 = vpop.permute.xlu1 %4429 }
 0x169   : > { %v1343_v16 = vsel %vm1335_vm10, %v9820_v21, %v4376_v5  ;;  %3993 = vmatmul.msk.bf16.vlgmr.msrb.gmra.mxu0 %vm1488_vm12, %v5821_v35  ;;  %v1458_v42 = vpack.c.bf16 %v1341_v22, %v1292_v37  ;;  %v4252_v51 = vunpack.i.h.bf16 %v5669_v41  ;;  %3994 = vmatmul.msk.bf16.vlgmr.msra.gmra.mxu1 %vm1488_vm12, %v5821_v35  ;;  %v4431_v22 = vunpack.i.l.bf16 %v6232_v44 }
 0x16a   : > { %1661 = vmatpush.bf16.msra.mxu0 %v1521_v25  ;;  %1674 = vmatpush.bf16.msrb.mxu1 %v1524_v62  ;;  %v1459_v25 = vpack.c.bf16 %v1340_v36, %v1291_v53  ;;  %v9823_v62 = vunpack.i.h.bf16 %v5677_v43  ;;  %v1293_v43 = vsel %vm1286_vm9, %v4336_v55, %v4337_v3  ;;  %v1342_v37 = vsel %vm1335_vm10, %v4376_v5, %v4377_v52  ;;  %v9825_v5 = vld [vmem:[#allocation7_spill] sm:$0xff] }
 0x16b   : > { %1635 = vmatpush.bf16.msrb.mxu2 %v1515_v15  ;;  %1600 = vmatpush.bf16.msra.mxu3 %v1405_v8  ;;  %v1245_v15 = vsel %vm1237_vm11, %v4292_v32, %v4296_v47  ;;  %v1518_v8 = vsel %vm1492_vm8, %v1473_v26, 0  ;;  %v4427_v50 = vunpack.i.h.bf16 %v6220_v7  ;;  %v4176_v32 = vunpack.i.l.bf16 %v9818_v6  ;;  %v9826_v36 = vld [vmem:[#allocation11_spill] sm:$0xff]  ;;  %v9828_v26 = vld [vmem:[#allocation9_spill] sm:$0xff] }
 0x16c   : > { %3991 = vmatmul.msk.bf16.vlgmr.msra.gmra.mxu2 %vm1488_vm12, %v5821_v35  ;;  %v1294_v20 = vsel %vm1286_vm9, %v9823_v62, %v4336_v55  ;;  %v4426_v54 = vunpack.i.l.bf16 %v6220_v7  ;;  %v9824_v3 = vunpack.i.h.bf16 %v5569_v34  ;;  %v1195_v49 = vsel %vm1188_vm6, %v4256_v40, %v4257_v24 }
 0x16d   : > { %v1456_v57 = vpack.c.bf16 %v1343_v16, %v1294_v20  ;;  %v4432_v52 = vunpack.i.h.bf16 %v6232_v44  ;;  %v1442_v53 = vpack.c.bf16 %v1243_v38, %v9825_v5  ;;  %v9827_v6 = vunpack.c.l.bf16 %v9826_v36  ;;  %v9834_v5 = vld [vmem:[#allocation6_spill] sm:$0xff] }
 0x16e   : > { %1662 = vmatpush.bf16.msra.mxu0 %v1458_v42  ;;  %1675 = vmatpush.bf16.msrb.mxu1 %v1459_v25  ;;  %v1146_v55 = vsel %vm1139_vm5, %v4216_v12, %v9824_v3  ;;  %v1194_v16 = vsel %vm1188_vm6, %v4257_v24, %v4261_v27  ;;  %v1440_v7 = vpack.c.bf16 %v1245_v15, %v9828_v26  ;;  %v9831_v15 = vunpack.i.l.bf16 %v5543_v2 }
 0x16f   : > { %1636 = vmatpush.bf16.msrb.mxu2 %v1456_v57  ;;  %1648 = vmatpush.bf16.msrb.mxu3 %v1518_v8  ;;  %v1443_v21 = vpack.c.bf16 %v1242_v11, %v9827_v6  ;;  %v1457_v42 = vpack.c.bf16 %v1342_v37, %v1293_v43  ;;  %v9829_v25 = vmov %v9824_v3  ;;  %v1197_v38 = vsel %vm1188_vm6, %v4251_v23, %v4252_v51  ;;  %v9830_v11 = vld [vmem:[#allocation14_spill] sm:$0xff] }
 0x170   : > { %v1145_v62 = vsel %vm1139_vm5, %v9829_v25, %v4221_v59  ;;  %v4181_v20 = vunpack.i.l.bf16 %v9830_v11  ;;  %v1244_v24 = vsel %vm1237_vm11, %v4296_v47, %v4297_v4  ;;  %v1386_v57 = vsel %vm1384_vm7, %v4427_v50, %v4431_v22 }
 0x171   : > { %v1385_v41 = vsel %vm1384_vm7, %v4431_v22, %v4432_v52  ;;  %v1097_v23 = vsel %vm1090_vm4, %v4176_v32, %v4177_v39  ;;  %v9832_v33 = vunpack.i.h.bf16 %v5509_v56  ;;  %v1388_v47 = vsel %vm1384_vm7, %v4422_v60, %v4426_v54  ;;  %v9835_v60 = vld [vmem:[#allocation36_spill] sm:$0xff] }
 0x172   : > { %1663 = vmatpush.bf16.msra.mxu0 %v1442_v53  ;;  %1676 = vmatpush.bf16.msrb.mxu1 %v1443_v21  ;;  %v1426_v43 = vpack.c.bf16 %v1195_v49, %v1146_v55  ;;  %v1427_v8 = vpack.c.bf16 %v1194_v16, %v1145_v62  ;;  %v9833_v22 = vunpack.i.l.bf16 %v5565_v17  ;;  %v1096_v56 = vsel %vm1090_vm4, %v4177_v39, %v4181_v20  ;;  %v9836_v49 = vld [vmem:[#allocation31_spill] sm:$0xff]  ;;  %v9838_v39 = vld [vmem:[#allocation38_spill] sm:$0xff] }
 0x173   : > { %1637 = vmatpush.bf16.msrb.mxu2 %v1440_v7  ;;  %1649 = vmatpush.bf16.msrb.mxu3 %v1457_v42  ;;  %v1047_v4 = vsel %vm1041_vm3, %v9832_v33, %v9831_v15  ;;  %v1441_v63 = vpack.c.bf16 %v1244_v24, %v9834_v5  ;;  %v1478_v53 = vpack.c.bf16 %v1386_v57, %v1386_v57  ;;  %v4351_v55 = vunpack.i.l.bf16 %v9835_v60  ;;  %v9837_v7 = vld [vmem:[#allocation43_spill] sm:$0xff]  ;;  %v9841_v33 = vld [vmem:[#allocation33_spill] sm:$0xff] }
 0x174   : > { %v1148_v37 = vsel %vm1139_vm5, %v9833_v22, %v4212_v10  ;;  %v1479_v6 = vpack.c.bf16 %v1385_v41, %v1385_v41  ;;  %v4347_v21 = vunpack.i.h.bf16 %v9836_v49  ;;  %v1196_v16 = vsel %vm1188_vm6, %v4252_v51, %v4256_v40  ;;  %3992 = vmatmul.msk.bf16.vlgmr.msra.gmra.mxu3 %vm1488_vm12, %v5821_v35 }
 0x175   : > { %v1424_v3 = vpack.c.bf16 %v1197_v38, %v1148_v37  ;;  %v1476_v26 = vpack.c.bf16 %v1388_v47, %v1388_v47  ;;  %v4397_v42 = vunpack.i.h.bf16 %v9837_v7  ;;  %v4406_v25 = vunpack.i.l.bf16 %v9838_v39 }
 0x176   : > { %1664 = vmatpush.bf16.msra.mxu0 %v1426_v43  ;;  %1677 = vmatpush.bf16.msrb.mxu1 %v1427_v8  ;;  %v1410_v62 = vpack.c.bf16 %v1097_v23, %v5940_v30  ;;  %v9839_v38 = vunpack.i.h.bf16 %v5527_v61  ;;  %v4346_v57 = vunpack.i.l.bf16 %v9836_v49  ;;  %v4396_v45 = vunpack.i.l.bf16 %v9837_v7  ;;  %v9840_v23 = vld [vmem:[#allocation30_spill] sm:$0xff] }
 0x177   : > { %1638 = vmatpush.bf16.msrb.mxu2 %v1424_v3  ;;  %1650 = vmatpush.bf16.msrb.mxu3 %v1441_v63  ;;  %v1411_v41 = vpack.c.bf16 %v1096_v56, %v1047_v4  ;;  %v1147_v40 = vsel %vm1139_vm5, %v4212_v10, %v4216_v12  ;;  %v1533_v30 = vsel %vm1492_vm8, %v1478_v53, 0  ;;  %v1536_v61 = vsel %vm1492_vm8, %v1479_v6, 0  ;;  %v9845_v3 = vld [vmem:[#allocation44_spill] sm:$0xff] }
 0x178   : > { %v1098_v24 = vsel %vm1090_vm4, %v9839_v38, %v4176_v32  ;;  %v1425_v51 = vpack.c.bf16 %v1196_v16, %v1147_v40  ;;  %v1387_v32 = vsel %vm1384_vm7, %v4426_v54, %v4427_v50  ;;  %v4307_v15 = vunpack.i.h.bf16 %v9840_v23  ;;  %v9848_v38 = vld [vmem:[#allocation15_spill] sm:$0xff] }
 0x179   : > { %v4312_v47 = vunpack.i.h.bf16 %v9841_v33  ;;  %v1527_v34 = vsel %vm1492_vm8, %v1476_v26, 0  ;;  %v1288_v17 = vsel %vm1286_vm9, %v4347_v21, %v4351_v55  ;;  %v4311_v12 = vunpack.i.l.bf16 %v9841_v33 }
 0x17a   : > { %1665 = vmatpush.bf16.msra.mxu0 %v1410_v62  ;;  %1678 = vmatpush.bf16.msrb.mxu1 %v1411_v41  ;;  %v9842_v10 = vpack.c.bf16 %v5899_v48, %v5846_v14  ;;  %v1337_v50 = vsel %vm1335_vm10, %v4397_v42, %v4406_v25  ;;  %v9843_v54 = vunpack.i.h.bf16 %v9835_v60  ;;  %v9844_v43 = vunpack.i.h.bf16 %v9838_v39  ;;  %v9847_v39 = vld [vmem:[#allocation13_spill] sm:$0xff] }
 0x17b   : > { %1651 = vmatpush.bf16.msrb.mxu3 %v1425_v51  ;;  %v4306_v22 = vunpack.i.l.bf16 %v9840_v23  ;;  %v1290_v14 = vsel %vm1286_vm9, %v4342_v29, %v4346_v57  ;;  %v1339_v48 = vsel %vm1335_vm10, %v4382_v9, %v4396_v45  ;;  %v1477_v37 = vpack.c.bf16 %v1387_v32, %v1387_v32  ;;  %v9849_v41 = vld [vmem:[#allocation17_spill] sm:$0xff]  ;;  %v9850_v51 = vld [vmem:[#allocation10_spill] sm:$0xff] }
 0x17c   : > { %1639 = vmatpush.bf16.msrb.mxu2 %v9842_v10  ;;  %v1287_v4 = vsel %vm1286_vm9, %v4351_v55, %v9843_v54  ;;  %v1336_v8 = vsel %vm1335_vm10, %v4406_v25, %v9844_v43  ;;  %v4262_v56 = vunpack.i.h.bf16 %v9819_v19  ;;  %v1409_v5 = vpack.c.bf16 %v1098_v24, %v9845_v3 }
 0x17d   : > { %v4222_v63 = vunpack.i.h.bf16 %v9822_v13  ;;  %v4267_v53 = vunpack.i.h.bf16 %v9846_v1  ;;  %3997 = vmatmul.msk.bf16.vlgmr.msra.gmra.mxu0 %vm1488_vm12, %v5821_v35  ;;  %v1462_v28 = vpack.c.bf16 %v1337_v50, %v1288_v17  ;;  %v1463_v9 = vpack.c.bf16 %v1336_v8, %v1287_v4  ;;  %3998 = vmatmul.msk.bf16.vlgmr.msrb.gmra.mxu1 %vm1488_vm12, %v5821_v35 }
 0x17e   : > { %1713 = vmatpush.bf16.msrb.mxu0 %v1533_v30  ;;  %1726 = vmatpush.bf16.msra.mxu1 %v1536_v61  ;;  %v4266_v29 = vunpack.i.l.bf16 %v9846_v1  ;;  %v1460_v6 = vpack.c.bf16 %v1339_v48, %v1290_v14  ;;  %v1239_v60 = vsel %vm1237_vm11, %v4307_v15, %v4311_v12  ;;  %v1238_v55 = vsel %vm1237_vm11, %v4311_v12, %v4312_v47  ;;  %v9857_v14 = vld [vmem:[#allocation42_spill] sm:$0xff] }
 0x17f   : > { %3995 = vmatmul.msk.bf16.vlgmr.msrb.gmra.mxu2 %vm1488_vm12, %v5821_v35  ;;  %1652 = vmatpush.bf16.msrb.mxu3 %v1409_v5  ;;  %v1530_v49 = vsel %vm1492_vm8, %v1477_v37, 0  ;;  %v1241_v16 = vsel %vm1237_vm11, %v4302_v0, %v4306_v22  ;;  %v1289_v26 = vsel %vm1286_vm9, %v4346_v57, %v4347_v21  ;;  %v1338_v7 = vsel %vm1335_vm10, %v4396_v45, %v4397_v42  ;;  %v9852_v57 = vld [vmem:[#allocation12_spill] sm:$0xff]  ;;  %v9860_v5 = vld [vmem:[#allocation19_spill] sm:$0xff] }
 0x180   : > { %1687 = vmatpush.bf16.msra.mxu2 %v1527_v34  ;;  %v4147_v25 = vunpack.i.h.bf16 %v9847_v39  ;;  %v4146_v62 = vunpack.i.l.bf16 %v9847_v39  ;;  %v4187_v24 = vunpack.i.h.bf16 %v9848_v38  ;;  %v4227_v40 = vunpack.i.h.bf16 %v9849_v41 }
 0x181   : > { %v4182_v58 = vunpack.i.h.bf16 %v9830_v11  ;;  %v4226_v0 = vunpack.i.l.bf16 %v9849_v41  ;;  %v9851_v30 = vunpack.c.h.bf16 %v9850_v51  ;;  %v9853_v61 = vunpack.c.l.bf16 %v9852_v57 }
 0x182   : > { %1714 = vmatpush.bf16.msrb.mxu0 %v1462_v28  ;;  %1727 = vmatpush.bf16.msra.mxu1 %v1463_v9  ;;  %v9854_v45 = vunpack.c.h.bf16 %v9826_v36  ;;  %v1461_v23 = vpack.c.bf16 %v1338_v7, %v1289_v26  ;;  %v1191_v34 = vsel %vm1188_vm6, %v4266_v29, %v4267_v53  ;;  %v9855_v17 = vunpack.i.l.bf16 %v5633_v18 }
 0x183   : > { %1700 = vmatpush.bf16.msra.mxu3 %v1530_v49  ;;  %v1446_v21 = vpack.c.bf16 %v1239_v60, %v9851_v30  ;;  %v1447_v42 = vpack.c.bf16 %v1238_v55, %v9853_v61  ;;  %v4142_v10 = vunpack.i.h.bf16 %v5543_v2  ;;  %v1144_v36 = vsel %vm1139_vm5, %v4221_v59, %v4222_v63  ;;  %v9874_v30 = vld [vmem:[#allocation21_spill] sm:$0xff] }
 0x184   : > { %1688 = vmatpush.bf16.msra.mxu2 %v1460_v6  ;;  %v1444_v32 = vpack.c.bf16 %v1241_v16, %v9854_v45  ;;  %v1190_v12 = vsel %vm1188_vm6, %v4267_v53, %v9855_v17  ;;  %v1193_v50 = vsel %vm1188_vm6, %v4261_v27, %v4262_v56  ;;  %v1240_v18 = vsel %vm1237_vm11, %v4306_v22, %v4307_v15  ;;  %v9863_v6 = vld [vmem:[#allocation16_spill] sm:$0xff]  ;;  %v6513_v45 = vld [vmem:[%s6509_s3] sm:$0xff] }
 0x185   : > { %v4186_v54 = vunpack.i.l.bf16 %v9848_v38  ;;  %v1142_v4 = vsel %vm1139_vm5, %v4226_v0, %v4227_v40  ;;  %v9856_v43 = vunpack.i.l.bf16 %v5582_v46  ;;  %v1044_v27 = vsel %vm1041_vm3, %v4146_v62, %v4147_v25  ;;  %3996 = vmatmul.msk.bf16.vlgmr.msrb.gmra.mxu3 %vm1488_vm12, %v5821_v35  ;;  %v9868_v38 = vld [vmem:[#allocation39_spill] sm:$0xff] }
 0x186   : > { %1715 = vmatpush.bf16.msrb.mxu0 %v1446_v21  ;;  %1728 = vmatpush.bf16.msra.mxu1 %v1447_v42  ;;  %v1430_v8 = vpack.c.bf16 %v1191_v34, %v1142_v4  ;;  %v9858_v48 = vunpack.i.l.bf16 %v9857_v14  ;;  %v1428_v22 = vpack.c.bf16 %v1193_v50, %v1144_v36  ;;  %v9859_v37 = vunpack.c.l.bf16 %v9850_v51  ;;  %v9875_v21 = vld [vmem:[#allocation20_spill] sm:$0xff] }
 0x187   : > { %1701 = vmatpush.bf16.msra.mxu3 %v1461_v23  ;;  %v1141_v59 = vsel %vm1139_vm5, %v4227_v40, %v9856_v43  ;;  %v1093_v46 = vsel %vm1090_vm4, %v4186_v54, %v4187_v24  ;;  %v9861_v1 = vunpack.i.l.bf16 %v9860_v5  ;;  %v9862_v28 = vunpack.i.l.bf16 %v5543_v2 }
 0x188   : > { %1689 = vmatpush.bf16.msra.mxu2 %v1444_v32  ;;  %v1431_v19 = vpack.c.bf16 %v1190_v12, %v1141_v59  ;;  %v1400_v15 = vsel %vm1384_vm7, %v4432_v52, %v9858_v48  ;;  %v1445_v3 = vpack.c.bf16 %v1240_v18, %v9859_v37  ;;  %v1095_v52 = vsel %vm1090_vm4, %v4181_v20, %v4182_v58  ;;  %v5078_v32 = vld [vmem:[%s9878_s6] ss:$0 sm:$0xff] }
 0x189   : > { %v1092_v53 = vsel %vm1090_vm4, %v4187_v24, %v9861_v1  ;;  %v1046_v44 = vsel %vm1041_vm3, %v9862_v28, %v4142_v10  ;;  %v1192_v9 = vsel %vm1188_vm6, %v4262_v56, %v4266_v29  ;;  %v9864_v60 = vunpack.i.l.bf16 %v9863_v6 }
 0x18a   : > { %1716 = vmatpush.bf16.msrb.mxu0 %v1430_v8  ;;  %1729 = vmatpush.bf16.msra.mxu1 %v1431_v19  ;;  %v1480_v49 = vpack.c.bf16 %v1400_v15, %v1400_v15  ;;  %v1414_v2 = vpack.c.bf16 %v1093_v46, %v1044_v27  ;;  %v1143_v11 = vsel %vm1139_vm5, %v4222_v63, %v4226_v0  ;;  %v9865_v63 = vld [vmem:[#allocation27_spill] sm:$0xff]  ;;  %v9870_v41 = vunpack.c.h.bf16 %v9852_v57  ;;  %v9872_v0 = vld [vmem:[#allocation24_spill] sm:$0xff] }
 0x18b   : > { %1702 = vmatpush.bf16.msra.mxu3 %v1445_v3  ;;  %v1043_v55 = vsel %vm1041_vm3, %v4147_v25, %v9864_v60  ;;  %v1412_v26 = vpack.c.bf16 %v1095_v52, %v1046_v44  ;;  %v1429_v20 = vpack.c.bf16 %v1192_v9, %v1143_v11  ;;  %v1045_v56 = vsel %vm1041_vm3, %v4142_v10, %v4146_v62  ;;  %v9867_v62 = vld [vmem:[#allocation40_spill] sm:$0xff] }
 0x18c   : > { %1690 = vmatpush.bf16.msra.mxu2 %v1428_v22  ;;  %v1415_v16 = vpack.c.bf16 %v1092_v53, %v1043_v55  ;;  %v1094_v29 = vsel %vm1090_vm4, %v4182_v58, %v4186_v54  ;;  %v1539_v7 = vsel %vm1492_vm8, %v1480_v49, 0  ;;  %v9866_v39 = vunpack.i.l.bf16 %v9865_v63  ;;  %v9871_v58 = vld [vmem:[#allocation26_spill] sm:$0xff] }
 0x18d   : > { %v1413_v13 = vpack.c.bf16 %v1094_v29, %v1045_v56  ;;  %v9869_v24 = vpack.c.bf16 %v9867_v62, %v9868_v38  ;;  %v9873_v51 = vpack.c.bf16 %v9871_v58, %v9872_v0  ;;  %v9876_v61 = vpack.c.bf16 %v9874_v30, %v9875_v21 }
 0x18e   : > { %1717 = vmatpush.bf16.msrb.mxu0 %v1414_v2  ;;  %1730 = vmatpush.bf16.msra.mxu1 %v1415_v16  ;;  %v1253_v25 = vsel %vm1237_vm11, %v4312_v47, %v9866_v39  ;;  %v6527_v10 = vperm.slane %v6513_v45, 0  ;;  %v6547_v15 = vperm.slane %v6513_v45, 3  ;;  %v6554_v1 = vperm.slane %v6513_v45, 6 }
 0x18f   : > { %1703 = vmatpush.bf16.msra.mxu3 %v1429_v20  ;;  %v1448_v40 = vpack.c.bf16 %v1253_v25, %v9870_v41  ;;  %v6573_v11 = vperm.slane %v6513_v45, 7  ;;  %v6576_v20 = vld [vmem:[%s6509_s3 + $0x8] sm:$0xff]  ;;  %s9902_s3 = smov 112  }
 0x190   : > { %1691 = vmatpush.bf16.msra.mxu2 %v1412_v26  ;;  %9880 = vst [vmem:[#allocation34_spill] sm:$0xff] %v6527_v10  ;;  %v6583_v63 = vperm.slane %v6576_v20, 2  ;;  %v6600_v21 = vperm.slane %v6576_v20, 3 }
 0x191   : > { %4001 = vmatmul.msk.bf16.vlgmr.msrb.gmra.mxu0 %vm1488_vm12, %v5821_v35  ;;  %4002 = vmatmul.msk.bf16.vlgmr.msra.gmra.mxu1 %vm1488_vm12, %v5821_v35  ;;  %9882 = vst [vmem:[#allocation35_spill] sm:$0xff] %v6547_v15 }
 0x192   : > { %9883 = vst [vmem:[#allocation37_spill] sm:$0xff] %v6554_v1 }
 0x193   : > { %3999 = vmatmul.msk.bf16.vlgmr.msra.gmra.mxu2 %vm1488_vm12, %v5821_v35  ;;  %1704 = vmatpush.bf16.msra.mxu3 %v1413_v13  ;;  %9888 = vst [vmem:[#allocation32_spill] sm:$0xff] %v6573_v11 }
 0x194   : > { %1739 = vmatpush.bf16.msrb.mxu2 %v1539_v7  ;;  %9889 = vst [vmem:[#allocation18_spill] sm:$0xff] %v6583_v63 }
 0x195   : > { %9891 = vst [vmem:[#allocation22_spill] sm:$0xff] %v6600_v21 }
 0x196   : > { %4000 = vmatmul.msk.bf16.vlgmr.msra.gmra.mxu3 %vm1488_vm12, %v5821_v35 }
 0x198   : > { %1740 = vmatpush.bf16.msrb.mxu2 %v9869_v24 }
 0x19c   : > { %1741 = vmatpush.bf16.msrb.mxu2 %v1448_v40 }
 0x1a0   : > { %1742 = vmatpush.bf16.msrb.mxu2 %v9873_v51 }
 0x1a4   : > { %1743 = vmatpush.bf16.msrb.mxu2 %v9876_v61 }
 0x1a7   : > { %4003 = vmatmul.msk.bf16.vlgmr.msrb.gmra.mxu2 %vm1488_vm12, %v5821_v35  ;;  %v6519_v35 = vperm.slane %v6513_v45, 2 }
 0x1a9   : > { %9879 = vst [vmem:[#allocation8_spill] sm:$0xff] %v6519_v35 }
 0x1b4   : > { %v1576_v33 = vpop.f32.mrf.mxu1 }
 0x1bc   : > { %v1578_v47 = vpop.f32.mrf.mxu1 }
 0x1bf   : > { %v6503_v57 = vpop.permute.xlu2 %1485 }
 0x1c0   : > { %v1577_v42 = vadd.f32 %v1576_v33, %v6503_v57 }
 0x1c2   : > { %v1751_v23 = vmax.f32 %v1577_v42, 0.0 }
 0x1c4   : > { %v6532_v18 = vmul.f32 %v6519_v35, %v1751_v23 }
 0x1c6   : > { %9881 = vst [vmem:[#allocation41_spill] sm:$0xff] %v6532_v18 }
 0x1d3   : > { %v1550_v34 = vpop.f32.mrf.mxu2 }
 0x1d4   : > { %v1551_v12 = vadd.f32 %v1550_v34, %v6503_v57 }
 0x1d5   : > { %v946_v17 = vpop.f32.mrf.mxu3 }
 0x1d6   : > { %v6529_v36 = vadd.f32 %v5078_v32, %v946_v17  ;;  %v1749_v50 = vmax.f32 %v1551_v12, 0.0 }
 0x1d8   : > { %950 = vst [vmem:[%s715_s5] sm:$0xff] %v6529_v36  ;;  %v6536_v54 = vmul.f32 %v6527_v10, %v1749_v50  ;;  %s9908_s5 = smov 113  }
 0x1da   : > { %v4434_v4 = vpack.i.bf16 %v6532_v18, %v6536_v54 }
 0x1db   : > { %v1552_v43 = vpop.f32.mrf.mxu2 }
 0x1dc   : > { %4435 = vrot.lane.b32.xlu0 %v4434_v4, %s9490_s0  ;;  %v6612_v43 = vperm.slane %v6576_v20, 6 }
 0x1dd   : > { %v948_v59 = vpop.f32.mrf.mxu3 }
 0x1de   : > { %9893 = vst [vmem:[#allocation7_spill] sm:$0xff] %v6612_v43 }
 0x1e5   : > { %v6543_v27 = vpop.f32.mrf.mxu3 }
 0x1e6   : > { %v6541_v8 = vpop.f32.mrf.mxu0  ;;  %v1628_v19 = vpop.f32.mrf.mxu1 }
 0x1e7   : > { %v1629_v37 = vadd.f32 %v1628_v19, %v6503_v57  ;;  %v6616_v19 = vperm.slane %v6576_v20, 7 }
 0x1e9   : > { %v1755_v53 = vmax.f32 %v1629_v37, 0.0  ;;  %9894 = vst [vmem:[#allocation11_spill] sm:$0xff] %v6616_v19 }
 0x1eb   : > { %v6562_v9 = vmul.f32 %v6554_v1, %v1755_v53 }
 0x1ed   : > { %v1565_v44 = vpop.f32.mrf.mxu3  ;;  %9887 = vst [vmem:[#allocation28_spill] sm:$0xff] %v6562_v9 }
 0x1ee   : > { %v1617_v22 = vpop.f32.mrf.mxu0  ;;  %v1630_v46 = vpop.f32.mrf.mxu1 }
 0x1ef   : > { %v1589_v14 = vpop.f32.mrf.mxu2  ;;  %v6627_v46 = vperm.slane %v6513_v45, 1 }
 0x1f0   : > { %v1590_v48 = vadd.f32 %v1589_v14, %v6503_v57  ;;  %v1564_v14 = vadd.f32 %v6543_v27, %v6503_v57 }
 0x1f1   : > { %9897 = vst [vmem:[#allocation6_spill] sm:$0xff] %v6627_v46 }
 0x1f2   : > { %v1752_v3 = vmax.f32 %v1590_v48, 0.0  ;;  %v1750_v53 = vmax.f32 %v1564_v14, 0.0  ;;  %v6725_v14 = vperm.slane %v6576_v20, 4 }
 0x1f4   : > { %v6551_v5 = vmul.f32 %v6547_v15, %v1752_v3  ;;  %v6635_v27 = vmul.f32 %v6627_v46, %v1750_v53  ;;  %9912 = vst [vmem:[#allocation15_spill] sm:$0xff] %v6725_v14 }
 0x1f6   : > { %v4449_v28 = vpack.i.bf16 %v6551_v5, %v6532_v18  ;;  %v4454_v55 = vpack.i.bf16 %v6562_v9, %v6551_v5  ;;  %9898 = vst [vmem:[#allocation36_spill] sm:$0xff] %v6635_v27 }
 0x1f7   : > { %v1591_v52 = vpop.f32.mrf.mxu2  ;;  %v6569_v49 = vpop.f32.mrf.mxu3 }
 0x1f8   : > { %4450 = vrot.lane.b32.xlu2 %v4449_v28, %s9884_s28  ;;  %4440 = vrot.lane.b32.xlu1 %v4449_v28, %s9885_s8 }
 0x1f9   : > { %4445 = vrot.lane.b32.xlu0 %v4449_v28, %s9886_s29 }
 0x1fa   : > { %v6564_v6 = vpop.f32.mrf.mxu0  ;;  %v1680_v60 = vpop.f32.mrf.mxu1 }
 0x1fb   : > { %v1681_v56 = vadd.f32 %v1680_v60, %v6503_v57  ;;  %v6641_v60 = vpack.i.bf16 %v6635_v27, %v6536_v54 }
 0x1fd   : > { %v1759_v39 = vmax.f32 %v1681_v56, 0.0  ;;  %v6657_v56 = vperm.slane %v6513_v45, 5 }
 0x1ff   : > { %v1604_v25 = vpop.f32.mrf.mxu3  ;;  %v6591_v24 = vmul.f32 %v6583_v63, %v1759_v39  ;;  %9900 = vst [vmem:[#allocation31_spill] sm:$0xff] %v6657_v56 }
 0x200   : > { %4455 = vrot.lane.b32.xlu2 %v4454_v55, %s9490_s0  ;;  %v1668_v25 = vadd.f32 %v6564_v6, %v6503_v57 }
 0x201   : > { %9890 = vst [vmem:[#allocation25_spill] sm:$0xff] %v6591_v24 }
 0x202   : > { %v1641_v2 = vpop.f32.mrf.mxu2  ;;  %v1669_v26 = vpop.f32.mrf.mxu0 }
 0x203   : > { %v1642_v16 = vadd.f32 %v1641_v2, %v6503_v57  ;;  %v1682_v7 = vpop.f32.mrf.mxu1  ;;  %v1616_v2 = vadd.f32 %v6541_v8, %v6503_v57 }
 0x204   : > { %v6660_v7 = vperm.slane %v6513_v45, 4 }
 0x205   : > { %v1756_v29 = vmax.f32 %v1642_v16, 0.0  ;;  %v1603_v16 = vadd.f32 %v6569_v49, %v6503_v57  ;;  %v1754_v26 = vmax.f32 %v1616_v2, 0.0 }
 0x206   : > { %9901 = vst [vmem:[#allocation43_spill] sm:$0xff] %v6660_v7 }
 0x207   : > { %v6580_v13 = vmul.f32 %v6573_v11, %v1756_v29  ;;  %v1753_v29 = vmax.f32 %v1603_v16, 0.0  ;;  %v6667_v39 = vmul.f32 %v6657_v56, %v1754_v26 }
 0x208   : > { %v1654_v0 = vpop.f32.mrf.mxu3 }
 0x209   : > { %v4469_v62 = vpack.i.bf16 %v6580_v13, %v6562_v9  ;;  %v4474_v58 = vpack.i.bf16 %v6591_v24, %v6580_v13  ;;  %9903 = vst [vmem:[#allocation38_spill] sm:$0xff] %v6667_v39  ;;  %v6670_v8 = vmul.f32 %v6660_v7, %v1753_v29  ;;  %v1655_v45 = vadd.f32 %v1654_v0, %v6503_v57  ;;  %v951_v0 = vld [vmem:[%s9910_s7] sm:$0x1]  ;;  %s719_s7 = scalar_lea.vmem %s9395_s19, %s5340_s24 }
 0x20a   : > { %v1643_v38 = vpop.f32.mrf.mxu2 }
 0x20b   : > { %4470 = vrot.lane.b32.xlu1 %v4469_v62, %s9884_s28  ;;  %4460 = vrot.lane.b32.xlu0 %v4469_v62, %s9885_s8  ;;  %9904 = vst [vmem:[#allocation30_spill] sm:$0xff] %v6670_v8  ;;  %v6674_v49 = vpack.i.bf16 %v6667_v39, %v6670_v8  ;;  %v6684_v38 = vperm.slane %v6576_v20, 0 }
 0x20c   : > { %4465 = vrot.lane.b32.xlu2 %v4469_v62, %s9886_s29  ;;  %v1757_v62 = vmax.f32 %v1655_v45, 0.0 }
 0x20d   : > { %9906 = vst [vmem:[#allocation33_spill] sm:$0xff] %v6684_v38 }
 0x20e   : > { %v6593_v41 = vpop.f32.mrf.mxu0  ;;  %v1732_v40 = vpop.f32.mrf.mxu1  ;;  %v6698_v6 = vmul.f32 %v6684_v38, %v1757_v62 }
 0x20f   : > { %v1733_v17 = vadd.f32 %v1732_v40, %v6503_v57  ;;  %v6688_v40 = vpack.i.bf16 %v6670_v8, %v6551_v5 }
 0x210   : > { %v1656_v32 = vpop.f32.mrf.mxu3  ;;  %9909 = vst [vmem:[#allocation29_spill] sm:$0xff] %v6698_v6 }
 0x211   : > { %v1763_v4 = vmax.f32 %v1733_v17, 0.0  ;;  %v1720_v17 = vadd.f32 %v6593_v41, %v6503_v57  ;;  %v6735_v41 = vperm.slane %v6576_v20, 5 }
 0x213   : > { %4475 = vrot.lane.b32.xlu1 %v4474_v58, %s9490_s0  ;;  %v6621_v22 = vmul.f32 %v6612_v43, %v1763_v4  ;;  %v1758_v58 = vmax.f32 %v1668_v25, 0.0  ;;  %9913 = vst [vmem:[#allocation17_spill] sm:$0xff] %v6735_v41 }
 0x215   : > { %9895 = vst [vmem:[#allocation9_spill] sm:$0xff] %v6621_v22 }
 0x216   : > { %v1693_v51 = vpop.f32.mrf.mxu2  ;;  %v1734_v61 = vpop.f32.mrf.mxu1 }
 0x217   : > { %v1694_v30 = vadd.f32 %v1693_v51, %v6503_v57  ;;  %v1721_v33 = vpop.f32.mrf.mxu0  ;;  %v6691_v51 = vperm.slane %v6576_v20, 1 }
 0x218   : > { %v952_v33 = vsub.f32 1.0, %v951_v0 }
 0x219   : > { %v1760_v47 = vmax.f32 %v1694_v30, 0.0  ;;  %v1706_v12 = vpop.f32.mrf.mxu3  ;;  %9907 = vst [vmem:[#allocation44_spill] sm:$0xff] %v6691_v51  ;;  %v6704_v30 = vmul.f32 %v6691_v51, %v1758_v58 }
 0x21a   : > { %v953_v32 = vmul.f32 1e+30, %v952_v33 }
 0x21b   : > { %v6603_v42 = vmul.f32 %v6600_v21, %v1760_v47  ;;  %9911 = vst [vmem:[#allocation13_spill] sm:$0xff] %v6704_v30  ;;  %v6710_v47 = vpack.i.bf16 %v6704_v30, %v6698_v6 }
 0x21d   : > { %9892 = vst [vmem:[#allocation23_spill] sm:$0xff] %v6603_v42  ;;  %v4479_v23 = vpack.i.bf16 %v6603_v42, %v6591_v24 }
 0x21e   : > { %v1695_v34 = vpop.f32.mrf.mxu2 }
 0x21f   : > { %4480 = vrot.lane.b32.xlu2 %v4479_v23, %s9885_s8  ;;  %4485 = vrot.lane.b32.xlu1 %v4479_v23, %s9886_s29 }
 0x220   : > { %4490 = vrot.lane.b32.xlu0 %v4479_v23, %s9884_s28  ;;  %v1707_v23 = vadd.f32 %v1706_v12, %v6503_v57 }
 0x221   : > { %v1708_v3 = vpop.f32.mrf.mxu3 }
 0x222   : > { %v955_v3 = vperm.slane %v953_v32, 0  ;;  %v1761_v53 = vmax.f32 %v1707_v23, 0.0 }
 0x224   : > { %v6763_v16 = vmul.f32 %v6725_v14, %v1761_v53 }
 0x226   : > { %9914 = vst [vmem:[#allocation10_spill] sm:$0xff] %v6763_v16  ;;  %v4644_v45 = vpack.i.bf16 %v6763_v16, %v6603_v42 }
 0x22a   : > { %v1745_v50 = vpop.f32.mrf.mxu2 }
 0x22b   : > { %v1746_v59 = vadd.f32 %v1745_v50, %v6503_v57  ;;  %v1762_v57 = vmax.f32 %v1720_v17, 0.0 }
 0x22d   : > { %v1764_v48 = vmax.f32 %v1746_v59, 0.0  ;;  %v6767_v26 = vmul.f32 %v6735_v41, %v1762_v57 }
 0x22f   : > { %v6624_v37 = vmul.f32 %v6616_v19, %v1764_v48  ;;  %9915 = vst [vmem:[#allocation12_spill] sm:$0xff] %v6767_v26  ;;  %v6771_v29 = vpack.i.bf16 %v6767_v26, %v6763_v16 }
 0x231   : > { %9896 = vst [vmem:[#allocation14_spill] sm:$0xff] %v6624_v37  ;;  %v4504_v28 = vpack.i.bf16 %v6624_v37, %v6621_v22  ;;  %v4514_v52 = vpack.i.bf16 %v6624_v37, %v6603_v42  ;;  %v6645_v55 = vpack.i.bf16 %v6624_v37, %v6532_v18 }
 0x232   : > { %v1747_v44 = vpop.f32.mrf.mxu2 }
 0x233   : > { %4505 = vrot.lane.b32.xlu2 %v4504_v28, %s9884_s28  ;;  %4495 = vrot.lane.b32.xlu1 %v4504_v28, %s9885_s8 }
 0x234   : > { %4500 = vrot.lane.b32.xlu0 %v4504_v28, %s9886_s29  ;;  %v6732_v28 = vpack.i.bf16 %v6698_v6, %v6580_v13 }
 0x23b   : > { %4515 = vrot.lane.b32.xlu2 %v4514_v52, %s9490_s0  ;;  %4530 = vrot.lane.b32.xlu1 %v6641_v60, %s9884_s28  ;;  %v6758_v52 = vsub.f32 %v6529_v36, %v955_v3  ;;  %s9919_s0 = smov 1  }
 0x23c   : > { %4510 = vrot.lane.b32.xlu0 %v6645_v55, %s9899_s25 }
 0x243   : > { %4545 = vrot.lane.b32.xlu1 %v6641_v60, %s9902_s3  ;;  %4525 = vrot.lane.b32.xlu2 %v6641_v60, %s9886_s29 }
 0x24b   : > { %4550 = vrot.lane.b32.xlu1 %v6641_v60, %s9905_s26  ;;  %4555 = vrot.lane.b32.xlu2 %v6674_v49, %s9885_s8 }
 0x24e   : > { %v6717_v34 = vpop.permute.xlu0 %4435 }
 0x24f   : > { %v9493_v59 = vunpack.i.h.bf16 %v6717_v34 }
 0x252   : > { %v6706_v61 = vpop.permute.xlu2 %4450 }
 0x253   : > { %4560 = vrot.lane.b32.xlu1 %v6674_v49, %s9886_s29  ;;  %4575 = vrot.lane.b32.xlu2 %v6688_v40, %s9908_s5  ;;  %v9495_v50 = vunpack.i.h.bf16 %v6706_v61  ;;  %v9498_v4 = vunpack.i.l.bf16 %v6706_v61 }
 0x255   : > { %v6747_v44 = vsel %vm1139_vm5, %v9498_v4, %v9495_v50 }
 0x25a   : > { %v6727_v48 = vpop.permute.xlu2 %4455 }
 0x25b   : > { %4570 = vrot.lane.b32.xlu1 %v6688_v40, %s9899_s25  ;;  %4600 = vrot.lane.b32.xlu2 %v6710_v47, %s9884_s28  ;;  %v9494_v12 = vunpack.i.l.bf16 %v6727_v48 }
 0x25d   : > { %v6755_v20 = vsel %vm1188_vm6, %v9493_v59, %v9494_v12 }
 0x263   : > { %4585 = vrot.lane.b32.xlu1 %v6688_v40, %s9905_s26  ;;  %4615 = vrot.lane.b32.xlu2 %v6732_v28, %s9902_s3 }
 0x266   : > { %958 = vmax.xlane.f32.xlu0 %v6758_v52  ;;  %v6813_v3 = vpop.permute.xlu2 %4465 }
 0x267   : > { %v9503_v53 = vunpack.i.h.bf16 %v6813_v3  ;;  %v9504_v57 = vunpack.i.l.bf16 %v6813_v3 }
 0x26a   : > { %v6777_v36 = vpop.permute.xlu1 %4440 }
 0x26b   : > { %4590 = vrot.lane.b32.xlu1 %v6710_v47, %s9885_s8  ;;  %4635 = vrot.lane.b32.xlu2 %v6771_v29, %s9886_s29  ;;  %v9499_v25 = vunpack.i.h.bf16 %v6777_v36  ;;  %v9496_v62 = vunpack.i.l.bf16 %v6777_v36  ;;  %v6783_v58 = vpop.permute.xlu0 %4445  ;;  %v9932_v15 = vunpack.i.h.bf16 %v6777_v36 }
 0x26c   : > { %v9497_v0 = vunpack.i.h.bf16 %v6783_v58  ;;  %v9502_v33 = vunpack.i.l.bf16 %v6783_v58 }
 0x26d   : > { %v6796_v32 = vsel %vm1041_vm3, %v9496_v62, %v9499_v25 }
 0x26e   : > { %v6804_v23 = vsel %vm1090_vm4, %v9502_v33, %v9497_v0  ;;  %v6843_v0 = vsel %vm1090_vm4, %v9504_v57, %v9503_v53 }
 0x273   : > { %4610 = vrot.lane.b32.xlu1 %v6732_v28, %s9908_s5  ;;  %4645 = vrot.lane.b32.xlu2 %v4644_v45, %s9899_s25 }
 0x279   : > { %v6827_v50 = vpop.permute.xlu2 %4480 }
 0x27a   : > { %4520 = vrot.lane.b32.xlu0 %v6641_v60, %s9885_s8  ;;  %9916 = vst [vmem:[#allocation42_spill] sm:$0xff] %v6827_v50  ;;  %v9920_v38 = vunpack.i.h.bf16 %v6827_v50  ;;  %v9921_v1 = vunpack.i.l.bf16 %v6827_v50 }
 0x27b   : > { %4640 = vrot.lane.b32.xlu1 %v6771_v29, %s9884_s28  ;;  %4660 = vrot.lane.b32.xlu2 %v4644_v45, %s9902_s3 }
 0x27d   : > { %v6819_v2 = vpop.permute.xlu1 %4470  ;;  %v6821_v17 = vpop.permute.xlu0 %4460 }
 0x27e   : > { %v9500_v59 = vunpack.i.h.bf16 %v6821_v17  ;;  %v9501_v12 = vunpack.i.l.bf16 %v6821_v17  ;;  %v9510_v4 = vunpack.i.h.bf16 %v6819_v2  ;;  %v9509_v25 = vunpack.i.l.bf16 %v6819_v2 }
 0x280   : > { %v6835_v62 = vsel %vm1041_vm3, %v9501_v12, %v9500_v59  ;;  %v9511_v12 = vunpack.i.h.bf16 %v6727_v48 }
 0x282   : > { %4535 = vrot.lane.b32.xlu0 %v6641_v60, %s9899_s25 }
 0x283   : > { %4650 = vrot.lane.b32.xlu1 %v4644_v45, %s9908_s5  ;;  %4665 = vrot.lane.b32.xlu2 %v4644_v45, %s9905_s26 }
 0x285   : > { %v6851_v59 = vpop.permute.xlu1 %4475 }
 0x286   : > { %9917 = vst [vmem:[#allocation19_spill] sm:$0xff] %v6851_v59  ;;  %v9512_v33 = vunpack.i.l.bf16 %v6851_v59  ;;  %v9928_v19 = vunpack.i.h.bf16 %v6851_v59 }
 0x288   : > { %v6875_v53 = vsel %vm1188_vm6, %v9511_v12, %v9512_v33  ;;  %v6893_v12 = vpack.i.bf16 %v6704_v30, %v6667_v39 }
 0x28a   : > { %4540 = vrot.lane.b32.xlu0 %v6641_v60, %s9908_s5  ;;  %v6867_v60 = vsel %vm1139_vm5, %v9509_v25, %v9510_v4  ;;  %v4679_v4 = vpack.i.bf16 %v6621_v22, %v6635_v27 }
 0x28b   : > { %4655 = vrot.lane.b32.xlu1 %v6645_v55, %s9902_s3  ;;  %4670 = vrot.lane.b32.xlu2 %v6645_v55, %s9905_s26 }
 0x28d   : > { %v6859_v45 = vpop.permute.xlu2 %4505 }
 0x28e   : > { %v9514_v57 = vunpack.i.h.bf16 %v6859_v45  ;;  %v9513_v43 = vunpack.i.l.bf16 %v6859_v45 }
 0x290   : > { %v6887_v25 = vsel %vm1139_vm5, %v9513_v43, %v9514_v57  ;;  %v6920_v57 = vsel %vm1041_vm3, %v9921_v1, %v9920_v38 }
 0x291   : > { %9918 = vst [vmem:[#allocation16_spill] sm:$0xff] %v6887_v25  ;;  %v6902_v43 = vpop.permute.xlu1 %4485  ;;  %v7008_v25 = vpack.i.bf16 %v6621_v22, %v6591_v24  ;;  %v9939_v24 = vunpack.i.l.bf16 %v6706_v61 }
 0x292   : > { %4565 = vrot.lane.b32.xlu0 %v6674_v49, %s9884_s28  ;;  %v6906_v63 = vpop.permute.xlu0 %4490  ;;  %9922 = vst [vmem:[#allocation27_spill] sm:$0xff] %v6920_v57  ;;  %v9923_v14 = vunpack.i.h.bf16 %v6902_v43  ;;  %v9924_v56 = vunpack.i.l.bf16 %v6902_v43 }
 0x293   : > { %4680 = vrot.lane.b32.xlu1 %v4679_v4, %s9919_s0  ;;  %4685 = vrot.lane.b32.xlu2 %v6893_v12, %s9908_s5  ;;  %v9531_v41 = vunpack.i.h.bf16 %v6906_v63  ;;  %v4492_v33 = vunpack.i.l.bf16 %v6906_v63 }
 0x294   : > { %v6928_v49 = vsel %vm1090_vm4, %v9924_v56, %v9923_v14  ;;  %v4699_v56 = vpack.i.bf16 %v6698_v6, %v6670_v8 }
 0x295   : > { %v6908_v51 = vpop.permute.xlu2 %4515  ;;  %9925 = vst [vmem:[#allocation40_spill] sm:$0xff] %v6928_v49  ;;  %v6934_v4 = vsel %vm1139_vm5, %v4492_v33, %v9531_v41 }
 0x296   : > { %9926 = vst [vmem:[#allocation39_spill] sm:$0xff] %v6934_v4  ;;  %v9927_v7 = vunpack.i.l.bf16 %v6908_v51 }
 0x298   : > { %v6942_v1 = vsel %vm1188_vm6, %v9928_v19, %v9927_v7  ;;  %v9930_v7 = vunpack.i.l.bf16 %v6783_v58 }
 0x299   : > { %9929 = vst [vmem:[#allocation26_spill] sm:$0xff] %v6942_v1 }
 0x29a   : > { %4580 = vrot.lane.b32.xlu0 %v6688_v40, %s9902_s3  ;;  %v6968_v40 = vpack.i.bf16 %v6767_v26, %v6562_v9  ;;  %v4734_v9 = vpack.i.bf16 %v6763_v16, %v6667_v39 }
 0x29b   : > { %4695 = vrot.lane.b32.xlu1 %v6893_v12, %s9905_s26  ;;  %4700 = vrot.lane.b32.xlu2 %v4699_v56, %s9919_s0 }
 0x29d   : > { %v6955_v41 = vpop.permute.xlu2 %4525 }
 0x29e   : > { %v9534_v19 = vunpack.i.h.bf16 %v6955_v41 }
 0x2a0   : > { %v6964_v38 = vsel %vm1090_vm4, %v9534_v19, %v9930_v7 }
 0x2a2   : > { %4595 = vrot.lane.b32.xlu0 %v6710_v47, %s9886_s29 }
 0x2a3   : > { %4710 = vrot.lane.b32.xlu1 %v6968_v40, %s9908_s5  ;;  %4715 = vrot.lane.b32.xlu2 %v6968_v40, %s9902_s3 }
 0x2a5   : > { %v6976_v56 = vpop.permute.xlu1 %4495  ;;  %v4556_v14 = vpop.permute.xlu2 %4555 }
 0x2a6   : > { %v9548_v21 = vunpack.i.h.bf16 %v6976_v56  ;;  %v9547_v7 = vunpack.i.l.bf16 %v6976_v56  ;;  %v6980_v19 = vpop.permute.xlu0 %4500  ;;  %v4558_v10 = vunpack.i.h.bf16 %v4556_v14  ;;  %v4557_v35 = vunpack.i.l.bf16 %v4556_v14 }
 0x2a7   : > { %v4502_v47 = vunpack.i.l.bf16 %v6980_v19  ;;  %v9934_v14 = vunpack.i.l.bf16 %v6821_v17 }
 0x2a8   : > { %v6990_v11 = vsel %vm1041_vm3, %v9547_v7, %v9548_v21  ;;  %v6996_v6 = vsel %vm1041_vm3, %v9932_v15, %v4557_v35  ;;  %v9936_v7 = vunpack.i.h.bf16 %v6980_v19  ;;  %v9938_v15 = vunpack.i.h.bf16 %v6859_v45 }
 0x2a9   : > { %9931 = vst [vmem:[#allocation24_spill] sm:$0xff] %v6990_v11  ;;  %v7002_v46 = vsel %vm1041_vm3, %v4558_v10, %v9934_v14  ;;  %v9556_v14 = vunpack.i.h.bf16 %v6908_v51 }
 0x2aa   : > { %9933 = vst [vmem:[#allocation21_spill] sm:$0xff] %v6996_v6  ;;  %v7014_v21 = vsel %vm1090_vm4, %v4502_v47, %v9936_v7  ;;  %4605 = vrot.lane.b32.xlu0 %v6732_v28, %s9899_s25  ;;  %v9557_v7 = vunpack.i.l.bf16 %v6717_v34 }
 0x2ab   : > { %9935 = vst [vmem:[#allocation20_spill] sm:$0xff] %v7002_v46  ;;  %4735 = vrot.lane.b32.xlu1 %v4734_v9, %s9919_s0  ;;  %4725 = vrot.lane.b32.xlu2 %v7008_v25, %s9899_s25 }
 0x2ac   : > { %9937 = vst [vmem:[#allocation45_spill] sm:$0xff] %v7014_v21  ;;  %v7045_v11 = vsel %vm1188_vm6, %v9556_v14, %v9557_v7 }
 0x2ad   : > { %v7024_v22 = vpop.permute.xlu1 %4530  ;;  %v7026_v16 = vpop.permute.xlu2 %4575 }
 0x2ae   : > { %v9558_v39 = vunpack.i.l.bf16 %v7024_v22  ;;  %v9940_v21 = vunpack.i.h.bf16 %v7024_v22 }
 0x2b0   : > { %v7037_v9 = vsel %vm1139_vm5, %v9938_v15, %v9558_v39  ;;  %v7053_v8 = vsel %vm1139_vm5, %v9940_v21, %v9939_v24  ;;  %v9942_v21 = vunpack.i.h.bf16 %v6819_v2 }
 0x2b2   : > { %4620 = vrot.lane.b32.xlu0 %v6732_v28, %s9905_s26 }
 0x2b3   : > { %4740 = vrot.lane.b32.xlu1 %v7008_v25, %s9902_s3  ;;  %4745 = vrot.lane.b32.xlu2 %v7008_v25, %s9905_s26 }
 0x2b5   : > { %v7063_v14 = vpop.permute.xlu1 %4545  ;;  %v7065_v7 = vpop.permute.xlu2 %4600 }
 0x2b6   : > { %9941 = vst [vmem:[#allocation46_spill] sm:$0xff] %v7065_v7  ;;  %v9566_v39 = vunpack.i.h.bf16 %v7065_v7  ;;  %v9563_v24 = vunpack.i.l.bf16 %v7065_v7 }
 0x2b8   : > { %v7075_v28 = vsel %vm1139_vm5, %v9942_v21, %v9563_v24  ;;  %v7081_v15 = vsel %vm1139_vm5, %v9566_v39, %v4492_v33  ;;  %v7097_v39 = vsel %vm1041_vm3, %v4557_v35, %v4558_v10  ;;  %v9952_v35 = vunpack.i.h.bf16 %v6902_v43 }
 0x2b9   : > { %9943 = vst [vmem:[#allocation47_spill] sm:$0xff] %v7075_v28 }
 0x2ba   : > { %9944 = vst [vmem:[#allocation48_spill] sm:$0xff] %v7081_v15  ;;  %4625 = vrot.lane.b32.xlu0 %v6645_v55, %s9908_s5  ;;  %v9947_v55 = vunpack.i.h.bf16 %v6783_v58 }
 0x2bb   : > { %9946 = vst [vmem:[#allocation50_spill] sm:$0xff] %v7097_v39 }
 0x2bd   : > { %v7085_v37 = vpop.permute.xlu1 %4550  ;;  %v7087_v57 = vpop.permute.xlu2 %4615 }
 0x2c2   : > { %4630 = vrot.lane.b32.xlu0 %v6771_v29, %s9885_s8 }
 0x2c5   : > { %v4561_v49 = vpop.permute.xlu1 %4560  ;;  %v7091_v4 = vpop.permute.xlu2 %4635 }
 0x2c6   : > { %9945 = vst [vmem:[#allocation49_spill] sm:$0xff] %v7091_v4  ;;  %v4563_v21 = vunpack.i.h.bf16 %v4561_v49  ;;  %v4562_v24 = vunpack.i.l.bf16 %v4561_v49  ;;  %v9567_v33 = vunpack.i.l.bf16 %v7091_v4  ;;  %v9950_v49 = vunpack.i.l.bf16 %v6813_v3 }
 0x2c8   : > { %v7103_v15 = vsel %vm1090_vm4, %v9947_v55, %v4562_v24  ;;  %v7107_v29 = vsel %vm1090_vm4, %v4562_v24, %v4563_v21  ;;  %v7113_v7 = vsel %vm1090_vm4, %v4563_v21, %v9950_v49  ;;  %v7121_v10 = vsel %vm1090_vm4, %v9952_v35, %v9567_v33  ;;  %v7137_v35 = vpop.permute.xlu0 %4510 }
 0x2c9   : > { %9948 = vst [vmem:[#allocation51_spill] sm:$0xff] %v7103_v15  ;;  %v9954_v21 = vunpack.i.h.bf16 %v7091_v4  ;;  %v4512_v24 = vunpack.i.l.bf16 %v7137_v35  ;;  %v9594_v18 = vunpack.i.h.bf16 %v7137_v35 }
 0x2ca   : > { %9949 = vst [vmem:[#allocation52_spill] sm:$0xff] %v7107_v29  ;;  %4675 = vrot.lane.b32.xlu0 %v6893_v12, %s9899_s25 }
 0x2cb   : > { %9951 = vst [vmem:[#allocation53_spill] sm:$0xff] %v7113_v7  ;;  %v7135_v49 = vsel %vm1090_vm4, %v9954_v21, %v4502_v47 }
 0x2cc   : > { %9953 = vst [vmem:[#allocation54_spill] sm:$0xff] %v7121_v10 }
 0x2cd   : > { %9955 = vst [vmem:[#allocation55_spill] sm:$0xff] %v7135_v49  ;;  %v7139_v33 = vpop.permute.xlu1 %4570  ;;  %v7141_v58 = vpop.permute.xlu2 %4645  ;;  %v4749_v49 = vpack.i.bf16 %v6767_v26, %v6704_v30 }
 0x2ce   : > { %9956 = vst [vmem:[#allocation56_spill] sm:$0xff] %v7137_v35  ;;  %v9576_v39 = vunpack.i.h.bf16 %v7139_v33  ;;  %v4572_v55 = vunpack.i.l.bf16 %v7139_v33 }
 0x2cf   : > { %9957 = vst [vmem:[#allocation57_spill] sm:$0xff] %v7139_v33 }
 0x2d0   : > { %v2195_v46 = vsel %vm1384_vm7, %v4512_v24, %v4572_v55  ;;  %v2194_v47 = vsel %vm1384_vm7, %v4572_v55, %v9576_v39 }
 0x2d1   : > { %v2265_v21 = vpack.c.bf16 %v2195_v46, %v2195_v46  ;;  %v2266_v7 = vpack.c.bf16 %v2194_v47, %v2194_v47 }
 0x2d2   : > { %4690 = vrot.lane.b32.xlu0 %v6893_v12, %s9902_s3 }
 0x2d3   : > { %v2296_v29 = vsel %vm1492_vm8, %v2265_v21, 0  ;;  %v2299_v6 = vsel %vm1492_vm8, %v2266_v7, 0  ;;  %v9958_v7 = vunpack.i.h.bf16 %v6821_v17 }
 0x2d4   : > { %2366 = vmatpush.bf16.msrb.mxu1 %v2296_v29  ;;  %2379 = vmatpush.bf16.msra.mxu2 %v2299_v6  ;;  %v9959_v29 = vunpack.i.l.bf16 %v6827_v50 }
 0x2d5   : > { %v7156_v15 = vpop.permute.xlu1 %4585  ;;  %v7158_v1 = vpop.permute.xlu2 %4660 }
 0x2d9   : > { %v7186_v21 = vpop.xlane.xlu0 %958 }
 0x2da   : > { %4705 = vrot.lane.b32.xlu0 %v6968_v40, %s9899_s25 }
 0x2dd   : > { %v7162_v33 = vpop.permute.xlu1 %4590  ;;  %v7164_v46 = vpop.permute.xlu2 %4665 }
 0x2de   : > { %v9579_v55 = vunpack.i.h.bf16 %v7162_v33  ;;  %v9577_v12 = vunpack.i.l.bf16 %v7162_v33 }
 0x2e0   : > { %v7174_v6 = vsel %vm1041_vm3, %v9958_v7, %v9577_v12  ;;  %v7182_v47 = vsel %vm1041_vm3, %v9579_v55, %v9959_v29  ;;  %v9588_v7 = vunpack.i.l.bf16 %v6955_v41 }
 0x2e2   : > { %4720 = vrot.lane.b32.xlu0 %v6968_v40, %s9905_s26 }
 0x2e5   : > { %v7188_v39 = vpop.permute.xlu1 %4610  ;;  %v7190_v17 = vpop.permute.xlu2 %4670 }
 0x2ea   : > { %4730 = vrot.lane.b32.xlu0 %v7008_v25, %s9908_s5  ;;  %v9962_v25 = vunpack.i.h.bf16 %v6955_v41 }
 0x2ec   : > { %v7195_v12 = vpop.permute.xlu0 %4520  ;;  %v7215_v4 = vsel %vm1090_vm4, %v9588_v7, %v9962_v25  ;;  %v9966_v25 = vunpack.i.h.bf16 %v6906_v63 }
 0x2ed   : > { %v4523_v42 = vunpack.i.h.bf16 %v7195_v12  ;;  %v4522_v29 = vunpack.i.l.bf16 %v7195_v12  ;;  %v7199_v55 = vpop.permute.xlu1 %4640  ;;  %v7201_v40 = vpop.permute.xlu2 %4685  ;;  %v9963_v12 = vunpack.i.l.bf16 %v6777_v36 }
 0x2ee   : > { %9960 = vst [vmem:[#allocation58_spill] sm:$0xff] %v7199_v55  ;;  %v9965_v27 = vunpack.i.l.bf16 %v7199_v55 }
 0x2ef   : > { %9961 = vst [vmem:[#allocation59_spill] sm:$0xff] %v7201_v40  ;;  %v7207_v50 = vsel %vm1041_vm3, %v4522_v29, %v4523_v42  ;;  %v7221_v40 = vsel %vm1041_vm3, %v4523_v42, %v9963_v12  ;;  %v9968_v42 = vunpack.i.l.bf16 %v6859_v45  ;;  %v9969_v12 = vunpack.i.h.bf16 %v7199_v55 }
 0x2f0   : > { %9964 = vst [vmem:[#allocation60_spill] sm:$0xff] %v7221_v40  ;;  %v7235_v36 = vsel %vm1139_vm5, %v9966_v25, %v9965_v27 }
 0x2f1   : > { %9967 = vst [vmem:[#allocation61_spill] sm:$0xff] %v7235_v36  ;;  %v7243_v7 = vsel %vm1139_vm5, %v9969_v12, %v9968_v42  ;;  %v9971_v12 = vunpack.i.l.bf16 %v6851_v59  ;;  %v9999_v36 = vunpack.i.h.bf16 %v7085_v37 }
 0x2f2   : > { %9970 = vst [vmem:[#allocation62_spill] sm:$0xff] %v7243_v7  ;;  %4750 = vrot.lane.b32.xlu0 %v4749_v49, %s9919_s0 }
 0x2f4   : > { %v4536_v10 = vpop.permute.xlu0 %4535 }
 0x2f5   : > { %v4538_v26 = vunpack.i.h.bf16 %v4536_v10  ;;  %v4537_v30 = vunpack.i.l.bf16 %v4536_v10  ;;  %v7247_v63 = vpop.permute.xlu1 %4650  ;;  %v7249_v40 = vpop.permute.xlu2 %4700 }
 0x2f6   : > { %v9595_v27 = vunpack.i.h.bf16 %v7249_v40  ;;  %v9607_v59 = vunpack.i.l.bf16 %v7249_v40 }
 0x2f7   : > { %v2197_v45 = vsel %vm1384_vm7, %v4537_v30, %v4538_v26  ;;  %v2196_v25 = vsel %vm1384_vm7, %v4538_v26, %v4512_v24  ;;  %v7260_v49 = vsel %vm1384_vm7, %v9594_v18, %v4537_v30  ;;  %v9608_v30 = vunpack.i.h.bf16 %v7063_v14 }
 0x2f8   : > { %v2263_v42 = vpack.c.bf16 %v2197_v45, %v2197_v45  ;;  %v2264_v10 = vpack.c.bf16 %v2196_v25, %v2196_v25  ;;  %v7268_v7 = vsel %vm1188_vm6, %v9971_v12, %v9595_v27  ;;  %v9602_v45 = vunpack.i.l.bf16 %v7063_v14 }
 0x2f9   : > { %9972 = vst [vmem:[#allocation63_spill] sm:$0xff] %v7268_v7  ;;  %v9605_v18 = vunpack.i.h.bf16 %v7085_v37  ;;  %v9603_v12 = vunpack.i.l.bf16 %v7085_v37 }
 0x2fa   : > { %v2290_v55 = vsel %vm1492_vm8, %v2263_v42, 0  ;;  %v2293_v26 = vsel %vm1492_vm8, %v2264_v10, 0 }
 0x2fb   : > { %2340 = vmatpush.bf16.msrb.mxu3 %v2290_v55  ;;  %2353 = vmatpush.bf16.msra.mxu0 %v2293_v26  ;;  %v2149_v26 = vsel %vm1335_vm10, %v9602_v45, %v9608_v30  ;;  %v2053_v35 = vsel %vm1237_vm11, %v9603_v12, %v9605_v18  ;;  %v9975_v12 = vunpack.i.l.bf16 %v6819_v2  ;;  %v9978_v18 = vunpack.i.l.bf16 %v6717_v34 }
 0x2fc   : > { %v7276_v25 = vpop.permute.xlu0 %4540  ;;  %v9979_v2 = vunpack.i.h.bf16 %v6717_v34  ;;  %v9981_v34 = vpack.c.bf16 %v7045_v11, %v7037_v9  ;;  %v9612_v30 = vunpack.i.l.bf16 %v7156_v15  ;;  %v960_v11 = vsub.f32 %v6758_v52, %v7186_v21  ;;  %v7401_v21 = vld [vmem:[%s9388_s12] sm:$0xf] }
 0x2fd   : > { %v9600_v27 = vunpack.i.h.bf16 %v7276_v25  ;;  %v9599_v42 = vunpack.i.l.bf16 %v7276_v25  ;;  %v7282_v10 = vpop.permute.xlu1 %4655 }
 0x2ff   : > { %v2101_v55 = vsel %vm1286_vm9, %v9599_v42, %v9600_v27  ;;  %v2231_v42 = vpack.c.bf16 %v2053_v35, %v6536_v54  ;;  %v9974_v54 = vunpack.i.l.bf16 %v6727_v48 }
 0x300   : > { %v2247_v24 = vpack.c.bf16 %v2149_v26, %v2101_v55  ;;  %v9973_v26 = vunpack.i.h.bf16 %v6706_v61  ;;  %v9976_v61 = vunpack.i.h.bf16 %v7024_v22 }
 0x301   : > { %v7325_v35 = vsel %vm1188_vm6, %v9974_v54, %v9607_v59  ;;  %v9982_v59 = vunpack.i.l.bf16 %v6955_v41 }
 0x302   : > { %2341 = vmatpush.bf16.msrb.mxu3 %v2247_v24 }
 0x304   : > { %v7303_v28 = vpop.permute.xlu0 %4565 }
 0x305   : > { %v9606_v27 = vunpack.i.h.bf16 %v7303_v28  ;;  %v9604_v7 = vunpack.i.l.bf16 %v7303_v28  ;;  %v7308_v45 = vpop.permute.xlu1 %4680 }
 0x306   : > { %v4682_v55 = vunpack.i.l.bf16 %v7308_v45  ;;  %2342 = vmatpush.bf16.msrb.mxu3 %v2231_v42 }
 0x307   : > { %v7317_v24 = vsel %vm1139_vm5, %v9973_v26, %v9604_v7  ;;  %v7333_v42 = vsel %vm1139_vm5, %v9606_v27, %v9975_v12  ;;  %v9977_v26 = vunpack.i.l.bf16 %v7024_v22  ;;  %v9980_v22 = vunpack.i.h.bf16 %v6976_v56 }
 0x308   : > { %v7347_v54 = vsel %vm1188_vm6, %v9978_v18, %v4682_v55  ;;  %v7353_v12 = vsel %vm1188_vm6, %v4682_v55, %v9979_v2  ;;  %v9610_v55 = vunpack.i.h.bf16 %v7026_v16  ;;  %v9614_v2 = vunpack.i.l.bf16 %v7026_v16 }
 0x309   : > { %v7341_v7 = vsel %vm1139_vm5, %v9977_v26, %v9976_v61  ;;  %v1862_v61 = vsel %vm1041_vm3, %v9980_v22, %v4522_v29  ;;  %v9983_v27 = vunpack.i.h.bf16 %v6980_v19  ;;  %v9611_v22 = vunpack.i.h.bf16 %v7156_v15 }
 0x30a   : > { %2343 = vmatpush.bf16.msrb.mxu3 %v9981_v34 }
 0x30b   : > { %v1910_v29 = vsel %vm1090_vm4, %v9983_v27, %v9982_v59  ;;  %v2098_v59 = vsel %vm1286_vm9, %v9614_v2, %v9610_v55  ;;  %v961_v27 = vmul.f32 1.442695, %v960_v11  ;;  %v9984_v11 = vunpack.i.h.bf16 %v6813_v3 }
 0x30c   : > { %v7377_v26 = vpop.permute.xlu0 %4580  ;;  %v2199_v18 = vpack.c.bf16 %v1910_v29, %v1862_v61  ;;  %v2050_v61 = vsel %vm1237_vm11, %v9612_v30, %v9611_v22  ;;  %v9987_v3 = vunpack.i.l.bf16 %v7162_v33  ;;  %v9621_v30 = vunpack.i.l.bf16 %v7087_v57 }
 0x30d   : > { %v9609_v9 = vunpack.i.h.bf16 %v7377_v26  ;;  %v9613_v34 = vunpack.i.l.bf16 %v7377_v26  ;;  %v7384_v41 = vpop.permute.xlu1 %4695  ;;  %v2234_v29 = vpack.c.bf16 %v2050_v61, %v6551_v5  ;;  %5079 = vpow2.f32 %v961_v27 }
 0x30e   : > { %2344 = vmatpush.bf16.msrb.mxu3 %v2199_v18  ;;  %v9986_v61 = vunpack.i.h.bf16 %v7162_v33  ;;  %v9991_v2 = vunpack.i.h.bf16 %v6727_v48 }
 0x30f   : > { %v2146_v52 = vsel %vm1335_vm10, %v9613_v34, %v9609_v9 }
 0x310   : > { %v2250_v19 = vpack.c.bf16 %v2146_v52, %v2098_v59 }
 0x311   : > { %4004 = vmatmul.msk.bf16.vlgmr.msrb.gmra.mxu3 %vm1488_vm12, %v7401_v21 }
 0x312   : > { %2380 = vmatpush.bf16.msra.mxu2 %v2250_v19  ;;  %v9985_v19 = vunpack.i.l.bf16 %v6902_v43  ;;  %v9626_v43 = vunpack.i.l.bf16 %v7188_v39 }
 0x314   : > { %v4596_v18 = vpop.permute.xlu0 %4595 }
 0x315   : > { %v4598_v59 = vunpack.i.h.bf16 %v4596_v18  ;;  %v4597_v52 = vunpack.i.l.bf16 %v4596_v18  ;;  %v7412_v9 = vpop.permute.xlu1 %4710  ;;  %v7438_v18 = vsel %vm1041_vm3, %v9987_v3, %v9986_v61  ;;  %v9619_v3 = vunpack.i.h.bf16 %v7188_v39 }
 0x316   : > { %2381 = vmatpush.bf16.msra.mxu2 %v2234_v29 }
 0x317   : > { %v7418_v55 = vsel %vm1090_vm4, %v9984_v11, %v4597_v52  ;;  %v7422_v22 = vsel %vm1090_vm4, %v4597_v52, %v4598_v59  ;;  %v7428_v5 = vsel %vm1090_vm4, %v4598_v59, %v9985_v19  ;;  %v9988_v59 = vpack.c.bf16 %v6755_v20, %v6747_v44  ;;  %v7447_v52 = vpop.eup %5079 }
 0x318   : > { %9989 = vst [vmem:[#allocation64_spill] sm:$0xff] %v7447_v52  ;;  %v9990_v20 = vpack.c.bf16 %v6804_v23, %v6796_v32  ;;  %v9992_v23 = vunpack.i.l.bf16 %v6908_v51 }
 0x31a   : > { %2382 = vmatpush.bf16.msra.mxu2 %v9988_v59  ;;  %v9620_v59 = vunpack.i.h.bf16 %v7087_v57 }
 0x31c   : > { %963 = vadd.xlane.f32.xlu0 %v7447_v52  ;;  %v7450_v11 = vpop.permute.xlu0 %4605  ;;  %v9997_v52 = vunpack.i.l.bf16 %v7026_v16 }
 0x31d   : > { %v9617_v33 = vunpack.i.h.bf16 %v7450_v11  ;;  %v9618_v19 = vunpack.i.l.bf16 %v7450_v11  ;;  %v7454_v61 = vpop.permute.xlu1 %4735 }
 0x31e   : > { %v9616_v29 = vunpack.i.h.bf16 %v7454_v61  ;;  %v9615_v44 = vunpack.i.l.bf16 %v7454_v61  ;;  %2383 = vmatpush.bf16.msra.mxu2 %v9990_v20 }
 0x31f   : > { %v2190_v27 = vsel %vm1384_vm7, %v9618_v19, %v9617_v33  ;;  %v9624_v33 = vunpack.i.h.bf16 %v7141_v58  ;;  %v9625_v19 = vunpack.i.l.bf16 %v7141_v58 }
 0x320   : > { %v2270_v34 = vpack.c.bf16 %v2190_v27, %v2190_v27  ;;  %v7477_v32 = vsel %vm1188_vm6, %v9615_v44, %v9991_v2  ;;  %v7485_v20 = vsel %vm1188_vm6, %v9992_v23, %v9616_v29  ;;  %v2094_v44 = vsel %vm1286_vm9, %v9626_v43, %v9619_v3 }
 0x321   : > { %9993 = vst [vmem:[#allocation65_spill] sm:$0xff] %v7485_v20  ;;  %4007 = vmatmul.msk.bf16.vlgmr.msra.gmra.mxu2 %vm1488_vm12, %v7401_v21  ;;  %v2142_v29 = vsel %vm1335_vm10, %v9621_v30, %v9620_v59  ;;  %v4657_v59 = vunpack.i.l.bf16 %v7282_v10  ;;  %v10000_v20 = vunpack.i.l.bf16 %v7156_v15 }
 0x322   : > { %v2311_v2 = vsel %vm1492_vm8, %v2270_v34, 0  ;;  %v2254_v48 = vpack.c.bf16 %v2142_v29, %v2094_v44  ;;  %v2186_v29 = vsel %vm1384_vm7, %v9625_v19, %v9624_v33  ;;  %v9996_v19 = vunpack.i.h.bf16 %v7063_v14 }
 0x323   : > { %2431 = vmatpush.bf16.msrb.mxu2 %v2311_v2 }
 0x324   : > { %v7500_v23 = vpop.permute.xlu0 %4620  ;;  %v2148_v43 = vsel %vm1335_vm10, %v9996_v19, %v4657_v59 }
 0x325   : > { %v9622_v27 = vunpack.i.h.bf16 %v7500_v23  ;;  %v9623_v34 = vunpack.i.l.bf16 %v7500_v23 }
 0x327   : > { %2432 = vmatpush.bf16.msrb.mxu2 %v2254_v48  ;;  %v2046_v2 = vsel %vm1237_vm11, %v9623_v34, %v9622_v27  ;;  %v4672_v48 = vunpack.i.l.bf16 %v7190_v17  ;;  %v9995_v34 = vunpack.i.h.bf16 %v7276_v25  ;;  %v4663_v27 = vunpack.i.h.bf16 %v7158_v1 }
 0x328   : > { %v2238_v3 = vpack.c.bf16 %v2046_v2, %v6580_v13  ;;  %v2274_v2 = vpack.c.bf16 %v2186_v29, %v2186_v29  ;;  %v9998_v29 = vunpack.i.l.bf16 %v7377_v26 }
 0x329   : > { %v2052_v19 = vsel %vm1237_vm11, %v9999_v36, %v4672_v48  ;;  %v10003_v36 = vunpack.i.l.bf16 %v7247_v63 }
 0x32b   : > { %2433 = vmatpush.bf16.msrb.mxu2 %v2238_v3  ;;  %v9994_v3 = vpack.c.bf16 %v6875_v53, %v6867_v60  ;;  %v2147_v53 = vsel %vm1335_vm10, %v4657_v59, %v9998_v29  ;;  %v2323_v59 = vsel %vm1492_vm8, %v2274_v2, 0  ;;  %v10006_v2 = vld [vmem:[#allocation49_spill] sm:$0xff] }
 0x32c   : > { %v7526_v44 = vpop.permute.xlu0 %4625 }
 0x32d   : > { %v4627_v30 = vunpack.i.l.bf16 %v7526_v44 }
 0x32f   : > { %2434 = vmatpush.bf16.msrb.mxu2 %v9994_v3  ;;  %v2100_v33 = vsel %vm1286_vm9, %v9995_v34, %v4627_v30  ;;  %v2099_v13 = vsel %vm1286_vm9, %v4627_v30, %v9997_v52  ;;  %v4662_v34 = vunpack.i.l.bf16 %v7158_v1  ;;  %v2051_v30 = vsel %vm1237_vm11, %v4672_v48, %v10000_v20  ;;  %v10004_v48 = vld [vmem:[#allocation36_spill] sm:$0xff] }
 0x330   : > { %v2248_v60 = vpack.c.bf16 %v2148_v43, %v2100_v33  ;;  %v2249_v3 = vpack.c.bf16 %v2147_v53, %v2099_v13  ;;  %v10001_v33 = vpack.c.bf16 %v6843_v0, %v6835_v62  ;;  %v10002_v13 = vunpack.i.h.bf16 %v7247_v63 }
 0x331   : > { %v2232_v53 = vpack.c.bf16 %v2052_v19, %v10004_v48  ;;  %v2138_v62 = vsel %vm1335_vm10, %v4662_v34, %v4663_v27 }
 0x332   : > { %2354 = vmatpush.bf16.msra.mxu0 %v2248_v60  ;;  %2367 = vmatpush.bf16.msrb.mxu1 %v2249_v3  ;;  %v2090_v29 = vsel %vm1286_vm9, %v10003_v36, %v10002_v13  ;;  %v10005_v60 = vld [vmem:[#allocation41_spill] sm:$0xff]  ;;  %v10010_v13 = vunpack.i.l.bf16 %v7164_v46 }
 0x333   : > { %2435 = vmatpush.bf16.msrb.mxu2 %v10001_v33  ;;  %v2233_v3 = vpack.c.bf16 %v2051_v30, %v10005_v60  ;;  %v2258_v0 = vpack.c.bf16 %v2138_v62, %v2090_v29  ;;  %v10007_v33 = vunpack.i.h.bf16 %v10006_v2  ;;  %v10009_v30 = vunpack.i.h.bf16 %v7164_v46  ;;  %v10014_v62 = vld [vmem:[#allocation54_spill] sm:$0xff] }
 0x334   : > { %v4631_v20 = vpop.permute.xlu0 %4630  ;;  %v10013_v60 = vunpack.i.l.bf16 %v6976_v56  ;;  %v10017_v56 = vpack.c.bf16 %v7353_v12, %v7053_v8  ;;  %v4628_v12 = vunpack.i.h.bf16 %v7526_v44 }
 0x335   : > { %v4633_v43 = vunpack.i.h.bf16 %v4631_v20  ;;  %v4632_v52 = vunpack.i.l.bf16 %v4631_v20  ;;  %v2042_v36 = vsel %vm1237_vm11, %v10010_v13, %v10009_v30  ;;  %v10011_v20 = vld [vmem:[#allocation42_spill] sm:$0xff] }
 0x336   : > { %2355 = vmatpush.bf16.msra.mxu0 %v2232_v53  ;;  %2368 = vmatpush.bf16.msrb.mxu1 %v2233_v3  ;;  %v10012_v29 = vunpack.i.h.bf16 %v10011_v20 }
 0x337   : > { %2483 = vmatpush.bf16.msra.mxu2 %v2323_v59  ;;  %v10008_v59 = vunpack.i.l.bf16 %v10006_v2  ;;  %v7605_v53 = vsel %vm1041_vm3, %v4632_v52, %v4633_v43  ;;  %v7611_v3 = vsel %vm1041_vm3, %v4633_v43, %v10013_v60  ;;  %v10018_v43 = vld [vmem:[#allocation23_spill] sm:$0xff]  ;;  %v10020_v60 = vld [vmem:[#allocation60_spill] sm:$0xff]  ;;  %v10039_v2 = vunpack.i.h.bf16 %v6908_v51 }
 0x338   : > { %4011 = vmatmul.msk.bf16.vlgmr.msrb.gmra.mxu2 %vm1488_vm12, %v7401_v21  ;;  %v7601_v48 = vsel %vm1041_vm3, %v10012_v29, %v4632_v52  ;;  %v10016_v52 = vpack.c.bf16 %v7347_v54, %v7341_v7  ;;  %v2242_v13 = vpack.c.bf16 %v2042_v36, %v10018_v43  ;;  %v10019_v29 = vpack.c.bf16 %v7215_v4, %v7207_v50  ;;  %v10022_v7 = vld [vmem:[#allocation57_spill] sm:$0xff]  ;;  %v10024_v36 = vld [vmem:[#allocation26_spill] sm:$0xff] }
 0x339   : > { %v7587_v19 = vsel %vm1090_vm4, %v10008_v59, %v10007_v33  ;;  %v10015_v59 = vld [vmem:[#allocation55_spill] sm:$0xff]  ;;  %v10021_v30 = vpack.c.bf16 %v6964_v38, %v10020_v60  ;;  %v10023_v54 = vunpack.i.h.bf16 %v10022_v7  ;;  %v2278_v50 = vpack.c.bf16 %v7260_v49, %v7260_v49  ;;  %v2280_v4 = vld [vmem:[%s9389_s13] sm:$0xff]  ;;  %v10028_v7 = vld [vmem:[#allocation40_spill] sm:$0xff] }
 0x33a   : > { %2356 = vmatpush.bf16.msra.mxu0 %v10016_v52  ;;  %2369 = vmatpush.bf16.msrb.mxu1 %v10017_v56  ;;  %v10025_v52 = vld [vmem:[#allocation39_spill] sm:$0xff]  ;;  %v4658_v38 = vunpack.i.h.bf16 %v7282_v10  ;;  %v4673_v49 = vunpack.i.h.bf16 %v7190_v17  ;;  %v10035_v33 = vunpack.i.l.bf16 %v7085_v37  ;;  %v10038_v37 = vld [vmem:[#allocation30_spill] sm:$0xff] }
 0x33b   : > { %2484 = vmatpush.bf16.msra.mxu2 %v2258_v0  ;;  %v10026_v56 = vpack.c.bf16 %v10024_v36, %v10025_v52  ;;  %2283 = vperm.xlu1 %4754, %v2280_v4   ;;  %v2335_v36 = vsel %vm1492_vm8, %v2278_v50, 0  ;;  %v10031_v52 = vunpack.i.l.bf16 %v7276_v25  ;;  %v10033_v25 = vunpack.i.h.bf16 %v7026_v16 }
 0x33c   : > { %v7626_v0 = vpop.permute.xlu0 %4675  ;;  %v2054_v16 = vsel %vm1237_vm11, %v4673_v49, %v10035_v33 }
 0x33d   : > { %v4677_v20 = vunpack.i.l.bf16 %v7626_v0 }
 0x33e   : > { %2357 = vmatpush.bf16.msra.mxu0 %v10019_v29  ;;  %2370 = vmatpush.bf16.msrb.mxu1 %v10021_v30 }
 0x33f   : > { %2485 = vmatpush.bf16.msra.mxu2 %v2242_v13  ;;  %v2193_v8 = vsel %vm1384_vm7, %v10023_v54, %v4677_v20  ;;  %v10027_v13 = vld [vmem:[#allocation59_spill] sm:$0xff] }
 0x340   : > { %v2267_v43 = vpack.c.bf16 %v2193_v8, %v2193_v8  ;;  %v4687_v29 = vunpack.i.l.bf16 %v10027_v13  ;;  %v10029_v54 = vld [vmem:[#allocation27_spill] sm:$0xff] }
 0x341   : > { %4006 = vmatmul.msk.bf16.vlgmr.msrb.gmra.mxu1 %vm1488_vm12, %v7401_v21  ;;  %4005 = vmatmul.msk.bf16.vlgmr.msra.gmra.mxu0 %vm1488_vm12, %v7401_v21  ;;  %v10030_v8 = vpack.c.bf16 %v10028_v7, %v10029_v54 }
 0x342   : > { %v2302_v30 = vsel %vm1492_vm8, %v2267_v43, 0  ;;  %v4697_v43 = vunpack.i.l.bf16 %v7384_v41  ;;  %v2097_v54 = vsel %vm1286_vm9, %v10033_v25, %v4687_v29  ;;  %v7698_v25 = vpop.permute.xlu2 %4715 }
 0x343   : > { %2486 = vmatpush.bf16.msra.mxu2 %v10026_v56  ;;  %2392 = vmatpush.bf16.msra.mxu3 %v2302_v30  ;;  %v2102_v56 = vsel %vm1286_vm9, %v4628_v12, %v10031_v52  ;;  %v10032_v30 = vunpack.i.l.bf16 %v7063_v14  ;;  %v9630_v14 = vunpack.i.h.bf16 %v7308_v45 }
 0x344   : > { %v7656_v60 = vpop.permute.xlu0 %4690 }
 0x345   : > { %v4692_v4 = vunpack.i.l.bf16 %v7656_v60  ;;  %v2150_v7 = vsel %vm1335_vm10, %v4658_v38, %v10032_v30  ;;  %v10037_v30 = vld [vmem:[#allocation14_spill] sm:$0xff] }
 0x346   : > { %v2262_v50 = vpack.c.bf16 %v2150_v7, %v2102_v56  ;;  %v10036_v56 = vunpack.i.h.bf16 %v7156_v15  ;;  %v2246_v7 = vpack.c.bf16 %v2054_v16, %v10037_v30  ;;  %v1991_v15 = vsel %vm1188_vm6, %v9630_v14, %v10039_v2  ;;  %v10050_v14 = vld [vmem:[#allocation21_spill] sm:$0xff] }
 0x347   : > { %2487 = vmatpush.bf16.msra.mxu2 %v10030_v8  ;;  %v10034_v8 = vunpack.i.h.bf16 %v7377_v26 }
 0x348   : > { %v2049_v26 = vsel %vm1237_vm11, %v10036_v56, %v4697_v43  ;;  %v10041_v56 = vunpack.i.l.bf16 %v7450_v11 }
 0x349   : > { %v2145_v52 = vsel %vm1335_vm10, %v10034_v8, %v4692_v4 }
 0x34a   : > { %4015 = vmatmul.msk.bf16.vlgmr.msra.gmra.mxu2 %vm1488_vm12, %v7401_v21 }
 0x34b   : > { %2535 = vmatpush.bf16.msrb.mxu2 %v2335_v36  ;;  %v2251_v36 = vpack.c.bf16 %v2145_v52, %v2097_v54  ;;  %v4678_v54 = vunpack.i.h.bf16 %v7626_v0  ;;  %v2235_v52 = vpack.c.bf16 %v2049_v26, %v10038_v37  ;;  %v4717_v26 = vunpack.i.l.bf16 %v7698_v25 }
 0x34c   : > { %v7701_v8 = vpop.permute.xlu0 %4705  ;;  %v10042_v37 = vunpack.i.h.bf16 %v7450_v11 }
 0x34d   : > { %2393 = vmatpush.bf16.msra.mxu3 %v2251_v36  ;;  %v4707_v33 = vunpack.i.l.bf16 %v7701_v8  ;;  %v10040_v36 = vld [vmem:[#allocation16_spill] sm:$0xff] }
 0x34e   : > { %v2230_v16 = vpack.c.bf16 %v1991_v15, %v10040_v36  ;;  %v10044_v36 = vunpack.i.l.bf16 %v7188_v39 }
 0x34f   : > { %2536 = vmatpush.bf16.msrb.mxu2 %v2262_v50  ;;  %v4712_v50 = vunpack.i.l.bf16 %v7412_v9  ;;  %v2192_v0 = vsel %vm1384_vm7, %v4677_v20, %v4707_v33  ;;  %v2191_v51 = vsel %vm1384_vm7, %v4707_v33, %v10041_v56  ;;  %v2144_v33 = vsel %vm1335_vm10, %v4692_v4, %v4717_v26 }
 0x350   : > { %v2268_v30 = vpack.c.bf16 %v2192_v0, %v2192_v0  ;;  %v2269_v2 = vpack.c.bf16 %v2191_v51, %v2191_v51  ;;  %v4693_v0 = vunpack.i.h.bf16 %v7656_v60  ;;  %v4688_v51 = vunpack.i.h.bf16 %v10027_v13 }
 0x351   : > { %2394 = vmatpush.bf16.msra.mxu3 %v2235_v52  ;;  %v10043_v52 = vpack.c.bf16 %v7325_v35, %v7317_v24  ;;  %v2095_v11 = vsel %vm1286_vm9, %v4712_v50, %v10044_v36  ;;  %v2096_v24 = vsel %vm1286_vm9, %v4687_v29, %v4712_v50  ;;  %v10045_v35 = vunpack.i.l.bf16 %v7087_v57  ;;  %v10049_v36 = vld [vmem:[#allocation51_spill] sm:$0xff] }
 0x352   : > { %v2305_v20 = vsel %vm1492_vm8, %v2268_v30, 0  ;;  %v2308_v15 = vsel %vm1492_vm8, %v2269_v2, 0  ;;  %v10046_v2 = vld [vmem:[#allocation45_spill] sm:$0xff]  ;;  %v10051_v29 = vpack.c.bf16 %v10049_v36, %v10050_v14 }
 0x353   : > { %2537 = vmatpush.bf16.msrb.mxu2 %v2246_v7  ;;  %v2189_v7 = vsel %vm1384_vm7, %v10042_v37, %v4678_v54  ;;  %2405 = vmatpush.bf16.msrb.mxu0 %v2305_v20  ;;  %v2143_v4 = vsel %vm1335_vm10, %v4717_v26, %v10045_v35  ;;  %v10047_v37 = vld [vmem:[#allocation24_spill] sm:$0xff]  ;;  %v2252_v20 = vpack.c.bf16 %v2144_v33, %v2096_v24  ;;  %v10052_v26 = vunpack.i.l.bf16 %v7500_v23 }
 0x354   : > { %2418 = vmatpush.bf16.msra.mxu1 %v2308_v15  ;;  %v7736_v56 = vpop.permute.xlu0 %4720  ;;  %v7749_v15 = vpop.permute.xlu2 %4725  ;;  %v10053_v33 = vunpack.i.h.bf16 %v7087_v57  ;;  %v10056_v57 = vunpack.i.h.bf16 %v7188_v39 }
 0x355   : > { %2395 = vmatpush.bf16.msra.mxu3 %v10043_v52  ;;  %v4722_v30 = vunpack.i.l.bf16 %v7736_v56  ;;  %v10048_v52 = vpack.c.bf16 %v10046_v2, %v10047_v37  ;;  %v4698_v2 = vunpack.i.h.bf16 %v7384_v41  ;;  %v10059_v41 = vunpack.i.h.bf16 %v7500_v23 }
 0x356   : > { %v2141_v14 = vsel %vm1335_vm10, %v10053_v33, %v4693_v0  ;;  %v10062_v23 = vunpack.i.l.bf16 %v7141_v58 }
 0x357   : > { %2538 = vmatpush.bf16.msrb.mxu2 %v2230_v16  ;;  %v2271_v16 = vpack.c.bf16 %v2189_v7, %v2189_v7  ;;  %v2253_v7 = vpack.c.bf16 %v2143_v4, %v2095_v11  ;;  %2406 = vmatpush.bf16.msrb.mxu0 %v2252_v20  ;;  %v2048_v13 = vsel %vm1237_vm11, %v4697_v43, %v4722_v30  ;;  %v10054_v11 = vld [vmem:[#allocation38_spill] sm:$0xff]  ;;  %v10055_v4 = vld [vmem:[#allocation28_spill] sm:$0xff]  ;;  %v4727_v43 = vunpack.i.l.bf16 %v7749_v15 }
 0x358   : > { %v2047_v35 = vsel %vm1237_vm11, %v4722_v30, %v10052_v26  ;;  %v2236_v24 = vpack.c.bf16 %v2048_v13, %v10054_v11  ;;  %v2093_v30 = vsel %vm1286_vm9, %v10056_v57, %v4688_v51  ;;  %v10058_v20 = vunpack.i.l.bf16 %v7249_v40  ;;  %v10063_v11 = vld [vmem:[#allocation29_spill] sm:$0xff] }
 0x359   : > { %2396 = vmatpush.bf16.msra.mxu3 %v10051_v29  ;;  %2419 = vmatpush.bf16.msra.mxu1 %v2253_v7  ;;  %v2314_v50 = vsel %vm1492_vm8, %v2271_v16, 0  ;;  %v2237_v16 = vpack.c.bf16 %v2047_v35, %v10055_v4  ;;  %v2255_v37 = vpack.c.bf16 %v2141_v14, %v2093_v30  ;;  %v2045_v36 = vsel %vm1237_vm11, %v10059_v41, %v4698_v2  ;;  %v7805_v4 = vpop.permute.xlu1 %4740 }
 0x35a   : > { %v10060_v29 = vunpack.i.h.bf16 %v7303_v28  ;;  %v2188_v26 = vsel %vm1384_vm7, %v4678_v54, %v4727_v43  ;;  %v4708_v35 = vunpack.i.h.bf16 %v7701_v8  ;;  %v2187_v14 = vsel %vm1384_vm7, %v4727_v43, %v10062_v23 }
 0x35b   : > { %2539 = vmatpush.bf16.msrb.mxu2 %v10048_v52  ;;  %v10057_v52 = vunpack.i.l.bf16 %v7454_v61  ;;  %2407 = vmatpush.bf16.msrb.mxu0 %v2236_v24  ;;  %v2239_v24 = vpack.c.bf16 %v2045_v36, %v10063_v11  ;;  %v2272_v54 = vpack.c.bf16 %v2188_v26, %v2188_v26  ;;  %v2273_v8 = vpack.c.bf16 %v2187_v14, %v2187_v14  ;;  %v10073_v26 = vld [vmem:[#allocation47_spill] sm:$0xff] }
 0x35c   : > { %4008 = vmatmul.msk.bf16.vlgmr.msra.gmra.mxu3 %vm1488_vm12, %v7401_v21  ;;  %v7789_v39 = vpop.permute.xlu0 %4730  ;;  %v7811_v57 = vpop.permute.xlu2 %4745  ;;  %v10065_v30 = vunpack.i.h.bf16 %v7141_v58  ;;  %v10075_v11 = vunpack.i.l.bf16 %v7247_v63 }
 0x35d   : > { %2444 = vmatpush.bf16.msrb.mxu3 %v2314_v50  ;;  %v2001_v7 = vsel %vm1188_vm6, %v10058_v20, %v10057_v52  ;;  %2420 = vmatpush.bf16.msra.mxu1 %v2237_v16  ;;  %v10061_v50 = vunpack.i.l.bf16 %v7303_v28  ;;  %v4732_v28 = vunpack.i.l.bf16 %v7789_v39  ;;  %v10064_v16 = vpack.c.bf16 %v7477_v32, %v7333_v42  ;;  %v10066_v20 = vld [vmem:[#allocation52_spill] sm:$0xff]  ;;  %v10069_v42 = vld [vmem:[#allocation53_spill] sm:$0xff] }
 0x35e   : > { %4019 = vmatmul.msk.bf16.vlgmr.msrb.gmra.mxu2 %vm1488_vm12, %v7401_v21  ;;  %v2185_v43 = vsel %vm1384_vm7, %v10065_v30, %v4708_v35  ;;  %v4747_v52 = vunpack.i.l.bf16 %v7811_v57  ;;  %v10070_v32 = vld [vmem:[#allocation20_spill] sm:$0xff]  ;;  %v2320_v14 = vsel %vm1492_vm8, %v2273_v8, 0 }
 0x35f   : > { %v1953_v13 = vsel %vm1139_vm5, %v10061_v50, %v10060_v29  ;;  %v10071_v36 = vpack.c.bf16 %v10069_v42, %v10070_v32  ;;  %v2317_v29 = vsel %vm1492_vm8, %v2272_v54, 0  ;;  %v2092_v58 = vsel %vm1286_vm9, %v4688_v51, %v4732_v28 }
 0x360   : > { %v2220_v33 = vpack.c.bf16 %v2001_v7, %v1953_v13  ;;  %v10067_v7 = vld [vmem:[#allocation50_spill] sm:$0xff]  ;;  %v4713_v50 = vunpack.i.h.bf16 %v7412_v9  ;;  %v10072_v13 = vld [vmem:[#allocation63_spill] sm:$0xff]  ;;  %v4718_v51 = vunpack.i.h.bf16 %v7698_v25  ;;  %v2044_v60 = vsel %vm1237_vm11, %v4698_v2, %v4747_v52 }
 0x361   : > { %2445 = vmatpush.bf16.msrb.mxu3 %v2255_v37  ;;  %2421 = vmatpush.bf16.msra.mxu1 %v10064_v16  ;;  %v4742_v37 = vunpack.i.l.bf16 %v7805_v4  ;;  %v10068_v41 = vpack.c.bf16 %v10066_v20, %v10067_v7  ;;  %v2275_v16 = vpack.c.bf16 %v2185_v43, %v2185_v43  ;;  %v10077_v43 = vld [vmem:[#allocation19_spill] sm:$0xff]  ;;  %v10079_v42 = vpack.c.bf16 %v7418_v55, %v7174_v6 }
 0x362   : > { %2408 = vmatpush.bf16.msrb.mxu0 %v2220_v33  ;;  %v10074_v33 = vpack.c.bf16 %v10072_v13, %v10073_v26  ;;  %v10078_v20 = vunpack.i.h.bf16 %v10077_v43  ;;  %v10080_v2 = vunpack.i.h.bf16 %v7247_v63  ;;  %v2137_v6 = vsel %vm1335_vm10, %v4663_v27, %v4718_v51  ;;  %v10083_v63 = vld [vmem:[#allocation25_spill] sm:$0xff]  ;;  %v10086_v27 = vld [vmem:[#allocation46_spill] sm:$0xff] }
 0x363   : > { %v2140_v9 = vsel %vm1335_vm10, %v4693_v0, %v4742_v37  ;;  %v10076_v0 = vunpack.i.l.bf16 %v7164_v46  ;;  %v10084_v13 = vunpack.i.h.bf16 %v7249_v40  ;;  %v10085_v26 = vunpack.i.h.bf16 %v7164_v46 }
 0x364   : > { %v7832_v23 = vpop.permute.xlu0 %4750  ;;  %v2256_v8 = vpack.c.bf16 %v2140_v9, %v2092_v58  ;;  %v10091_v9 = vld [vmem:[#allocation10_spill] sm:$0xff] }
 0x365   : > { %2446 = vmatpush.bf16.msrb.mxu3 %v2239_v24  ;;  %2422 = vmatpush.bf16.msra.mxu1 %v10071_v36  ;;  %v2091_v24 = vsel %vm1286_vm9, %v4732_v28, %v10075_v11  ;;  %v4752_v54 = vunpack.i.l.bf16 %v7832_v23  ;;  %v2139_v28 = vsel %vm1335_vm10, %v4742_v37, %v4662_v34  ;;  %v2043_v25 = vsel %vm1237_vm11, %v4747_v52, %v10076_v0  ;;  %v10081_v52 = vld [vmem:[#allocation48_spill] sm:$0xff] }
 0x366   : > { %2409 = vmatpush.bf16.msrb.mxu0 %v10068_v41  ;;  %v2257_v30 = vpack.c.bf16 %v2139_v28, %v2091_v24  ;;  %v4723_v41 = vunpack.i.h.bf16 %v7736_v56  ;;  %v2326_v34 = vsel %vm1492_vm8, %v2275_v16, 0  ;;  %v2089_v37 = vsel %vm1286_vm9, %v10080_v2, %v4713_v50  ;;  %v10089_v24 = vld [vmem:[#allocation56_spill] sm:$0xff] }
 0x367   : > { %v1996_v7 = vsel %vm1188_vm6, %v4752_v54, %v10078_v20  ;;  %v4728_v36 = vunpack.i.h.bf16 %v7749_v15  ;;  %v2241_v55 = vpack.c.bf16 %v2043_v25, %v10083_v63  ;;  %v2259_v58 = vpack.c.bf16 %v2137_v6, %v2089_v37 }
 0x368   : > { %4010 = vmatmul.msk.bf16.vlgmr.msra.gmra.mxu1 %vm1488_vm12, %v7401_v21  ;;  %v2225_v32 = vpack.c.bf16 %v1996_v7, %v10081_v52  ;;  %v1997_v15 = vsel %vm1188_vm6, %v10084_v13, %v4752_v54  ;;  %v2041_v1 = vsel %vm1237_vm11, %v10085_v26, %v4723_v41  ;;  %v10090_v40 = vunpack.i.h.bf16 %v10089_v24  ;;  %v10094_v7 = vld [vmem:[#allocation65_spill] sm:$0xff]  ;;  %v10108_v26 = vld [vmem:[#allocation64_spill] sm:$0xff] }
 0x369   : > { %2447 = vmatpush.bf16.msrb.mxu3 %v10074_v33  ;;  %2470 = vmatpush.bf16.msrb.mxu1 %v2320_v14  ;;  %v10087_v33 = vunpack.i.h.bf16 %v10086_v27  ;;  %v10088_v14 = vunpack.i.l.bf16 %v10086_v27  ;;  %v2184_v46 = vsel %vm1384_vm7, %v4708_v35, %v4728_v36  ;;  %v4743_v0 = vunpack.i.h.bf16 %v7805_v4 }
 0x36a   : > { %2457 = vmatpush.bf16.msra.mxu0 %v2317_v29  ;;  %v10082_v29 = vld [vmem:[#allocation13_spill] sm:$0xff]  ;;  %v2183_v16 = vsel %vm1384_vm7, %v4728_v36, %v10090_v40  ;;  %v10092_v25 = vpack.c.bf16 %v7422_v22, %v7438_v18  ;;  %v4748_v20 = vunpack.i.h.bf16 %v7811_v57  ;;  %v10093_v35 = vpack.c.bf16 %v7428_v5, %v7182_v47 }
 0x36b   : > { %4009 = vmatmul.msk.bf16.vlgmr.msrb.gmra.mxu0 %vm1488_vm12, %v7401_v21  ;;  %v2240_v56 = vpack.c.bf16 %v2044_v60, %v10082_v29  ;;  %v1949_v11 = vsel %vm1139_vm5, %v10088_v14, %v10087_v33  ;;  %v2277_v28 = vpack.c.bf16 %v2183_v16, %v2183_v16  ;;  %v2276_v60 = vpack.c.bf16 %v2184_v46, %v2184_v46  ;;  %v10105_v29 = vld [vmem:[#allocation62_spill] sm:$0xff]  ;;  %v10109_v46 = vld [vmem:[#allocation35_spill] sm:$0xff] }
 0x36c   : > { %v2224_v54 = vpack.c.bf16 %v1997_v15, %v1949_v11  ;;  %v2136_v47 = vsel %vm1335_vm10, %v4718_v51, %v4743_v0  ;;  %v2135_v5 = vsel %vm1335_vm10, %v4743_v0, %v4658_v38  ;;  %v10097_v57 = vpack.c.bf16 %v10014_v62, %v7601_v48  ;;  %v10098_v38 = vld [vmem:[#allocation12_spill] sm:$0xff] }
 0x36d   : > { %2448 = vmatpush.bf16.msrb.mxu3 %v10079_v42  ;;  %2471 = vmatpush.bf16.msrb.mxu1 %v2257_v30  ;;  %v4733_v30 = vunpack.i.h.bf16 %v7789_v39  ;;  %v2332_v43 = vsel %vm1492_vm8, %v2277_v28, 0  ;;  %v10095_v42 = vld [vmem:[#allocation61_spill] sm:$0xff]  ;;  %v2039_v10 = vsel %vm1237_vm11, %v4748_v20, %v4673_v49  ;;  %v10100_v48 = vunpack.i.h.bf16 %v7454_v61  ;;  %v10102_v49 = vld [vmem:[#allocation58_spill] sm:$0xff] }
 0x36e   : > { %2458 = vmatpush.bf16.msra.mxu0 %v2256_v8  ;;  %v2243_v8 = vpack.c.bf16 %v2041_v1, %v10091_v9  ;;  %v10096_v39 = vpack.c.bf16 %v10094_v7, %v10095_v42  ;;  %v10103_v37 = vunpack.i.h.bf16 %v10102_v49  ;;  %v10104_v52 = vunpack.i.l.bf16 %v10102_v49 }
 0x36f   : > { %v2088_v4 = vsel %vm1286_vm9, %v4713_v50, %v4733_v30  ;;  %v2087_v22 = vsel %vm1286_vm9, %v4733_v30, %v4628_v12  ;;  %v4753_v12 = vunpack.i.h.bf16 %v7832_v23  ;;  %v2040_v50 = vsel %vm1237_vm11, %v4723_v41, %v4748_v20  ;;  %v10099_v23 = vld [vmem:[#allocation9_spill] sm:$0xff] }
 0x370   : > { %4012 = vmatmul.msk.bf16.vlgmr.msrb.gmra.mxu3 %vm1488_vm12, %v7401_v21  ;;  %v2260_v18 = vpack.c.bf16 %v2136_v47, %v2088_v4  ;;  %v2261_v44 = vpack.c.bf16 %v2135_v5, %v2087_v22  ;;  %v2244_v51 = vpack.c.bf16 %v2040_v50, %v10098_v38  ;;  %v2245_v2 = vpack.c.bf16 %v2039_v10, %v10099_v23  ;;  %v10112_v4 = vld [vmem:[#allocation8_spill] sm:$0xff] }
 0x371   : > { %2496 = vmatpush.bf16.msra.mxu3 %v2326_v34  ;;  %2472 = vmatpush.bf16.msrb.mxu1 %v2241_v55  ;;  %v2329_v34 = vsel %vm1492_vm8, %v2276_v60, 0  ;;  %v1993_v62 = vsel %vm1188_vm6, %v10100_v48, %v4753_v12  ;;  %v10101_v41 = vunpack.i.h.bf16 %v7308_v45  ;;  %v10106_v45 = vpack.c.bf16 %v7587_v19, %v7605_v53 }
 0x372   : > { %2459 = vmatpush.bf16.msra.mxu0 %v2240_v56  ;;  %v10107_v56 = vpack.c.bf16 %v10015_v59, %v7611_v3 }
 0x373   : > { %v1992_v17 = vsel %vm1188_vm6, %v4753_v12, %v10101_v41 }
 0x374   : > { %v2229_v61 = vpack.c.bf16 %v1992_v17, %v10105_v29 }
 0x375   : > { %2497 = vmatpush.bf16.msra.mxu3 %v2259_v58  ;;  %2473 = vmatpush.bf16.msrb.mxu1 %v2225_v32  ;;  %v1945_v32 = vsel %vm1139_vm5, %v10104_v52, %v10103_v37  ;;  %v10115_v52 = vld [vmem:[#allocation11_spill] sm:$0xff] }
 0x376   : > { %2460 = vmatpush.bf16.msra.mxu0 %v2224_v54  ;;  %v2228_v36 = vpack.c.bf16 %v1993_v62, %v1945_v32 }
 0x379   : > { %2498 = vmatpush.bf16.msra.mxu3 %v2243_v8  ;;  %2474 = vmatpush.bf16.msrb.mxu1 %v10093_v35 }
 0x37a   : > { %2461 = vmatpush.bf16.msra.mxu0 %v10092_v25 }
 0x37c   : > { %4014 = vmatmul.msk.bf16.vlgmr.msrb.gmra.mxu1 %vm1488_vm12, %v7401_v21 }
 0x37d   : > { %2499 = vmatpush.bf16.msra.mxu3 %v10096_v39  ;;  %2522 = vmatpush.bf16.msra.mxu1 %v2332_v43  ;;  %v10110_v43 = vld [vmem:[#allocation32_spill] sm:$0xff]  ;;  %v10111_v39 = vld [vmem:[#allocation6_spill] sm:$0xff] }
 0x37e   : > { %2509 = vmatpush.bf16.msrb.mxu0 %v2329_v34 }
 0x37f   : > { %4013 = vmatmul.msk.bf16.vlgmr.msra.gmra.mxu0 %vm1488_vm12, %v7401_v21 }
 0x381   : > { %2500 = vmatpush.bf16.msra.mxu3 %v10097_v57  ;;  %2523 = vmatpush.bf16.msra.mxu1 %v2261_v44  ;;  %v10113_v57 = vld [vmem:[#allocation34_spill] sm:$0xff] }
 0x382   : > { %2510 = vmatpush.bf16.msrb.mxu0 %v2260_v18 }
 0x384   : > { %4016 = vmatmul.msk.bf16.vlgmr.msra.gmra.mxu3 %vm1488_vm12, %v7401_v21 }
 0x385   : > { %2524 = vmatpush.bf16.msra.mxu1 %v2245_v2 }
 0x386   : > { %2511 = vmatpush.bf16.msrb.mxu0 %v2244_v51  ;;  %v10114_v51 = vld [vmem:[#allocation22_spill] sm:$0xff] }
 0x389   : > { %2525 = vmatpush.bf16.msra.mxu1 %v2229_v61 }
 0x38a   : > { %2512 = vmatpush.bf16.msrb.mxu0 %v2228_v36  ;;  %v10116_v36 = vld [vmem:[#allocation43_spill] sm:$0xff] }
 0x38d   : > { %2526 = vmatpush.bf16.msra.mxu1 %v10107_v56 }
 0x38e   : > { %2513 = vmatpush.bf16.msrb.mxu0 %v10106_v45 }
 0x38f   : > { %v964_v6 = vpop.xlane.xlu0 %963 }
 0x390   : > { %4018 = vmatmul.msk.bf16.vlgmr.msra.gmra.mxu1 %vm1488_vm12, %v7401_v21  ;;  %5081 = vrcp.f32 %v964_v6  ;;  %v976_v13 = vand.u32 2147483648, %v964_v6  ;;  %v974_v19 = vand.u32 2147483647, %v964_v6  ;;  %vm970_vm14 = vweird.f32 %v964_v6 }
 0x391   : > { %4017 = vmatmul.msk.bf16.vlgmr.msrb.gmra.mxu0 %vm1488_vm12, %v7401_v21 }
 0x392   : > { %v977_v3 = vor.u32 1.1754944e-38, %v976_v13  ;;  %vm975_vm0 = vcmp.eq.f32.partialorder %v974_v19, 8.507059e+37 }
 0x394   : > { %v2346_v27 = vpop.f32.mrf.mxu3 }
 0x396   : > { %v5082_v63 = vpop.eup %5081 }
 0x397   : > { %v966_v55 = vmul.f32 %v5082_v63, %v964_v6  ;;  %vm971_vm13 = vweird.f32 %v5082_v63 }
 0x398   : > { %vm972_vm15 = vmor %vm970_vm14, %vm971_vm13 }
 0x399   : > { %v967_v58 = vsub.f32 1.0, %v966_v55 }
 0x39b   : > { %v968_v15 = vmul.f32 %v5082_v63, %v967_v58 }
 0x39c   : > { %v2348_v14 = vpop.f32.mrf.mxu3 }
 0x39d   : > { %v969_v53 = vadd.f32 %v5082_v63, %v968_v15  ;;  %v10117_v15 = vld [vmem:[#allocation31_spill] sm:$0xff] }
 0x39f   : > { %v973_v59 = vsel %vm972_vm15, %v5082_v63, %v969_v53  ;;  %v10118_v53 = vld [vmem:[#allocation37_spill] sm:$0xff] }
 0x3a0   : > { %v978_v21 = vsel %vm975_vm0, %v977_v3, %v973_v59 }
 0x3a1   : > { %v979_v1 = vmul.f32 %v10108_v26, %v978_v21 }
 0x3a3   : > { %980 = vst [vmem:[%s719_s7] sm:$0xff] %v979_v1 }
 0x3a4   : > { %v2385_v33 = vpop.f32.mrf.mxu2 }
 0x3ac   : > { %v2387_v11 = vpop.f32.mrf.mxu2 }
 0x3ad   : > { %v7977_v24 = vpop.permute.xlu1 %2283  ;;  %v10119_v11 = vld [vmem:[#allocation33_spill] sm:$0xff] }
 0x3ae   : > { %v2386_v40 = vadd.f32 %v2385_v33, %v7977_v24  ;;  %v2347_v18 = vadd.f32 %v2346_v27, %v7977_v24 }
 0x3b0   : > { %v2548_v16 = vmax.f32 %v2386_v40, 0.0  ;;  %v2545_v44 = vmax.f32 %v2347_v18, 0.0 }
 0x3b2   : > { %v7982_v9 = vmul.f32 %v2548_v16, %v10109_v46  ;;  %v8011_v50 = vmul.f32 %v2545_v44, %v10113_v57 }
 0x3b4   : > { %3342 = vst [vmem:[%s7987_s1 + $0x18] sm:$0xff] %v7982_v9 }
 0x3b5   : > { %3339 = vst [vmem:[%s7987_s1] sm:$0xff] %v8011_v50 }
 0x3bb   : > { %v2437_v54 = vpop.f32.mrf.mxu2 }
 0x3bc   : > { %v2438_v8 = vadd.f32 %v2437_v54, %v7977_v24 }
 0x3be   : > { %v2552_v28 = vmax.f32 %v2438_v8, 0.0  ;;  %v2372_v30 = vpop.f32.mrf.mxu1  ;;  %v2359_v60 = vpop.f32.mrf.mxu0 }
 0x3bf   : > { %v2360_v0 = vadd.f32 %v2359_v60, %v7977_v24  ;;  %v2373_v25 = vadd.f32 %v2372_v30, %v7977_v24 }
 0x3c0   : > { %v7995_v20 = vmul.f32 %v2552_v28, %v10110_v43 }
 0x3c1   : > { %v2546_v35 = vmax.f32 %v2360_v0, 0.0  ;;  %v2547_v7 = vmax.f32 %v2373_v25, 0.0  ;;  %v10120_v25 = vld [vmem:[#allocation44_spill] sm:$0xff] }
 0x3c2   : > { %3346 = vst [vmem:[%s7987_s1 + $0x38] sm:$0xff] %v7995_v20 }
 0x3c3   : > { %v2439_v42 = vpop.f32.mrf.mxu2  ;;  %v8000_v34 = vmul.f32 %v2546_v35, %v10111_v39  ;;  %v8003_v22 = vmul.f32 %v2547_v7, %v10112_v4  ;;  %v10121_v7 = vld [vmem:[#allocation18_spill] sm:$0xff] }
 0x3c5   : > { %3340 = vst [vmem:[%s7987_s1 + $0x8] sm:$0xff] %v8000_v34  ;;  %v4785_v14 = vpack.i.bf16 %v8000_v34, %v8011_v50 }
 0x3c6   : > { %v2374_v47 = vpop.f32.mrf.mxu1  ;;  %v2361_v5 = vpop.f32.mrf.mxu0  ;;  %3341 = vst [vmem:[%s7987_s1 + $0x10] sm:$0xff] %v8003_v22 }
 0x3c7   : > { %v4830_v47 = vpack.i.bf16 %v7982_v9, %v8003_v22 }
 0x3cd   : > { %v2489_v12 = vpop.f32.mrf.mxu2 }
 0x3ce   : > { %v2490_v10 = vadd.f32 %v2489_v12, %v7977_v24 }
 0x3d0   : > { %v2556_v38 = vmax.f32 %v2490_v10, 0.0 }
 0x3d2   : > { %v8017_v23 = vmul.f32 %v2556_v38, %v10114_v51 }
 0x3d4   : > { %3350 = vst [vmem:[%s7987_s1 + $0x58] sm:$0xff] %v8017_v23 }
 0x3d5   : > { %v2491_v2 = vpop.f32.mrf.mxu2 }
 0x3d6   : > { %v4835_v2 = vpack.i.bf16 %v7995_v20, %v8003_v22 }
 0x3df   : > { %v2398_v62 = vpop.f32.mrf.mxu3 }
 0x3e0   : > { %v2399_v17 = vadd.f32 %v2398_v62, %v7977_v24 }
 0x3e1   : > { %v2541_v48 = vpop.f32.mrf.mxu2 }
 0x3e2   : > { %v2542_v41 = vadd.f32 %v2541_v48, %v7977_v24  ;;  %v2549_v37 = vmax.f32 %v2399_v17, 0.0  ;;  %v10122_v48 = vld [vmem:[#allocation15_spill] sm:$0xff] }
 0x3e4   : > { %v2560_v49 = vmax.f32 %v2542_v41, 0.0  ;;  %v8027_v29 = vmul.f32 %v2549_v37, %v10116_v36 }
 0x3e5   : > { %v2424_v45 = vpop.f32.mrf.mxu1 }
 0x3e6   : > { %v8024_v32 = vmul.f32 %v2560_v49, %v10115_v52  ;;  %3343 = vst [vmem:[%s7987_s1 + $0x20] sm:$0xff] %v8027_v29  ;;  %v2425_v6 = vadd.f32 %v2424_v45, %v7977_v24  ;;  %v4805_v5 = vpack.i.bf16 %v8027_v29, %v7982_v9 }
 0x3e7   : > { %v2400_v63 = vpop.f32.mrf.mxu3 }
 0x3e8   : > { %3354 = vst [vmem:[%s7987_s1 + $0x78] sm:$0xff] %v8024_v32  ;;  %v2411_v61 = vpop.f32.mrf.mxu0  ;;  %v2551_v13 = vmax.f32 %v2425_v6, 0.0  ;;  %v10123_v6 = vld [vmem:[#allocation17_spill] sm:$0xff] }
 0x3e9   : > { %v2412_v56 = vadd.f32 %v2411_v61, %v7977_v24  ;;  %v2543_v55 = vpop.f32.mrf.mxu2 }
 0x3ea   : > { %v8039_v3 = vmul.f32 %v2551_v13, %v10118_v53  ;;  %v10124_v55 = vld [vmem:[#allocation7_spill] sm:$0xff] }
 0x3eb   : > { %v2550_v58 = vmax.f32 %v2412_v56, 0.0 }
 0x3ec   : > { %v4765_v59 = vpack.i.bf16 %v8039_v3, %v8000_v34  ;;  %3345 = vst [vmem:[%s7987_s1 + $0x30] sm:$0xff] %v8039_v3 }
 0x3ed   : > { %v8036_v19 = vmul.f32 %v2550_v58, %v10117_v15  ;;  %v2426_v21 = vpop.f32.mrf.mxu1 }
 0x3ee   : > { %4766 = vrot.lane.b32.xlu1 %v4765_v59, %s9885_s8  ;;  %4761 = vrot.lane.b32.xlu0 %v4765_v59, %s9919_s0  ;;  %v4880_v21 = vpack.i.bf16 %v8027_v29, %v7995_v20 }
 0x3ef   : > { %3344 = vst [vmem:[%s7987_s1 + $0x28] sm:$0xff] %v8036_v19  ;;  %4756 = vrot.lane.b32.xlu2 %v4765_v59, %s9884_s28 }
 0x3f0   : > { %v2413_v26 = vpop.f32.mrf.mxu0 }
 0x3f1   : > { %v4895_v26 = vpack.i.bf16 %v8017_v23, %v8039_v3 }
 0x3f3   : > { %v2450_v1 = vpop.f32.mrf.mxu3 }
 0x3f4   : > { %v2451_v27 = vadd.f32 %v2450_v1, %v7977_v24 }
 0x3f6   : > { %v2553_v33 = vmax.f32 %v2451_v27, 0.0  ;;  %4786 = vrot.lane.b32.xlu1 %v4785_v14, %s9902_s3  ;;  %4781 = vrot.lane.b32.xlu0 %v4785_v14, %s9908_s5  ;;  %v4925_v27 = vpack.i.bf16 %v8024_v32, %v8011_v50 }
 0x3f7   : > { %4771 = vrot.lane.b32.xlu2 %v4765_v59, %s9886_s29 }
 0x3f8   : > { %v8054_v40 = vmul.f32 %v2553_v33, %v10119_v11 }
 0x3f9   : > { %v2476_v8 = vpop.f32.mrf.mxu1 }
 0x3fa   : > { %3347 = vst [vmem:[%s7987_s1 + $0x40] sm:$0xff] %v8054_v40  ;;  %v2477_v28 = vadd.f32 %v2476_v8, %v7977_v24  ;;  %v4860_v59 = vpack.i.bf16 %v8036_v19, %v8054_v40 }
 0x3fb   : > { %v2452_v30 = vpop.f32.mrf.mxu3 }
 0x3fc   : > { %v2463_v16 = vpop.f32.mrf.mxu0  ;;  %v2555_v0 = vmax.f32 %v2477_v28, 0.0  ;;  %v4975_v30 = vpack.i.bf16 %v8054_v40, %v8017_v23 }
 0x3fd   : > { %v2464_v54 = vadd.f32 %v2463_v16, %v7977_v24 }
 0x3fe   : > { %v8067_v42 = vmul.f32 %v2555_v0, %v10121_v7  ;;  %4831 = vrot.lane.b32.xlu1 %v4830_v47, %s9886_s29  ;;  %4806 = vrot.lane.b32.xlu0 %v4805_v5, %s9902_s3 }
 0x3ff   : > { %v2554_v60 = vmax.f32 %v2464_v54, 0.0  ;;  %4776 = vrot.lane.b32.xlu2 %v4785_v14, %s9899_s25 }
 0x400   : > { %3349 = vst [vmem:[%s7987_s1 + $0x50] sm:$0xff] %v8067_v42 }
 0x401   : > { %v8064_v35 = vmul.f32 %v2554_v60, %v10120_v25  ;;  %v2478_v44 = vpop.f32.mrf.mxu1 }
 0x403   : > { %3348 = vst [vmem:[%s7987_s1 + $0x48] sm:$0xff] %v8064_v35 }
 0x404   : > { %v2465_v18 = vpop.f32.mrf.mxu0 }
 0x406   : > { %4836 = vrot.lane.b32.xlu1 %v4835_v2, %s9899_s25  ;;  %4821 = vrot.lane.b32.xlu0 %v4830_v47, %s9919_s0 }
 0x407   : > { %v2502_v12 = vpop.f32.mrf.mxu3  ;;  %4791 = vrot.lane.b32.xlu2 %v4785_v14, %s9905_s26  ;;  %v4945_v14 = vpack.i.bf16 %v8067_v42, %v8036_v19 }
 0x408   : > { %v2503_v10 = vadd.f32 %v2502_v12, %v7977_v24  ;;  %v4985_v12 = vpack.i.bf16 %v8024_v32, %v8067_v42 }
 0x40a   : > { %v2557_v38 = vmax.f32 %v2503_v10, 0.0 }
 0x40c   : > { %v8084_v62 = vmul.f32 %v2557_v38, %v10122_v48 }
 0x40d   : > { %v2528_v17 = vpop.f32.mrf.mxu1 }
 0x40e   : > { %3351 = vst [vmem:[%s7987_s1 + $0x60] sm:$0xff] %v8084_v62  ;;  %v2515_v41 = vpop.f32.mrf.mxu0  ;;  %v2529_v37 = vadd.f32 %v2528_v17, %v7977_v24  ;;  %4846 = vrot.lane.b32.xlu1 %v4835_v2, %s9902_s3  ;;  %4826 = vrot.lane.b32.xlu0 %v4830_v47, %s9885_s8  ;;  %v4915_v1 = vpack.i.bf16 %v8064_v35, %v8084_v62 }
 0x40f   : > { %v2516_v49 = vadd.f32 %v2515_v41, %v7977_v24  ;;  %v2504_v61 = vpop.f32.mrf.mxu3  ;;  %4796 = vrot.lane.b32.xlu2 %v4805_v5, %s9899_s25 }
 0x410   : > { %v2559_v56 = vmax.f32 %v2529_v37, 0.0 }
 0x411   : > { %v2558_v45 = vmax.f32 %v2516_v49, 0.0 }
 0x412   : > { %v8097_v58 = vmul.f32 %v2559_v56, %v10124_v55 }
 0x413   : > { %v8094_v63 = vmul.f32 %v2558_v45, %v10123_v6 }
 0x414   : > { %3353 = vst [vmem:[%s7987_s1 + $0x70] sm:$0xff] %v8097_v58  ;;  %v5000_v10 = vpack.i.bf16 %v8097_v58, %v8064_v35 }
 0x415   : > { %3352 = vst [vmem:[%s7987_s1 + $0x68] sm:$0xff] %v8094_v63  ;;  %v2530_v24 = vpop.f32.mrf.mxu1 }
 0x416   : > { %v2517_v13 = vpop.f32.mrf.mxu0  ;;  %4851 = vrot.lane.b32.xlu1 %v4835_v2, %s9905_s26  ;;  %4841 = vrot.lane.b32.xlu0 %v4835_v2, %s9908_s5 }
 0x417   : > { %4801 = vrot.lane.b32.xlu2 %v4805_v5, %s9908_s5 }
 0x41e   : > { %4861 = vrot.lane.b32.xlu1 %v4860_v59, %s9908_s5  ;;  %4871 = vrot.lane.b32.xlu0 %v4860_v59, %s9905_s26 }
 0x41f   : > { %4811 = vrot.lane.b32.xlu2 %v4805_v5, %s9905_s26 }
 0x426   : > { %4881 = vrot.lane.b32.xlu1 %v4880_v21, %s9919_s0  ;;  %4876 = vrot.lane.b32.xlu0 %v4880_v21, %s9884_s28 }
 0x427   : > { %4816 = vrot.lane.b32.xlu2 %v4830_v47, %s9884_s28 }
 0x42e   : > { %4886 = vrot.lane.b32.xlu1 %v4880_v21, %s9885_s8  ;;  %4896 = vrot.lane.b32.xlu0 %v4895_v26, %s9899_s25 }
 0x42f   : > { %4856 = vrot.lane.b32.xlu2 %v4860_v59, %s9899_s25 }
 0x436   : > { %4901 = vrot.lane.b32.xlu1 %v4895_v26, %s9908_s5  ;;  %4916 = vrot.lane.b32.xlu0 %v4915_v1, %s9899_s25 }
 0x437   : > { %4866 = vrot.lane.b32.xlu2 %v4860_v59, %s9902_s3 }
 0x43e   : > { %4926 = vrot.lane.b32.xlu1 %v4925_v27, %s9919_s0  ;;  %4921 = vrot.lane.b32.xlu0 %v4925_v27, %s9884_s28 }
 0x43f   : > { %4891 = vrot.lane.b32.xlu2 %v4880_v21, %s9886_s29 }
 0x446   : > { %4941 = vrot.lane.b32.xlu1 %v4925_v27, %s9886_s29  ;;  %4931 = vrot.lane.b32.xlu0 %v4925_v27, %s9885_s8 }
 0x447   : > { %4906 = vrot.lane.b32.xlu2 %v4895_v26, %s9902_s3 }
 0x449   : > { %v8137_v33 = vpop.permute.xlu2 %4756 }
 0x44e   : > { %4946 = vrot.lane.b32.xlu1 %v4945_v14, %s9919_s0  ;;  %4936 = vrot.lane.b32.xlu0 %v4945_v14, %s9884_s28 }
 0x44f   : > { %4911 = vrot.lane.b32.xlu2 %v4895_v26, %s9905_s26 }
 0x451   : > { %v8144_v16 = vpop.permute.xlu2 %4771 }
 0x456   : > { %4971 = vrot.lane.b32.xlu1 %v4915_v1, %s9905_s26  ;;  %4956 = vrot.lane.b32.xlu0 %v4915_v1, %s9902_s3 }
 0x457   : > { %4951 = vrot.lane.b32.xlu2 %v4915_v1, %s9908_s5 }
 0x459   : > { %v8149_v54 = vpop.permute.xlu2 %4776 }
 0x45a   : > { %v4779_v8 = vunpack.i.h.bf16 %v8149_v54  ;;  %v9634_v28 = vunpack.i.l.bf16 %v8149_v54 }
 0x45c   : > { %v2959_v60 = vsel %vm1384_vm7, %v9634_v28, %v4779_v8  ;;  %v5015_v28 = vpack.i.bf16 %v8097_v58, %v8094_v63 }
 0x45d   : > { %v3025_v0 = vpack.c.bf16 %v2959_v60, %v2959_v60 }
 0x45e   : > { %4976 = vrot.lane.b32.xlu1 %v4975_v30, %s9884_s28  ;;  %4966 = vrot.lane.b32.xlu0 %v4945_v14, %s9886_s29 }
 0x45f   : > { %4961 = vrot.lane.b32.xlu2 %v4945_v14, %s9885_s8  ;;  %v3052_v47 = vsel %vm1492_vm8, %v3025_v0, 0 }
 0x460   : > { %3102 = vmatpush.bf16.msrb.mxu3 %v3052_v47  ;;  %v8165_v5 = vpop.permute.xlu1 %4766  ;;  %v8167_v18 = vpop.permute.xlu0 %4761 }
 0x461   : > { %v8169_v44 = vpop.permute.xlu2 %4791 }
 0x462   : > { %v9643_v35 = vunpack.i.h.bf16 %v8169_v44  ;;  %v9631_v37 = vunpack.i.l.bf16 %v8169_v44 }
 0x464   : > { %v2815_v26 = vsel %vm1237_vm11, %v9631_v37, %v9643_v35 }
 0x466   : > { %4986 = vrot.lane.b32.xlu1 %v4985_v12, %s9899_s25  ;;  %5001 = vrot.lane.b32.xlu0 %v5000_v10, %s9884_s28 }
 0x467   : > { %4981 = vrot.lane.b32.xlu2 %v4975_v30, %s9919_s0 }
 0x468   : > { %v8178_v38 = vpop.permute.xlu1 %4786  ;;  %v8180_v2 = vpop.permute.xlu0 %4781 }
 0x469   : > { %v4789_v41 = vunpack.i.h.bf16 %v8178_v38  ;;  %v9633_v17 = vunpack.i.l.bf16 %v8178_v38  ;;  %v4784_v49 = vunpack.i.h.bf16 %v8180_v2  ;;  %v9632_v32 = vunpack.i.l.bf16 %v8180_v2  ;;  %v8186_v42 = vpop.permute.xlu2 %4796 }
 0x46a   : > { %v9635_v61 = vunpack.i.h.bf16 %v8186_v42  ;;  %v4798_v45 = vunpack.i.l.bf16 %v8186_v42 }
 0x46b   : > { %v2863_v56 = vsel %vm1286_vm9, %v9632_v32, %v4784_v49  ;;  %v2911_v24 = vsel %vm1335_vm10, %v9633_v17, %v4789_v41 }
 0x46c   : > { %v3009_v13 = vpack.c.bf16 %v2911_v24, %v2863_v56  ;;  %v2956_v59 = vsel %vm1384_vm7, %v4798_v45, %v9635_v61  ;;  %v2993_v56 = vpack.c.bf16 %v2815_v26, %v8011_v50 }
 0x46d   : > { %v3028_v21 = vpack.c.bf16 %v2956_v59, %v2956_v59 }
 0x46e   : > { %4991 = vrot.lane.b32.xlu1 %v4975_v30, %s9885_s8  ;;  %5021 = vrot.lane.b32.xlu0 %v4985_v12, %s9902_s3 }
 0x46f   : > { %4996 = vrot.lane.b32.xlu2 %v4975_v30, %s9886_s29  ;;  %3103 = vmatpush.bf16.msrb.mxu3 %v3009_v13  ;;  %v3061_v1 = vsel %vm1492_vm8, %v3028_v21, 0 }
 0x470   : > { %3141 = vmatpush.bf16.msra.mxu2 %v3061_v1  ;;  %v8218_v27 = vpop.permute.xlu1 %4831  ;;  %v8220_v14 = vpop.permute.xlu0 %4806 }
 0x471   : > { %v9637_v60 = vunpack.i.h.bf16 %v8220_v14  ;;  %v4808_v0 = vunpack.i.l.bf16 %v8220_v14  ;;  %v8224_v47 = vpop.permute.xlu2 %4801  ;;  %v10139_v6 = vunpack.i.h.bf16 %v8218_v27 }
 0x472   : > { %v9638_v24 = vunpack.i.h.bf16 %v8224_v47  ;;  %v4803_v30 = vunpack.i.l.bf16 %v8224_v47 }
 0x473   : > { %3104 = vmatpush.bf16.msrb.mxu3 %v2993_v56  ;;  %v2908_v13 = vsel %vm1335_vm10, %v4808_v0, %v9637_v60 }
 0x474   : > { %v2860_v59 = vsel %vm1286_vm9, %v4803_v30, %v9638_v24 }
 0x475   : > { %v3012_v50 = vpack.c.bf16 %v2908_v13, %v2860_v59 }
 0x476   : > { %5006 = vrot.lane.b32.xlu1 %v5000_v10, %s9919_s0  ;;  %5026 = vrot.lane.b32.xlu0 %v4985_v12, %s9905_s26 }
 0x477   : > { %5011 = vrot.lane.b32.xlu2 %v4985_v12, %s9908_s5  ;;  %3142 = vmatpush.bf16.msra.mxu2 %v3012_v50 }
 0x478   : > { %v8244_v21 = vpop.permute.xlu1 %4836  ;;  %v8246_v26 = vpop.permute.xlu0 %4821 }
 0x479   : > { %v4838_v1 = vunpack.i.l.bf16 %v8244_v21  ;;  %v8249_v56 = vpop.permute.xlu2 %4811  ;;  %v10125_v48 = vunpack.i.h.bf16 %v8244_v21 }
 0x47a   : > { %v9636_v37 = vunpack.i.h.bf16 %v8249_v56  ;;  %v9640_v32 = vunpack.i.l.bf16 %v8249_v56 }
 0x47b   : > { %v2958_v13 = vsel %vm1384_vm7, %v4779_v8, %v4838_v1  ;;  %v2957_v12 = vsel %vm1384_vm7, %v4838_v1, %v4798_v45  ;;  %v9641_v1 = vunpack.i.h.bf16 %v8246_v26 }
 0x47c   : > { %v2812_v59 = vsel %vm1237_vm11, %v9640_v32, %v9636_v37  ;;  %v3026_v50 = vpack.c.bf16 %v2958_v13, %v2958_v13  ;;  %v3027_v17 = vpack.c.bf16 %v2957_v12, %v2957_v12  ;;  %v9642_v13 = vunpack.i.l.bf16 %v8246_v26 }
 0x47d   : > { %v2996_v61 = vpack.c.bf16 %v2812_v59, %v7982_v9  ;;  %v9647_v37 = vunpack.i.l.bf16 %v8218_v27 }
 0x47e   : > { %5036 = vrot.lane.b32.xlu1 %v5000_v10, %s9886_s29  ;;  %5031 = vrot.lane.b32.xlu0 %v5000_v10, %s9885_s8  ;;  %v3055_v8 = vsel %vm1492_vm8, %v3026_v50, 0  ;;  %v3058_v45 = vsel %vm1492_vm8, %v3027_v17, 0  ;;  %v9646_v50 = vunpack.i.h.bf16 %v8218_v27 }
 0x47f   : > { %5016 = vrot.lane.b32.xlu2 %v5015_v28, %s9899_s25  ;;  %3143 = vmatpush.bf16.msra.mxu2 %v2996_v61 }
 0x480   : > { %3115 = vmatpush.bf16.msra.mxu0 %v3055_v8  ;;  %3128 = vmatpush.bf16.msrb.mxu1 %v3058_v45  ;;  %v8275_v58 = vpop.permute.xlu1 %4846  ;;  %v8277_v9 = vpop.permute.xlu0 %4826  ;;  %v2765_v45 = vsel %vm1188_vm6, %v9642_v13, %v9641_v1 }
 0x481   : > { %v8279_v12 = vpop.permute.xlu2 %4816  ;;  %v9644_v10 = vunpack.i.h.bf16 %v8277_v9  ;;  %v9645_v59 = vunpack.i.l.bf16 %v8277_v9  ;;  %v4848_v24 = vunpack.i.l.bf16 %v8275_v58 }
 0x482   : > { %v9639_v17 = vunpack.i.h.bf16 %v8279_v12  ;;  %v4818_v61 = vunpack.i.l.bf16 %v8279_v12 }
 0x484   : > { %v2717_v8 = vsel %vm1139_vm5, %v4818_v61, %v9639_v17  ;;  %v2621_v17 = vsel %vm1041_vm3, %v9645_v59, %v9644_v10 }
 0x485   : > { %v2980_v60 = vpack.c.bf16 %v2765_v45, %v2717_v8  ;;  %v2669_v8 = vsel %vm1090_vm4, %v9647_v37, %v9646_v50  ;;  %v8330_v50 = vld [vmem:[%s9390_s14] sm:$0xf] }
 0x486   : > { %5051 = vrot.lane.b32.xlu1 %v5015_v28, %s9905_s26  ;;  %5046 = vrot.lane.b32.xlu0 %v5015_v28, %s9902_s3  ;;  %v2964_v35 = vpack.c.bf16 %v2669_v8, %v2621_v17 }
 0x487   : > { %5041 = vrot.lane.b32.xlu2 %v5015_v28, %s9908_s5  ;;  %3144 = vmatpush.bf16.msra.mxu2 %v2980_v60  ;;  %v2910_v60 = vsel %vm1335_vm10, %v4789_v41, %v4848_v24  ;;  %v2909_v41 = vsel %vm1335_vm10, %v4848_v24, %v4808_v0  ;;  %v10127_v24 = vunpack.i.l.bf16 %v8249_v56 }
 0x488   : > { %v8307_v32 = vpop.permute.xlu1 %4851  ;;  %v8309_v1 = vpop.permute.xlu0 %4841 }
 0x489   : > { %v4843_v45 = vunpack.i.l.bf16 %v8309_v1  ;;  %v8318_v13 = vpop.permute.xlu2 %4856  ;;  %v4853_v59 = vunpack.i.l.bf16 %v8307_v32 }
 0x48a   : > { %v9648_v28 = vunpack.i.l.bf16 %v8318_v13 }
 0x48b   : > { %3145 = vmatpush.bf16.msra.mxu2 %v2964_v35  ;;  %v2862_v17 = vsel %vm1286_vm9, %v4784_v49, %v4843_v45  ;;  %v2861_v8 = vsel %vm1286_vm9, %v4843_v45, %v4803_v30  ;;  %v5065_v35 = vpack.i.bf16 %v8094_v63, %v8084_v62  ;;  %v10126_v63 = vunpack.i.h.bf16 %v8169_v44 }
 0x48c   : > { %v3010_v37 = vpack.c.bf16 %v2910_v60, %v2862_v17  ;;  %v3011_v10 = vpack.c.bf16 %v2909_v41, %v2861_v8  ;;  %v2952_v49 = vsel %vm1384_vm7, %v10125_v48, %v9648_v28  ;;  %v2813_v48 = vsel %vm1237_vm11, %v4853_v59, %v10127_v24 }
 0x48d   : > { %v3032_v55 = vpack.c.bf16 %v2952_v49, %v2952_v49  ;;  %v2814_v0 = vsel %vm1237_vm11, %v10126_v63, %v4853_v59  ;;  %v9651_v30 = vunpack.i.l.bf16 %v8137_v33  ;;  %v9654_v60 = vunpack.i.h.bf16 %v8275_v58 }
 0x48e   : > { %4023 = vmatmul.msk.bf16.vlgmr.msra.gmra.mxu2 %vm1488_vm12, %v8330_v50  ;;  %5066 = vrot.lane.b32.xlu1 %v5065_v35, %s9885_s8  ;;  %v9664_v8 = vunpack.i.h.bf16 %v8309_v1  ;;  %v2995_v28 = vpack.c.bf16 %v2813_v48, %v8003_v22  ;;  %v9656_v45 = vunpack.i.h.bf16 %v8307_v32  ;;  %v10128_v22 = vunpack.i.h.bf16 %v8224_v47 }
 0x48f   : > { %5061 = vrot.lane.b32.xlu0 %v5065_v35, %s9919_s0  ;;  %5056 = vrot.lane.b32.xlu2 %v5065_v35, %s9884_s28  ;;  %v3073_v62 = vsel %vm1492_vm8, %v3032_v55, 0  ;;  %v2718_v59 = vsel %vm1139_vm5, %v9651_v30, %v4818_v61  ;;  %v9655_v48 = vunpack.i.l.bf16 %v8165_v5  ;;  %s686_s0 = sand.u32 1, %s5113_s2   ;;  %s4079_s2 = sshll.u32 (%p5267_p4), %s5255_s27, 7 }
 0x490   : > { %3116 = vmatpush.bf16.msra.mxu0 %v3010_v37  ;;  %3129 = vmatpush.bf16.msrb.mxu1 %v3011_v10  ;;  %v8369_v17 = vpop.permute.xlu1 %4861  ;;  %v8371_v55 = vpop.permute.xlu0 %4871  ;;  %v2994_v10 = vpack.c.bf16 %v2814_v0, %v8000_v34  ;;  %s3911_s6 = sshll.u32 %s686_s0, 8  ;;  %s9302_s9 = scalar_lea.vmem (%p5267_p4), %s9396_s20, %s4079_s2 }
 0x491   : > { %3193 = vmatpush.bf16.msrb.mxu2 %v3073_v62  ;;  %v9650_v41 = vunpack.i.h.bf16 %v8369_v17  ;;  %v9649_v49 = vunpack.i.l.bf16 %v8369_v17  ;;  %v8377_v63 = vpop.permute.xlu2 %4866  ;;  %v3373_v62 = vld [vmem:[%s9393_s17] sm:$0xff]  ;;  %v10132_v30 = vunpack.i.l.bf16 %v8371_v55  ;;  %v4874_v11 = vunpack.i.h.bf16 %v8371_v55  ;;  %s9227_s24 = scalar_lea.vmem [#allocation2], %s3911_s6 }
 0x492   : > { %v9653_v24 = vunpack.i.h.bf16 %v8377_v63  ;;  %v9652_v37 = vunpack.i.l.bf16 %v8377_v63  ;;  %v10149_v53 = vunpack.i.h.bf16 %v8369_v17 }
 0x493   : > { %v2856_v34 = vsel %vm1286_vm9, %v9664_v8, %v9649_v49  ;;  %v8403_v0 = vsel %vm1286_vm9, %v10128_v22, %v9650_v41  ;;  %v10129_v49 = vunpack.i.h.bf16 %v8220_v14  ;;  %v10130_v22 = vunpack.i.l.bf16 %v8246_v26  ;;  %v3042_v14 = vld [vmem:[%s9391_s15] sm:$0xff] }
 0x494   : > { %3117 = vmatpush.bf16.msra.mxu0 %v2994_v10  ;;  %3130 = vmatpush.bf16.msrb.mxu1 %v2995_v28  ;;  %v2904_v61 = vsel %vm1335_vm10, %v9654_v60, %v9652_v37  ;;  %v10131_v10 = vunpack.i.l.bf16 %v8167_v18  ;;  %v2808_v37 = vsel %vm1237_vm11, %v9656_v45, %v10132_v30 }
 0x495   : > { %v8418_v47 = vsel %vm1335_vm10, %v10129_v49, %v9653_v24  ;;  %v3016_v41 = vpack.c.bf16 %v2904_v61, %v2856_v34  ;;  %v9663_v24 = vunpack.i.l.bf16 %v8144_v16  ;;  %v10133_v34 = vunpack.i.l.bf16 %v8277_v9 }
 0x496   : > { %v2766_v28 = vsel %vm1188_vm6, %v10131_v10, %v10130_v22  ;;  %3377 = vperm.xlu1 %4754, %v3373_v62   ;;  %v9662_v61 = vunpack.i.h.bf16 %v8137_v33  ;;  %v9661_v22 = vunpack.i.h.bf16 %v8167_v18 }
 0x497   : > { %v2979_v60 = vpack.c.bf16 %v2766_v28, %v2718_v59  ;;  %5071 = vrot.lane.b32.xlu2 %v5065_v35, %s9886_s29  ;;  %3194 = vmatpush.bf16.msrb.mxu2 %v3016_v41  ;;  %v2622_v30 = vsel %vm1041_vm3, %v9655_v48, %v10133_v34  ;;  %v10134_v59 = vunpack.i.l.bf16 %v8218_v27  ;;  %v3000_v41 = vpack.c.bf16 %v2808_v37, %v7995_v20 }
 0x498   : > { %v8447_v10 = vpop.permute.xlu1 %4881  ;;  %v8449_v49 = vpop.permute.xlu0 %4876  ;;  %3045 = vperm.xlu0 %5075, %v3042_v14   ;;  %v10135_v14 = vunpack.i.h.bf16 %v8279_v12 }
 0x499   : > { %3131 = vmatpush.bf16.msrb.mxu1 %v2979_v60  ;;  %v2670_v35 = vsel %vm1090_vm4, %v9663_v24, %v10134_v59  ;;  %v9659_v62 = vunpack.i.h.bf16 %v8447_v10  ;;  %v9657_v28 = vunpack.i.l.bf16 %v8447_v10  ;;  %v9660_v60 = vunpack.i.h.bf16 %v8449_v49  ;;  %v8462_v48 = vpop.permute.xlu2 %4891 }
 0x49a   : > { %v9658_v34 = vunpack.i.l.bf16 %v8449_v49  ;;  %v2963_v45 = vpack.c.bf16 %v2670_v35, %v2622_v30  ;;  %v10136_v59 = vunpack.i.h.bf16 %v8246_v26  ;;  %v9668_v26 = vunpack.i.h.bf16 %v8144_v16 }
 0x49b   : > { %3195 = vmatpush.bf16.msrb.mxu2 %v3000_v41  ;;  %v2761_v37 = vsel %vm1188_vm6, %v9661_v22, %v9657_v28  ;;  %v8482_v30 = vsel %vm1139_vm5, %v10135_v14, %v9660_v60  ;;  %v3374_v41 = vld [vmem:[%s9393_s17 + $0x8] sm:$0xff]  ;;  %v9667_v14 = vunpack.i.l.bf16 %v8462_v48  ;;  %v10137_v22 = vunpack.i.h.bf16 %v8244_v21 }
 0x49c   : > { %v2713_v20 = vsel %vm1139_vm5, %v9662_v61, %v9658_v34  ;;  %v8490_v35 = vsel %vm1188_vm6, %v10136_v59, %v9659_v62  ;;  %v9669_v59 = vunpack.i.h.bf16 %v8462_v48  ;;  %v10138_v24 = vunpack.i.h.bf16 %v8277_v9 }
 0x49d   : > { %3132 = vmatpush.bf16.msrb.mxu1 %v2963_v45  ;;  %v2984_v28 = vpack.c.bf16 %v2761_v37, %v2713_v20  ;;  %v9666_v20 = vunpack.i.h.bf16 %v8165_v5 }
 0x49e   : > { %v8542_v21 = vsel %vm1090_vm4, %v10139_v6, %v9669_v59 }
 0x49f   : > { %3382 = vperm.xlu2 %4433, %v3374_v41   ;;  %3196 = vmatpush.bf16.msrb.mxu2 %v2984_v28  ;;  %v2665_v41 = vsel %vm1090_vm4, %v9668_v26, %v9667_v14  ;;  %v10141_v26 = vunpack.i.h.bf16 %v8275_v58 }
 0x4a0   : > { %4022 = vmatmul.msk.bf16.vlgmr.msrb.gmra.mxu1 %vm1488_vm12, %v8330_v50  ;;  %v8502_v45 = vpop.permute.xlu1 %4886  ;;  %v8504_v34 = vpop.permute.xlu0 %4896 }
 0x4a1   : > { %v9670_v37 = vunpack.i.h.bf16 %v8502_v45  ;;  %v9665_v12 = vunpack.i.l.bf16 %v8502_v45  ;;  %v4898_v62 = vunpack.i.l.bf16 %v8504_v34  ;;  %v8510_v60 = vpop.permute.xlu2 %4906 }
 0x4a2   : > { %v9671_v14 = vunpack.i.l.bf16 %v8510_v60 }
 0x4a3   : > { %v2617_v28 = vsel %vm1041_vm3, %v9666_v20, %v9665_v12  ;;  %v2953_v61 = vsel %vm1384_vm7, %v4898_v62, %v10137_v22  ;;  %v8534_v8 = vsel %vm1041_vm3, %v10138_v24, %v9670_v37 }
 0x4a4   : > { %v2968_v12 = vpack.c.bf16 %v2665_v41, %v2617_v28  ;;  %v3031_v20 = vpack.c.bf16 %v2953_v61, %v2953_v61  ;;  %v9673_v28 = vunpack.i.h.bf16 %v8504_v34  ;;  %v2905_v59 = vsel %vm1335_vm10, %v9671_v14, %v10141_v26 }
 0x4a6   : > { %3197 = vmatpush.bf16.msrb.mxu2 %v2968_v12  ;;  %v3070_v9 = vsel %vm1492_vm8, %v3031_v20, 0  ;;  %v10140_v20 = vunpack.i.h.bf16 %v8309_v1  ;;  %v10142_v1 = vunpack.i.h.bf16 %v8307_v32 }
 0x4a7   : > { %3180 = vmatpush.bf16.msra.mxu1 %v3070_v9 }
 0x4a8   : > { %v8548_v24 = vpop.permute.xlu1 %4901  ;;  %v8550_v61 = vpop.permute.xlu0 %4916 }
 0x4a9   : > { %v4903_v27 = vunpack.i.l.bf16 %v8548_v24  ;;  %v9672_v6 = vunpack.i.l.bf16 %v8550_v61  ;;  %v8555_v41 = vpop.permute.xlu2 %4911  ;;  %4027 = vmatmul.msk.bf16.vlgmr.msrb.gmra.mxu2 %vm1488_vm12, %v8330_v50 }
 0x4ab   : > { %v2857_v9 = vsel %vm1286_vm9, %v4903_v27, %v10140_v20  ;;  %v2948_v37 = vsel %vm1384_vm7, %v9673_v28, %v9672_v6  ;;  %v10143_v20 = vunpack.i.l.bf16 %v8555_v41 }
 0x4ac   : > { %v3015_v22 = vpack.c.bf16 %v2905_v59, %v2857_v9  ;;  %v3036_v12 = vpack.c.bf16 %v2948_v37, %v2948_v37 }
 0x4ad   : > { %v2809_v58 = vsel %vm1237_vm11, %v10143_v20, %v10142_v1  ;;  %v10145_v20 = vunpack.i.l.bf16 %v8167_v18 }
 0x4ae   : > { %3181 = vmatpush.bf16.msra.mxu1 %v3015_v22  ;;  %v3085_v52 = vsel %vm1492_vm8, %v3036_v12, 0  ;;  %v2999_v7 = vpack.c.bf16 %v2809_v58, %v8039_v3  ;;  %v4859_v22 = vunpack.i.h.bf16 %v8318_v13  ;;  %v10144_v12 = vunpack.i.l.bf16 %v8137_v33 }
 0x4af   : > { %3245 = vmatpush.bf16.msra.mxu2 %v3085_v52 }
 0x4b0   : > { %v8583_v26 = vpop.permute.xlu1 %4926  ;;  %v8585_v14 = vpop.permute.xlu0 %4921 }
 0x4b1   : > { %v9675_v59 = vunpack.i.h.bf16 %v8583_v26  ;;  %v4928_v37 = vunpack.i.l.bf16 %v8583_v26  ;;  %v9674_v32 = vunpack.i.h.bf16 %v8585_v14  ;;  %v4923_v9 = vunpack.i.l.bf16 %v8585_v14  ;;  %v8592_v6 = vpop.permute.xlu2 %4951 }
 0x4b2   : > { %3182 = vmatpush.bf16.msra.mxu1 %v2999_v7 }
 0x4b3   : > { %v2720_v52 = vsel %vm1139_vm5, %v9674_v32, %v4923_v9  ;;  %v2768_v3 = vsel %vm1188_vm6, %v9675_v59, %v4928_v37  ;;  %v2719_v1 = vsel %vm1139_vm5, %v4923_v9, %v10144_v12  ;;  %v2767_v7 = vsel %vm1188_vm6, %v4928_v37, %v10145_v20 }
 0x4b4   : > { %v2977_v58 = vpack.c.bf16 %v2768_v3, %v2720_v52  ;;  %v2978_v28 = vpack.c.bf16 %v2767_v7, %v2719_v1  ;;  %v10146_v32 = vunpack.i.h.bf16 %v8186_v42  ;;  %v2954_v59 = vsel %vm1384_vm7, %v4859_v22, %v4898_v62 }
 0x4b5   : > { %v3030_v1 = vpack.c.bf16 %v2954_v59, %v2954_v59  ;;  %v10148_v7 = vunpack.i.l.bf16 %v8144_v16 }
 0x4b6   : > { %3105 = vmatpush.bf16.msrb.mxu3 %v2977_v58  ;;  %3118 = vmatpush.bf16.msra.mxu0 %v2978_v28  ;;  %v2955_v25 = vsel %vm1384_vm7, %v10146_v32, %v4859_v22  ;;  %v10147_v22 = vunpack.i.l.bf16 %v8165_v5 }
 0x4b7   : > { %v3029_v42 = vpack.c.bf16 %v2955_v25, %v2955_v25 }
 0x4b8   : > { %v8617_v51 = vpop.permute.xlu1 %4941  ;;  %v8619_v9 = vpop.permute.xlu0 %4931 }
 0x4b9   : > { %v9677_v12 = vunpack.i.h.bf16 %v8617_v51  ;;  %v4943_v37 = vunpack.i.l.bf16 %v8617_v51  ;;  %v9676_v52 = vunpack.i.h.bf16 %v8619_v9  ;;  %v4933_v28 = vunpack.i.l.bf16 %v8619_v9  ;;  %v8625_v3 = vpop.permute.xlu2 %4961 }
 0x4bb   : > { %v2624_v62 = vsel %vm1041_vm3, %v9676_v52, %v4933_v28  ;;  %v2672_v32 = vsel %vm1090_vm4, %v9677_v12, %v4943_v37  ;;  %v2623_v20 = vsel %vm1041_vm3, %v4933_v28, %v10147_v22  ;;  %v2671_v25 = vsel %vm1090_vm4, %v4943_v37, %v10148_v7 }
 0x4bc   : > { %v2961_v59 = vpack.c.bf16 %v2672_v32, %v2624_v62  ;;  %v2962_v58 = vpack.c.bf16 %v2671_v25, %v2623_v20  ;;  %v3064_v52 = vsel %vm1492_vm8, %v3029_v42, 0  ;;  %v3067_v12 = vsel %vm1492_vm8, %v3030_v1, 0 }
 0x4bd   : > { %v2858_v28 = vsel %vm1286_vm9, %v10149_v53, %v4903_v27  ;;  %v10150_v62 = vunpack.i.l.bf16 %v8510_v60  ;;  %v10151_v32 = vunpack.i.h.bf16 %v8377_v63  ;;  %v10152_v27 = vunpack.i.h.bf16 %v8249_v56 }
 0x4be   : > { %3106 = vmatpush.bf16.msrb.mxu3 %v2961_v59  ;;  %3119 = vmatpush.bf16.msra.mxu0 %v2962_v58  ;;  %v10154_v59 = vpack.c.bf16 %v8418_v47, %v8403_v0  ;;  %v10155_v58 = vunpack.i.h.bf16 %v8137_v33  ;;  %v10156_v56 = vunpack.i.h.bf16 %v8167_v18  ;;  %v10157_v0 = vunpack.i.h.bf16 %v8449_v49 }
 0x4bf   : > { %v2906_v42 = vsel %vm1335_vm10, %v10151_v32, %v10150_v62  ;;  %v4919_v32 = vunpack.i.h.bf16 %v8550_v61  ;;  %v10158_v47 = vunpack.i.h.bf16 %v8447_v10 }
 0x4c0   : > { %v8650_v22 = vpop.permute.xlu1 %4946  ;;  %v8652_v37 = vpop.permute.xlu0 %4936  ;;  %v3014_v53 = vpack.c.bf16 %v2906_v42, %v2858_v28 }
 0x4c1   : > { %v4948_v1 = vunpack.i.l.bf16 %v8650_v22  ;;  %v4938_v20 = vunpack.i.l.bf16 %v8652_v37  ;;  %v8662_v7 = vpop.permute.xlu2 %4981  ;;  %4020 = vmatmul.msk.bf16.vlgmr.msrb.gmra.mxu3 %vm1488_vm12, %v8330_v50  ;;  %4021 = vmatmul.msk.bf16.vlgmr.msra.gmra.mxu0 %vm1488_vm12, %v8330_v50 }
 0x4c2   : > { %3154 = vmatpush.bf16.msra.mxu3 %v3064_v52  ;;  %3167 = vmatpush.bf16.msrb.mxu0 %v3067_v12  ;;  %v2811_v12 = vsel %vm1237_vm11, %v10152_v27, %v4874_v11  ;;  %v10153_v52 = vunpack.i.l.bf16 %v8555_v41 }
 0x4c3   : > { %v2714_v28 = vsel %vm1139_vm5, %v4938_v20, %v10155_v58  ;;  %v2762_v62 = vsel %vm1188_vm6, %v4948_v1, %v10156_v56  ;;  %v2715_v33 = vsel %vm1139_vm5, %v10157_v0, %v4938_v20  ;;  %v2763_v18 = vsel %vm1188_vm6, %v10158_v47, %v4948_v1 }
 0x4c4   : > { %v2810_v25 = vsel %vm1237_vm11, %v4874_v11, %v10153_v52  ;;  %v2983_v42 = vpack.c.bf16 %v2762_v62, %v2714_v28  ;;  %v2997_v11 = vpack.c.bf16 %v2811_v12, %v8027_v29  ;;  %v4909_v52 = vunpack.i.h.bf16 %v8510_v60 }
 0x4c5   : > { %v2998_v27 = vpack.c.bf16 %v2810_v25, %v8036_v19  ;;  %v10159_v12 = vunpack.i.l.bf16 %v8318_v13  ;;  %v4904_v25 = vunpack.i.h.bf16 %v8548_v24  ;;  %v2982_v28 = vpack.c.bf16 %v2763_v18, %v2715_v33 }
 0x4c6   : > { %3155 = vmatpush.bf16.msra.mxu3 %v10154_v59  ;;  %3168 = vmatpush.bf16.msrb.mxu0 %v3014_v53  ;;  %v9681_v53 = vunpack.i.l.bf16 %v8592_v6  ;;  %v4914_v56 = vunpack.i.h.bf16 %v8555_v41  ;;  %v4954_v0 = vunpack.i.h.bf16 %v8592_v6  ;;  %v9682_v47 = vunpack.i.h.bf16 %v8650_v22  ;;  %v8959_v41 = vld [vmem:[%s7987_s1 + $0x50] sm:$0xff] }
 0x4c7   : > { %3183 = vmatpush.bf16.msra.mxu1 %v2983_v42  ;;  %v2951_v20 = vsel %vm1384_vm7, %v10159_v12, %v4919_v32  ;;  %v10160_v42 = vpack.c.bf16 %v8490_v35, %v8482_v30  ;;  %v4963_v30 = vunpack.i.l.bf16 %v8625_v3  ;;  %v9680_v18 = vunpack.i.l.bf16 %v8662_v7 }
 0x4c8   : > { %v8700_v29 = vpop.permute.xlu1 %4971  ;;  %v8702_v19 = vpop.permute.xlu0 %4956  ;;  %v2852_v13 = vsel %vm1286_vm9, %v4904_v25, %v9681_v53 }
 0x4c9   : > { %v9678_v1 = vunpack.i.l.bf16 %v8700_v29  ;;  %v9679_v59 = vunpack.i.l.bf16 %v8702_v19  ;;  %v8713_v58 = vpop.permute.xlu2 %4996  ;;  %v4959_v62 = vunpack.i.h.bf16 %v8702_v19  ;;  %v4974_v12 = vunpack.i.h.bf16 %v8700_v29 }
 0x4ca   : > { %3156 = vmatpush.bf16.msra.mxu3 %v2997_v11  ;;  %3169 = vmatpush.bf16.msrb.mxu0 %v2998_v27  ;;  %v3033_v27 = vpack.c.bf16 %v2951_v20, %v2951_v20  ;;  %v10161_v20 = vpack.c.bf16 %v8542_v21, %v8534_v8  ;;  %v10163_v8 = vunpack.i.l.bf16 %v8369_v17 }
 0x4cb   : > { %v2900_v11 = vsel %vm1335_vm10, %v4909_v52, %v9679_v59  ;;  %v2804_v33 = vsel %vm1237_vm11, %v4914_v56, %v9678_v1 }
 0x4cc   : > { %v3020_v35 = vpack.c.bf16 %v2900_v11, %v2852_v13  ;;  %v2855_v21 = vsel %vm1286_vm9, %v10163_v8, %v4954_v0  ;;  %v2757_v8 = vsel %vm1188_vm6, %v9682_v47, %v9680_v18  ;;  %v4984_v47 = vunpack.i.h.bf16 %v8662_v7 }
 0x4ce   : > { %3157 = vmatpush.bf16.msra.mxu3 %v10160_v42  ;;  %3170 = vmatpush.bf16.msrb.mxu0 %v2982_v28  ;;  %v3076_v28 = vsel %vm1492_vm8, %v3033_v27, 0  ;;  %v10162_v42 = vunpack.i.l.bf16 %v8377_v63  ;;  %v10164_v27 = vunpack.i.h.bf16 %v8502_v45 }
 0x4cf   : > { %3246 = vmatpush.bf16.msra.mxu2 %v3020_v35  ;;  %v3004_v35 = vpack.c.bf16 %v2804_v33, %v8017_v23  ;;  %v10165_v23 = vunpack.i.h.bf16 %v8165_v5 }
 0x4d0   : > { %v2903_v13 = vsel %vm1335_vm10, %v10162_v42, %v4959_v62  ;;  %v8753_v11 = vpop.permute.xlu1 %4976  ;;  %v8755_v1 = vpop.permute.xlu0 %4966  ;;  %v2619_v63 = vsel %vm1041_vm3, %v10164_v27, %v4963_v30  ;;  %v10166_v27 = vunpack.i.l.bf16 %v8371_v55 }
 0x4d1   : > { %v9683_v42 = vunpack.i.l.bf16 %v8753_v11  ;;  %v8771_v59 = vpop.permute.xlu2 %5011  ;;  %v2618_v17 = vsel %vm1041_vm3, %v4963_v30, %v10165_v23  ;;  %v3017_v33 = vpack.c.bf16 %v2903_v13, %v2855_v21  ;;  %v4979_v30 = vunpack.i.h.bf16 %v8753_v11 }
 0x4d2   : > { %3158 = vmatpush.bf16.msra.mxu3 %v10161_v20  ;;  %v4939_v20 = vunpack.i.h.bf16 %v8652_v37  ;;  %v2807_v5 = vsel %vm1237_vm11, %v10166_v27, %v4974_v12  ;;  %v10167_v23 = vunpack.i.h.bf16 %v8462_v48 }
 0x4d3   : > { %3247 = vmatpush.bf16.msra.mxu2 %v3004_v35  ;;  %v10168_v35 = vunpack.i.h.bf16 %v8144_v16  ;;  %v3001_v16 = vpack.c.bf16 %v2807_v5, %v8054_v40  ;;  %v10170_v40 = vunpack.i.l.bf16 %v8447_v10  ;;  %v4999_v10 = vunpack.i.h.bf16 %v8713_v58 }
 0x4d4   : > { %v2709_v55 = vsel %vm1139_vm5, %v4939_v20, %v9683_v42  ;;  %v10175_v42 = vunpack.i.l.bf16 %v8502_v45 }
 0x4d5   : > { %4024 = vmatmul.msk.bf16.vlgmr.msra.gmra.mxu3 %vm1488_vm12, %v8330_v50  ;;  %v2988_v53 = vpack.c.bf16 %v2757_v8, %v2709_v55  ;;  %v5013_v55 = vunpack.i.l.bf16 %v8771_v59 }
 0x4d6   : > { %3206 = vmatpush.bf16.msrb.mxu3 %v3076_v28  ;;  %v4968_v28 = vunpack.i.l.bf16 %v8755_v1 }
 0x4d7   : > { %3248 = vmatpush.bf16.msra.mxu2 %v2988_v53 }
 0x4d8   : > { %v2667_v13 = vsel %vm1090_vm4, %v10167_v23, %v4968_v28  ;;  %v2666_v21 = vsel %vm1090_vm4, %v4968_v28, %v10168_v35  ;;  %v10169_v28 = vunpack.i.l.bf16 %v8449_v49  ;;  %v8814_v35 = vpop.permute.xlu1 %4986  ;;  %v2760_v49 = vsel %vm1188_vm6, %v10170_v40, %v4984_v47 }
 0x4d9   : > { %v2966_v27 = vpack.c.bf16 %v2667_v13, %v2619_v63  ;;  %v2967_v18 = vpack.c.bf16 %v2666_v21, %v2618_v17  ;;  %v4988_v63 = vunpack.i.l.bf16 %v8814_v35  ;;  %v8819_v17 = vpop.permute.xlu2 %5016  ;;  %v10171_v13 = vunpack.i.h.bf16 %v8504_v34 }
 0x4da   : > { %3207 = vmatpush.bf16.msrb.mxu3 %v3017_v33  ;;  %v2712_v23 = vsel %vm1139_vm5, %v10169_v28, %v4979_v30  ;;  %v8816_v33 = vpop.permute.xlu0 %5001  ;;  %v5018_v8 = vunpack.i.l.bf16 %v8819_v17  ;;  %v9685_v28 = vunpack.i.h.bf16 %v8755_v1  ;;  %v10172_v34 = vunpack.i.l.bf16 %v8550_v61 }
 0x4db   : > { %3171 = vmatpush.bf16.msrb.mxu0 %v2966_v27  ;;  %3184 = vmatpush.bf16.msra.mxu1 %v2967_v18  ;;  %v2985_v53 = vpack.c.bf16 %v2760_v49, %v2712_v23  ;;  %v4989_v18 = vunpack.i.h.bf16 %v8814_v35  ;;  %v2950_v5 = vsel %vm1384_vm7, %v4919_v32, %v4988_v63  ;;  %v2949_v21 = vsel %vm1384_vm7, %v4988_v63, %v10171_v13 }
 0x4dc   : > { %v3034_v27 = vpack.c.bf16 %v2950_v5, %v2950_v5  ;;  %v2947_v32 = vsel %vm1384_vm7, %v10172_v34, %v5018_v8  ;;  %v10173_v63 = vunpack.i.l.bf16 %v8149_v54  ;;  %v9684_v5 = vunpack.i.l.bf16 %v8713_v58 }
 0x4dd   : > { %v10174_v61 = vunpack.i.l.bf16 %v8462_v48  ;;  %v2853_v34 = vsel %vm1286_vm9, %v5013_v55, %v4904_v25 }
 0x4de   : > { %3208 = vmatpush.bf16.msrb.mxu3 %v3001_v16  ;;  %4025 = vmatmul.msk.bf16.vlgmr.msrb.gmra.mxu0 %vm1488_vm12, %v8330_v50  ;;  %v3035_v16 = vpack.c.bf16 %v2949_v21, %v2949_v21  ;;  %v3079_v23 = vsel %vm1492_vm8, %v3034_v27, 0  ;;  %v2960_v49 = vsel %vm1384_vm7, %v4989_v18, %v10173_v63  ;;  %v2854_v27 = vsel %vm1286_vm9, %v4954_v0, %v5013_v55 }
 0x4df   : > { %4026 = vmatmul.msk.bf16.vlgmr.msra.gmra.mxu1 %vm1488_vm12, %v8330_v50  ;;  %3219 = vmatpush.bf16.msra.mxu0 %v3079_v23  ;;  %v2664_v54 = vsel %vm1090_vm4, %v10174_v61, %v4999_v10  ;;  %v2661_v0 = vsel %vm1090_vm4, %v9685_v28, %v9684_v5  ;;  %v3037_v63 = vpack.c.bf16 %v2947_v32, %v2947_v32  ;;  %v5014_v28 = vunpack.i.h.bf16 %v8771_v59 }
 0x4e0   : > { %v3082_v40 = vsel %vm1492_vm8, %v3035_v16, 0  ;;  %v8860_v13 = vpop.permute.xlu1 %4991  ;;  %v3040_v61 = vpack.c.bf16 %v2960_v49, %v2960_v49 }
 0x4e1   : > { %3232 = vmatpush.bf16.msrb.mxu1 %v3082_v40  ;;  %v4994_v16 = vunpack.i.h.bf16 %v8860_v13  ;;  %v4993_v23 = vunpack.i.l.bf16 %v8860_v13  ;;  %v3088_v60 = vsel %vm1492_vm8, %v3037_v63, 0 }
 0x4e2   : > { %3209 = vmatpush.bf16.msrb.mxu3 %v2985_v53  ;;  %v4964_v53 = vunpack.i.h.bf16 %v8625_v3  ;;  %v8862_v21 = vpop.permute.xlu0 %5021  ;;  %v10184_v3 = vunpack.i.h.bf16 %v8617_v51 }
 0x4e3   : > { %v5023_v40 = vunpack.i.l.bf16 %v8862_v21  ;;  %v5024_v48 = vunpack.i.h.bf16 %v8862_v21  ;;  %v2616_v24 = vsel %vm1041_vm3, %v10175_v42, %v4994_v16 }
 0x4e4   : > { %v2613_v45 = vsel %vm1041_vm3, %v4964_v53, %v4993_v23  ;;  %v2969_v32 = vpack.c.bf16 %v2664_v54, %v2616_v24  ;;  %v5019_v24 = vunpack.i.h.bf16 %v8819_v17 }
 0x4e5   : > { %v2902_v25 = vsel %vm1335_vm10, %v4959_v62, %v5023_v40  ;;  %v2901_v55 = vsel %vm1335_vm10, %v5023_v40, %v4909_v52  ;;  %v2972_v5 = vpack.c.bf16 %v2661_v0, %v2613_v45  ;;  %v3097_v52 = vsel %vm1492_vm8, %v3040_v61, 0 }
 0x4e6   : > { %v3018_v49 = vpack.c.bf16 %v2902_v25, %v2854_v27  ;;  %v3019_v42 = vpack.c.bf16 %v2901_v55, %v2853_v34  ;;  %3210 = vmatpush.bf16.msrb.mxu3 %v2969_v32  ;;  %v10176_v62 = vunpack.i.l.bf16 %v8178_v38  ;;  %v10177_v38 = vunpack.i.l.bf16 %v8180_v2 }
 0x4e7   : > { %3249 = vmatpush.bf16.msra.mxu2 %v2972_v5  ;;  %v5003_v61 = vunpack.i.l.bf16 %v8816_v33  ;;  %v10178_v32 = vunpack.i.l.bf16 %v8169_v44  ;;  %v2945_v37 = vsel %vm1384_vm7, %v5019_v24, %v4989_v18 }
 0x4e8   : > { %3220 = vmatpush.bf16.msra.mxu0 %v3018_v49  ;;  %3233 = vmatpush.bf16.msrb.mxu1 %v3019_v42  ;;  %v2912_v54 = vsel %vm1335_vm10, %v5024_v48, %v10176_v62  ;;  %v8917_v27 = vpop.permute.xlu1 %5006  ;;  %v2864_v63 = vsel %vm1286_vm9, %v5014_v28, %v10177_v38  ;;  %v5004_v42 = vunpack.i.h.bf16 %v8816_v33  ;;  %v8963_v62 = vld [vmem:[%s7987_s1 + $0x78] sm:$0xff] }
 0x4e9   : > { %v5008_v34 = vunpack.i.l.bf16 %v8917_v27  ;;  %4028 = vmatmul.msk.bf16.vlgmr.msrb.gmra.mxu3 %vm1488_vm12, %v8330_v50  ;;  %v3024_v25 = vpack.c.bf16 %v2912_v54, %v2864_v63  ;;  %v5009_v55 = vunpack.i.h.bf16 %v8917_v27  ;;  %v2711_v63 = vsel %vm1139_vm5, %v4979_v30, %v5003_v61 }
 0x4ea   : > { %3258 = vmatpush.bf16.msra.mxu3 %v3088_v60  ;;  %v8919_v40 = vpop.permute.xlu0 %5026  ;;  %4031 = vmatmul.msk.bf16.vlgmr.msra.gmra.mxu2 %vm1488_vm12, %v8330_v50  ;;  %v8952_v60 = vpop.permute.xlu2 %5041 }
 0x4eb   : > { %3297 = vmatpush.bf16.msrb.mxu2 %v3097_v52  ;;  %v5029_v5 = vunpack.i.h.bf16 %v8919_v40  ;;  %v5028_v0 = vunpack.i.l.bf16 %v8919_v40  ;;  %v8955_v52 = vld [vmem:[%s7987_s1 + $0x48] sm:$0xff]  ;;  %v2759_v54 = vsel %vm1188_vm6, %v4984_v47, %v5008_v34  ;;  %v2946_v47 = vsel %vm1384_vm7, %v5018_v8, %v5019_v24 }
 0x4ed   : > { %v2806_v2 = vsel %vm1237_vm11, %v4974_v12, %v5028_v0  ;;  %v2805_v45 = vsel %vm1237_vm11, %v5028_v0, %v4914_v56  ;;  %v2816_v49 = vsel %vm1237_vm11, %v5029_v5, %v10178_v32  ;;  %v10179_v0 = vunpack.i.h.bf16 %v8650_v22 }
 0x4ee   : > { %v3002_v12 = vpack.c.bf16 %v2806_v2, %v8955_v52  ;;  %v3003_v56 = vpack.c.bf16 %v2805_v45, %v8959_v41  ;;  %v3008_v44 = vpack.c.bf16 %v2816_v49, %v8963_v62  ;;  %v10180_v2 = vunpack.i.h.bf16 %v8583_v26 }
 0x4ef   : > { %3298 = vmatpush.bf16.msrb.mxu2 %v3024_v25  ;;  %v2758_v38 = vsel %vm1188_vm6, %v5008_v34, %v10179_v0  ;;  %v2710_v25 = vsel %vm1139_vm5, %v5003_v61, %v4939_v20  ;;  %v2986_v26 = vpack.c.bf16 %v2759_v54, %v2711_v63  ;;  %v10181_v61 = vunpack.i.h.bf16 %v8585_v14 }
 0x4f0   : > { %3221 = vmatpush.bf16.msra.mxu0 %v3002_v12  ;;  %3234 = vmatpush.bf16.msrb.mxu1 %v3003_v56  ;;  %v2753_v22 = vsel %vm1188_vm6, %v5009_v55, %v10180_v2  ;;  %v8996_v30 = vpop.permute.xlu1 %5036  ;;  %v2987_v34 = vpack.c.bf16 %v2758_v38, %v2710_v25  ;;  %v3038_v32 = vpack.c.bf16 %v2946_v47, %v2946_v47  ;;  %v5044_v63 = vunpack.i.h.bf16 %v8952_v60 }
 0x4f1   : > { %v2705_v17 = vsel %vm1139_vm5, %v5004_v42, %v10181_v61  ;;  %v5039_v8 = vunpack.i.h.bf16 %v8996_v30  ;;  %v5038_v35 = vunpack.i.l.bf16 %v8996_v30  ;;  %v3039_v49 = vpack.c.bf16 %v2945_v37, %v2945_v37 }
 0x4f2   : > { %v8998_v20 = vpop.permute.xlu0 %5031  ;;  %v2992_v45 = vpack.c.bf16 %v2753_v22, %v2705_v17  ;;  %v5043_v25 = vunpack.i.l.bf16 %v8952_v60  ;;  %v5057_v2 = vpop.permute.xlu2 %5056  ;;  %v10185_v60 = vunpack.i.l.bf16 %v8592_v6  ;;  %v2849_v6 = vsel %vm1286_vm9, %v5044_v63, %v5014_v28 }
 0x4f3   : > { %3299 = vmatpush.bf16.msrb.mxu2 %v3008_v44  ;;  %v5034_v18 = vunpack.i.h.bf16 %v8998_v20  ;;  %v5033_v24 = vunpack.i.l.bf16 %v8998_v20  ;;  %v2663_v12 = vsel %vm1090_vm4, %v4999_v10, %v5038_v35  ;;  %v10182_v44 = vunpack.i.h.bf16 %v8755_v1 }
 0x4f4   : > { %3222 = vmatpush.bf16.msra.mxu0 %v2986_v26  ;;  %3235 = vmatpush.bf16.msrb.mxu1 %v2987_v34  ;;  %v2657_v1 = vsel %vm1090_vm4, %v5039_v8, %v10184_v3  ;;  %v3094_v22 = vsel %vm1492_vm8, %v3039_v49, 0  ;;  %v2851_v17 = vsel %vm1286_vm9, %v10185_v60, %v5043_v25  ;;  %v5059_v21 = vunpack.i.h.bf16 %v5057_v2 }
 0x4f5   : > { %v2615_v14 = vsel %vm1041_vm3, %v4994_v16, %v5033_v24  ;;  %v2614_v56 = vsel %vm1041_vm3, %v5033_v24, %v4964_v53  ;;  %v2662_v54 = vsel %vm1090_vm4, %v5038_v35, %v10182_v44  ;;  %v10183_v16 = vunpack.i.h.bf16 %v8619_v9 }
 0x4f6   : > { %v2970_v0 = vpack.c.bf16 %v2663_v12, %v2615_v14  ;;  %v2971_v38 = vpack.c.bf16 %v2662_v54, %v2614_v56  ;;  %v3091_v9 = vsel %vm1492_vm8, %v3038_v32, 0  ;;  %v2850_v35 = vsel %vm1286_vm9, %v5043_v25, %v5044_v63 }
 0x4f7   : > { %3300 = vmatpush.bf16.msrb.mxu2 %v2992_v45  ;;  %v2609_v10 = vsel %vm1041_vm3, %v5034_v18, %v10183_v16  ;;  %v10186_v24 = vunpack.i.l.bf16 %v8702_v19  ;;  %v10187_v56 = vunpack.i.l.bf16 %v8700_v29  ;;  %v9079_v29 = vld [vmem:[%s7987_s1 + $0x60] sm:$0xff]  ;;  %v9083_v16 = vld [vmem:[%s7987_s1 + $0x68] sm:$0xff] }
 0x4f8   : > { %v2976_v53 = vpack.c.bf16 %v2657_v1, %v2609_v10  ;;  %3223 = vmatpush.bf16.msra.mxu0 %v2970_v0  ;;  %3236 = vmatpush.bf16.msrb.mxu1 %v2971_v38  ;;  %v5052_v51 = vpop.permute.xlu1 %5051  ;;  %v9087_v1 = vld [vmem:[%s7987_s1 + $0x70] sm:$0xff] }
 0x4f9   : > { %v5054_v37 = vunpack.i.h.bf16 %v5052_v51  ;;  %v5053_v26 = vunpack.i.l.bf16 %v5052_v51 }
 0x4fa   : > { %v5047_v47 = vpop.permute.xlu0 %5046  ;;  %v5072_v54 = vpop.permute.xlu2 %5071 }
 0x4fb   : > { %3301 = vmatpush.bf16.msrb.mxu2 %v2976_v53  ;;  %v5049_v34 = vunpack.i.h.bf16 %v5047_v47  ;;  %v5048_v61 = vunpack.i.l.bf16 %v5047_v47  ;;  %4029 = vmatmul.msk.bf16.vlgmr.msra.gmra.mxu0 %vm1488_vm12, %v8330_v50  ;;  %v2803_v44 = vsel %vm1237_vm11, %v10187_v56, %v5053_v26  ;;  %v2802_v59 = vsel %vm1237_vm11, %v5053_v26, %v5054_v37 }
 0x4fc   : > { %3271 = vmatpush.bf16.msrb.mxu0 %v3091_v9  ;;  %3284 = vmatpush.bf16.msra.mxu1 %v3094_v22  ;;  %v2801_v28 = vsel %vm1237_vm11, %v5054_v37, %v5029_v5  ;;  %v3005_v38 = vpack.c.bf16 %v2803_v44, %v9079_v29  ;;  %v3006_v10 = vpack.c.bf16 %v2802_v59, %v9083_v16  ;;  %v10188_v9 = vunpack.i.l.bf16 %v8753_v11 }
 0x4fd   : > { %4030 = vmatmul.msk.bf16.vlgmr.msrb.gmra.mxu1 %vm1488_vm12, %v8330_v50  ;;  %v2899_v45 = vsel %vm1335_vm10, %v10186_v24, %v5048_v61  ;;  %v2898_v32 = vsel %vm1335_vm10, %v5048_v61, %v5049_v34  ;;  %v2897_v49 = vsel %vm1335_vm10, %v5049_v34, %v5024_v48  ;;  %v5058_v48 = vunpack.i.l.bf16 %v5057_v2 }
 0x4fe   : > { %4035 = vmatmul.msk.bf16.vlgmr.msrb.gmra.mxu2 %vm1488_vm12, %v8330_v50  ;;  %v3021_v14 = vpack.c.bf16 %v2899_v45, %v2851_v17  ;;  %v3022_v19 = vpack.c.bf16 %v2898_v32, %v2850_v35  ;;  %v3023_v12 = vpack.c.bf16 %v2897_v49, %v2849_v6  ;;  %v3007_v40 = vpack.c.bf16 %v2801_v28, %v9087_v1  ;;  %v5089_v49 = vld [vmem:[%s7987_s1 + $0x10] sm:$0xff] }
 0x4ff   : > { %v5074_v2 = vunpack.i.h.bf16 %v5072_v54  ;;  %v2708_v22 = vsel %vm1139_vm5, %v10188_v9, %v5058_v48  ;;  %v2707_v51 = vsel %vm1139_vm5, %v5058_v48, %v5059_v21  ;;  %v2706_v47 = vsel %vm1139_vm5, %v5059_v21, %v5004_v42 }
 0x500   : > { %3259 = vmatpush.bf16.msra.mxu3 %v3021_v14  ;;  %3272 = vmatpush.bf16.msrb.mxu0 %v3022_v19  ;;  %v5067_v0 = vpop.permute.xlu1 %5066  ;;  %v5073_v37 = vunpack.i.l.bf16 %v5072_v54  ;;  %v10189_v26 = vunpack.i.l.bf16 %v8662_v7  ;;  %v9144_v19 = vld [vmem:[%s9392_s16] sm:$0xff] }
 0x501   : > { %3285 = vmatpush.bf16.msra.mxu1 %v3023_v12  ;;  %v5069_v53 = vunpack.i.h.bf16 %v5067_v0  ;;  %v5068_v5 = vunpack.i.l.bf16 %v5067_v0  ;;  %v2658_v20 = vsel %vm1090_vm4, %v5074_v2, %v5039_v8 }
 0x502   : > { %v5062_v3 = vpop.permute.xlu0 %5061  ;;  %v2659_v13 = vsel %vm1090_vm4, %v5073_v37, %v5074_v2  ;;  %v5091_v2 = vld [vmem:[%s7987_s1] sm:$0xff] }
 0x503   : > { %v5064_v63 = vunpack.i.h.bf16 %v5062_v3  ;;  %v5063_v25 = vunpack.i.l.bf16 %v5062_v3  ;;  %v2612_v42 = vsel %vm1041_vm3, %v4993_v23, %v5068_v5  ;;  %v2611_v7 = vsel %vm1041_vm3, %v5068_v5, %v5069_v53 }
 0x504   : > { %3260 = vmatpush.bf16.msra.mxu3 %v3005_v38  ;;  %3273 = vmatpush.bf16.msrb.mxu0 %v3006_v10  ;;  %v2610_v27 = vsel %vm1041_vm3, %v5069_v53, %v5034_v18  ;;  %v2974_v24 = vpack.c.bf16 %v2659_v13, %v2611_v7  ;;  %v5090_v38 = vld [vmem:[%s7987_s1 + $0x8] sm:$0xff] }
 0x505   : > { %3286 = vmatpush.bf16.msra.mxu1 %v3007_v40  ;;  %v2756_v34 = vsel %vm1188_vm6, %v10189_v26, %v5063_v25  ;;  %v2755_v11 = vsel %vm1188_vm6, %v5063_v25, %v5064_v63  ;;  %v2754_v61 = vsel %vm1188_vm6, %v5064_v63, %v5009_v55  ;;  %v10190_v55 = vunpack.i.l.bf16 %v8713_v58 }
 0x506   : > { %v2989_v60 = vpack.c.bf16 %v2756_v34, %v2708_v22  ;;  %v2990_v17 = vpack.c.bf16 %v2755_v11, %v2707_v51  ;;  %v2991_v33 = vpack.c.bf16 %v2754_v61, %v2706_v47  ;;  %v2975_v45 = vpack.c.bf16 %v2658_v20, %v2610_v27  ;;  %v5092_v22 = vld [vmem:[%s7987_s1 + $0x18] sm:$0xff]  ;;  %v5096_v20 = vld [vmem:[%s7987_s1 + $0x30] sm:$0xff] }
 0x507   : > { %v2660_v35 = vsel %vm1090_vm4, %v10190_v55, %v5073_v37  ;;  %v5093_v37 = vld [vmem:[%s7987_s1 + $0x38] sm:$0xff] }
 0x508   : > { %3261 = vmatpush.bf16.msra.mxu3 %v2989_v60  ;;  %3274 = vmatpush.bf16.msrb.mxu0 %v2990_v17  ;;  %v2973_v23 = vpack.c.bf16 %v2660_v35, %v2612_v42  ;;  %v10191_v27 = vld [vmem:[#allocation37_spill] sm:$0xff]  ;;  %v5094_v35 = vld [vmem:[%s7987_s1 + $0x20] sm:$0xff] }
 0x509   : > { %3287 = vmatpush.bf16.msra.mxu1 %v2991_v33 }
 0x50a   : > { %v9136_v30 = vpop.permute.xlu0 %3045 }
 0x50c   : > { %3262 = vmatpush.bf16.msra.mxu3 %v2973_v23  ;;  %3275 = vmatpush.bf16.msrb.mxu0 %v2974_v24  ;;  %v5095_v23 = vld [vmem:[%s7987_s1 + $0x28] sm:$0xff] }
 0x50d   : > { %3288 = vmatpush.bf16.msra.mxu1 %v2975_v45 }
 0x50f   : > { %4032 = vmatmul.msk.bf16.vlgmr.msra.gmra.mxu3 %vm1488_vm12, %v8330_v50  ;;  %4033 = vmatmul.msk.bf16.vlgmr.msrb.gmra.mxu0 %vm1488_vm12, %v8330_v50 }
 0x510   : > { %4034 = vmatmul.msk.bf16.vlgmr.msra.gmra.mxu1 %vm1488_vm12, %v8330_v50 }
 0x511   : > { %v3147_v58 = vpop.f32.mrf.mxu2 }
 0x519   : > { %v3149_v18 = vpop.f32.mrf.mxu2 }
 0x51d   : > { %v3134_v31 = vpop.f32.mrf.mxu1 }
 0x51e   : > { %v3135_v8 = vadd.f32 %v3134_v31, %v9136_v30 }
 0x520   : > { %v3309_v32 = vmax.f32 %v3135_v8, 0.0 }
 0x522   : > { %v3325_v6 = vmul.f32 %v3309_v32, %v10112_v4  ;;  %v3148_v4 = vadd.f32 %v3147_v58, %v9136_v30 }
 0x524   : > { %v3357_v14 = vpack.c.bf16 %v3325_v6, %v5089_v49  ;;  %v3310_v54 = vmax.f32 %v3148_v4, 0.0  ;;  %v5098_v4 = vld [vmem:[%s7987_s1 + $0x58] sm:$0xff] }
 0x525   : > { %v3136_v12 = vpop.f32.mrf.mxu1 }
 0x526   : > { %3429 = vmatpush.bf16.msrb.mxu1 %v3357_v14  ;;  %v3326_v63 = vmul.f32 %v3310_v54, %v10109_v46  ;;  %v10192_v14 = vld [vmem:[#allocation33_spill] sm:$0xff] }
 0x528   : > { %v3358_v51 = vpack.c.bf16 %v3326_v63, %v5092_v22  ;;  %v10195_v63 = vld [vmem:[#allocation18_spill] sm:$0xff] }
 0x529   : > { %4042 = vmatmul.msk.bf16.vlgmr.msrb.gmra.mxu1 %vm3390_vm1, %v9144_v19 }
 0x52c   : > { %v3199_v50 = vpop.f32.mrf.mxu2 }
 0x52d   : > { %v3200_v21 = vadd.f32 %v3199_v50, %v9136_v30  ;;  %v10193_v50 = vld [vmem:[#allocation22_spill] sm:$0xff] }
 0x52f   : > { %v3314_v53 = vmax.f32 %v3200_v21, 0.0 }
 0x534   : > { %v3201_v56 = vpop.f32.mrf.mxu2 }
 0x53e   : > { %v3121_v44 = vpop.f32.mrf.mxu0 }
 0x53f   : > { %v3122_v59 = vadd.f32 %v3121_v44, %v9136_v30  ;;  %v5097_v44 = vld [vmem:[%s7987_s1 + $0x40] sm:$0xff] }
 0x541   : > { %v3308_v28 = vmax.f32 %v3122_v59, 0.0 }
 0x543   : > { %v3324_v48 = vmul.f32 %v3308_v28, %v10111_v39  ;;  %v3330_v39 = vmul.f32 %v3314_v53, %v10110_v43  ;;  %v10194_v53 = vld [vmem:[#allocation44_spill] sm:$0xff] }
 0x544   : > { %v3108_v0 = vpop.f32.mrf.mxu3 }
 0x545   : > { %v3356_v10 = vpack.c.bf16 %v3324_v48, %v5090_v38  ;;  %v3109_v3 = vadd.f32 %v3108_v0, %v9136_v30  ;;  %v3362_v26 = vpack.c.bf16 %v3330_v39, %v5093_v37 }
 0x546   : > { %v3123_v40 = vpop.f32.mrf.mxu0 }
 0x547   : > { %v3307_v5 = vmax.f32 %v3109_v3, 0.0  ;;  %3415 = vmatpush.bf16.msra.mxu0 %v3356_v10 }
 0x549   : > { %v3323_v25 = vmul.f32 %v3307_v5, %v10113_v57 }
 0x54a   : > { %4041 = vmatmul.msk.bf16.vlgmr.msra.gmra.mxu0 %vm3390_vm1, %v9144_v19 }
 0x54b   : > { %v3355_v9 = vpack.c.bf16 %v3323_v25, %v5091_v2 }
 0x54c   : > { %v3110_v47 = vpop.f32.mrf.mxu3 }
 0x54d   : > { %3401 = vmatpush.bf16.msrb.mxu3 %v3355_v9 }
 0x550   : > { %4040 = vmatmul.msk.bf16.vlgmr.msrb.gmra.mxu3 %vm3390_vm1, %v9144_v19 }
 0x551   : > { %3443 = vmatpush.bf16.msra.mxu3 %v3358_v51 }
 0x555   : > { %3499 = vmatpush.bf16.msrb.mxu3 %v3362_v26 }
 0x558   : > { %v3160_v46 = vpop.f32.mrf.mxu3 }
 0x559   : > { %v3161_v57 = vadd.f32 %v3160_v46, %v9136_v30 }
 0x55b   : > { %v3173_v43 = vpop.f32.mrf.mxu0  ;;  %v3311_v60 = vmax.f32 %v3161_v57, 0.0 }
 0x55c   : > { %v3186_v34 = vpop.f32.mrf.mxu1  ;;  %v3174_v11 = vadd.f32 %v3173_v43, %v9136_v30 }
 0x55d   : > { %v3187_v61 = vadd.f32 %v3186_v34, %v9136_v30  ;;  %v3327_v42 = vmul.f32 %v3311_v60, %v10116_v36 }
 0x55e   : > { %v3312_v17 = vmax.f32 %v3174_v11, 0.0 }
 0x55f   : > { %v3313_v33 = vmax.f32 %v3187_v61, 0.0  ;;  %v3359_v13 = vpack.c.bf16 %v3327_v42, %v5094_v35  ;;  %v10198_v42 = vld [vmem:[#allocation7_spill] sm:$0xff] }
 0x560   : > { %v3328_v7 = vmul.f32 %v3312_v17, %v10117_v15  ;;  %v3162_v58 = vpop.f32.mrf.mxu3  ;;  %4043 = vmatmul.msk.bf16.vlgmr.msra.gmra.mxu3 %vm3390_vm1, %v9144_v19  ;;  %v10197_v17 = vld [vmem:[#allocation17_spill] sm:$0xff] }
 0x561   : > { %v3329_v55 = vmul.f32 %v3313_v33, %v10191_v27  ;;  %3457 = vmatpush.bf16.msrb.mxu0 %v3359_v13 }
 0x562   : > { %v3360_v24 = vpack.c.bf16 %v3328_v7, %v5095_v23 }
 0x563   : > { %v3361_v45 = vpack.c.bf16 %v3329_v55, %v5096_v20  ;;  %v3175_v18 = vpop.f32.mrf.mxu0  ;;  %v10199_v20 = vld [vmem:[#allocation15_spill] sm:$0xff] }
 0x564   : > { %v3188_v31 = vpop.f32.mrf.mxu1  ;;  %3471 = vmatpush.bf16.msra.mxu2 %v3360_v24  ;;  %4044 = vmatmul.msk.bf16.vlgmr.msrb.gmra.mxu0 %vm3390_vm1, %v9144_v19 }
 0x565   : > { %3485 = vmatpush.bf16.msra.mxu1 %v3361_v45 }
 0x567   : > { %4045 = vmatmul.msk.bf16.vlgmr.msra.gmra.mxu2 %vm3390_vm1, %v9144_v19 }
 0x568   : > { %4046 = vmatmul.msk.bf16.vlgmr.msra.gmra.mxu1 %vm3390_vm1, %v9144_v19 }
 0x56c   : > { %v3212_v36 = vpop.f32.mrf.mxu3 }
 0x56d   : > { %v3213_v15 = vadd.f32 %v3212_v36, %v9136_v30  ;;  %v3251_v8 = vpop.f32.mrf.mxu2 }
 0x56e   : > { %v3252_v32 = vadd.f32 %v3251_v8, %v9136_v30 }
 0x56f   : > { %v3315_v6 = vmax.f32 %v3213_v15, 0.0 }
 0x570   : > { %v3318_v49 = vmax.f32 %v3252_v32, 0.0  ;;  %4047 = vmatmul.msk.bf16.vlgmr.msrb.gmra.mxu3 %vm3390_vm1, %v9144_v19 }
 0x571   : > { %v3331_v12 = vmul.f32 %v3315_v6, %v10192_v14 }
 0x572   : > { %v3334_v56 = vmul.f32 %v3318_v49, %v10193_v50 }
 0x573   : > { %v3363_v59 = vpack.c.bf16 %v3331_v12, %v5097_v44 }
 0x574   : > { %v3366_v28 = vpack.c.bf16 %v3334_v56, %v5098_v4  ;;  %v3214_v21 = vpop.f32.mrf.mxu3 }
 0x575   : > { %v3253_v48 = vpop.f32.mrf.mxu2  ;;  %3513 = vmatpush.bf16.msra.mxu0 %v3363_v59 }
 0x576   : > { %3555 = vmatpush.bf16.msra.mxu3 %v3366_v28 }
 0x578   : > { %v3225_v54 = vpop.f32.mrf.mxu0  ;;  %4048 = vmatmul.msk.bf16.vlgmr.msra.gmra.mxu0 %vm3390_vm1, %v9144_v19 }
 0x579   : > { %v3226_v38 = vadd.f32 %v3225_v54, %v9136_v30 }
 0x57a   : > { %v3238_v0 = vpop.f32.mrf.mxu1 }
 0x57b   : > { %v3239_v10 = vadd.f32 %v3238_v0, %v9136_v30  ;;  %v3316_v3 = vmax.f32 %v3226_v38, 0.0 }
 0x57d   : > { %v3317_v40 = vmax.f32 %v3239_v10, 0.0  ;;  %v3332_v5 = vmul.f32 %v3316_v3, %v10194_v53 }
 0x57f   : > { %v3333_v25 = vmul.f32 %v3317_v40, %v10195_v63  ;;  %v3364_v39 = vpack.c.bf16 %v3332_v5, %v8955_v52  ;;  %v10196_v52 = vld [vmem:[#allocation11_spill] sm:$0xff] }
 0x580   : > { %v3227_v22 = vpop.f32.mrf.mxu0  ;;  %4051 = vmatmul.msk.bf16.vlgmr.msra.gmra.mxu3 %vm3390_vm1, %v9144_v19 }
 0x581   : > { %v3365_v2 = vpack.c.bf16 %v3333_v25, %v8959_v41  ;;  %v3303_v9 = vpop.f32.mrf.mxu2  ;;  %3527 = vmatpush.bf16.msrb.mxu2 %v3364_v39 }
 0x582   : > { %v3304_v51 = vadd.f32 %v3303_v9, %v9136_v30  ;;  %v3240_v47 = vpop.f32.mrf.mxu1 }
 0x583   : > { %3541 = vmatpush.bf16.msrb.mxu1 %v3365_v2 }
 0x584   : > { %v3322_v37 = vmax.f32 %v3304_v51, 0.0  ;;  %4049 = vmatmul.msk.bf16.vlgmr.msrb.gmra.mxu2 %vm3390_vm1, %v9144_v19 }
 0x586   : > { %4050 = vmatmul.msk.bf16.vlgmr.msrb.gmra.mxu1 %vm3390_vm1, %v9144_v19  ;;  %v3338_v26 = vmul.f32 %v3322_v37, %v10196_v52 }
 0x588   : > { %v3370_v41 = vpack.c.bf16 %v3338_v26, %v8963_v62 }
 0x589   : > { %v3305_v46 = vpop.f32.mrf.mxu2 }
 0x58a   : > { %3611 = vmatpush.bf16.msrb.mxu3 %v3370_v41 }
 0x58c   : > { %v3277_v57 = vpop.f32.mrf.mxu0 }
 0x58d   : > { %v3278_v43 = vadd.f32 %v3277_v57, %v9136_v30  ;;  %v3290_v34 = vpop.f32.mrf.mxu1 }
 0x58e   : > { %v3291_v11 = vadd.f32 %v3290_v34, %v9136_v30 }
 0x58f   : > { %v3320_v61 = vmax.f32 %v3278_v43, 0.0 }
 0x590   : > { %v3321_v60 = vmax.f32 %v3291_v11, 0.0  ;;  %4055 = vmatmul.msk.bf16.vlgmr.msrb.gmra.mxu3 %vm3390_vm1, %v9144_v19 }
 0x591   : > { %v3336_v33 = vmul.f32 %v3320_v61, %v10197_v17 }
 0x592   : > { %v3337_v7 = vmul.f32 %v3321_v60, %v10198_v42  ;;  %v3264_v27 = vpop.f32.mrf.mxu3 }
 0x593   : > { %v3368_v62 = vpack.c.bf16 %v3336_v33, %v9083_v16  ;;  %v3265_v55 = vadd.f32 %v3264_v27, %v9136_v30 }
 0x594   : > { %v3369_v35 = vpack.c.bf16 %v3337_v7, %v9087_v1  ;;  %v3279_v13 = vpop.f32.mrf.mxu0  ;;  %v9224_v1 = vpop.permute.xlu1 %3377 }
 0x595   : > { %v3319_v23 = vmax.f32 %v3265_v55, 0.0  ;;  %v3292_v24 = vpop.f32.mrf.mxu1  ;;  %3583 = vmatpush.bf16.msra.mxu2 %v3368_v62 }
 0x596   : > { %3597 = vmatpush.bf16.msra.mxu1 %v3369_v35 }
 0x597   : > { %v3335_v45 = vmul.f32 %v3319_v23, %v10199_v20 }
 0x598   : > { %4053 = vmatmul.msk.bf16.vlgmr.msra.gmra.mxu2 %vm3390_vm1, %v9144_v19 }
 0x599   : > { %v3367_v58 = vpack.c.bf16 %v3335_v45, %v9079_v29  ;;  %4054 = vmatmul.msk.bf16.vlgmr.msra.gmra.mxu1 %vm3390_vm1, %v9144_v19  ;;  %v9230_v29 = vpop.permute.xlu2 %3382 }
 0x59a   : > { %v3266_v16 = vpop.f32.mrf.mxu3 }
 0x59b   : > { %3569 = vmatpush.bf16.msrb.mxu0 %v3367_v58 }
 0x59e   : > { %4052 = vmatmul.msk.bf16.vlgmr.msrb.gmra.mxu0 %vm3390_vm1, %v9144_v19 }
 0x5a6   : > { %v3431_v30 = vpop.f32.mrf.mxu1 }
 0x5a7   : > { %v3432_v18 = vadd.f32 %v3431_v30, %v9224_v1 }
 0x5a9   : > { %3620 = vst [vmem:[%s9227_s24 + $0x10] sm:$0xff] %v3432_v18 }
 0x5ae   : > { %v3433_v31 = vpop.f32.mrf.mxu1 }
 0x5af   : > { %v3434_v19 = vadd.f32 %v3433_v31, %v9230_v29 }
 0x5b1   : > { %3636 = vst [vmem:[%s9227_s24 + $0x90] sm:$0xff] %v3434_v19 }
 0x5c7   : > { %v3417_v36 = vpop.f32.mrf.mxu0 }
 0x5c8   : > { %v3418_v15 = vadd.f32 %v3417_v36, %v9224_v1 }
 0x5ca   : > { %3619 = vst [vmem:[%s9227_s24 + $0x8] sm:$0xff] %v3418_v15 }
 0x5cf   : > { %v3419_v8 = vpop.f32.mrf.mxu0 }
 0x5d0   : > { %v3420_v32 = vadd.f32 %v3419_v8, %v9230_v29 }
 0x5d1   : > { %v3693_v31 = vld [vmem:[%s9227_s24 + $0x8] sm:$0xff] (%p5267_p4) }
 0x5d2   : > { %3635 = vst [vmem:[%s9227_s24 + $0x88] sm:$0xff] %v3420_v32 }
 0x5d3   : > { %v3403_v6 = vpop.f32.mrf.mxu3  ;;  %3694 = vst [vmem:[%s9302_s9 + $0x8] sm:$0xff] (%p5267_p4), %v3693_v31 }
 0x5d4   : > { %v3404_v49 = vadd.f32 %v3403_v6, %v9224_v1 }
 0x5d6   : > { %3618 = vst [vmem:[%s9227_s24] sm:$0xff] %v3404_v49 }
 0x5db   : > { %v3405_v14 = vpop.f32.mrf.mxu3 }
 0x5dc   : > { %v3406_v12 = vadd.f32 %v3405_v14, %v9230_v29 }
 0x5de   : > { %3634 = vst [vmem:[%s9227_s24 + $0x80] sm:$0xff] %v3406_v12 }
 0x5e1   : > { %v3459_v50 = vpop.f32.mrf.mxu0 }
 0x5e2   : > { %v3460_v56 = vadd.f32 %v3459_v50, %v9224_v1 }
 0x5e3   : > { %v3445_v4 = vpop.f32.mrf.mxu3 }
 0x5e4   : > { %3622 = vst [vmem:[%s9227_s24 + $0x20] sm:$0xff] %v3460_v56  ;;  %v3446_v28 = vadd.f32 %v3445_v4, %v9224_v1 }
 0x5e5   : > { %v3487_v44 = vpop.f32.mrf.mxu1  ;;  %v3723_v4 = vld [vmem:[%s9227_s24 + $0x80] sm:$0xff] (%p5267_p4) }
 0x5e6   : > { %v3488_v59 = vadd.f32 %v3487_v44, %v9224_v1  ;;  %3621 = vst [vmem:[%s9227_s24 + $0x18] sm:$0xff] %v3446_v28  ;;  %v3725_v28 = vld [vmem:[%s9227_s24 + $0x88] sm:$0xff] (%p5267_p4) }
 0x5e7   : > { %3724 = vst [vmem:[%s9302_s9 + $0x100] sm:$0xff] (%p5267_p4), %v3723_v4 }
 0x5e8   : > { %3624 = vst [vmem:[%s9227_s24 + $0x30] sm:$0xff] %v3488_v59 }
 0x5e9   : > { %v3461_v54 = vpop.f32.mrf.mxu0  ;;  %3726 = vst [vmem:[%s9302_s9 + $0x108] sm:$0xff] (%p5267_p4), %v3725_v28 }
 0x5ea   : > { %v3473_v21 = vpop.f32.mrf.mxu2  ;;  %v3462_v0 = vadd.f32 %v3461_v54, %v9230_v29 }
 0x5eb   : > { %v3474_v48 = vadd.f32 %v3473_v21, %v9224_v1  ;;  %v3447_v3 = vpop.f32.mrf.mxu3  ;;  %v3699_v36 = vld [vmem:[%s9227_s24 + $0x20] sm:$0xff] (%p5267_p4)  ;;  %v3727_v21 = vld [vmem:[%s9227_s24 + $0x90] sm:$0xff] (%p5267_p4) }
 0x5ec   : > { %3638 = vst [vmem:[%s9227_s24 + $0xa0] sm:$0xff] %v3462_v0  ;;  %v3448_v40 = vadd.f32 %v3447_v3, %v9230_v29 }
 0x5ed   : > { %v3489_v38 = vpop.f32.mrf.mxu1  ;;  %3623 = vst [vmem:[%s9227_s24 + $0x28] sm:$0xff] %v3474_v48  ;;  %v3697_v19 = vld [vmem:[%s9227_s24 + $0x18] sm:$0xff] (%p5267_p4) }
 0x5ee   : > { %v3490_v10 = vadd.f32 %v3489_v38, %v9230_v29  ;;  %3637 = vst [vmem:[%s9227_s24 + $0x98] sm:$0xff] %v3448_v40 }
 0x5ef   : > { %3698 = vst [vmem:[%s9302_s9 + $0x18] sm:$0xff] (%p5267_p4), %v3697_v19  ;;  %v3703_v8 = vld [vmem:[%s9227_s24 + $0x30] sm:$0xff] (%p5267_p4) }
 0x5f0   : > { %3640 = vst [vmem:[%s9227_s24 + $0xb0] sm:$0xff] %v3490_v10 }
 0x5f1   : > { %3700 = vst [vmem:[%s9302_s9 + $0x20] sm:$0xff] (%p5267_p4), %v3699_v36 }
 0x5f2   : > { %v3475_v53 = vpop.f32.mrf.mxu2  ;;  %3704 = vst [vmem:[%s9302_s9 + $0x30] sm:$0xff] (%p5267_p4), %v3703_v8 }
 0x5f3   : > { %v3476_v5 = vadd.f32 %v3475_v53, %v9230_v29  ;;  %v3501_v63 = vpop.f32.mrf.mxu3  ;;  %v3731_v54 = vld [vmem:[%s9227_s24 + $0xa0] sm:$0xff] (%p5267_p4)  ;;  %3728 = vst [vmem:[%s9302_s9 + $0x110] sm:$0xff] (%p5267_p4), %v3727_v21 }
 0x5f4   : > { %v3502_v25 = vadd.f32 %v3501_v63, %v9224_v1  ;;  %v3701_v15 = vld [vmem:[%s9227_s24 + $0x28] sm:$0xff] (%p5267_p4)  ;;  %3732 = vst [vmem:[%s9302_s9 + $0x120] sm:$0xff] (%p5267_p4), %v3731_v54 }
 0x5f5   : > { %3639 = vst [vmem:[%s9227_s24 + $0xa8] sm:$0xff] %v3476_v5  ;;  %v3515_v39 = vpop.f32.mrf.mxu0  ;;  %v3729_v48 = vld [vmem:[%s9227_s24 + $0x98] sm:$0xff] (%p5267_p4) }
 0x5f6   : > { %3625 = vst [vmem:[%s9227_s24 + $0x38] sm:$0xff] %v3502_v25  ;;  %v3516_v2 = vadd.f32 %v3515_v39, %v9224_v1 }
 0x5f7   : > { %3702 = vst [vmem:[%s9302_s9 + $0x28] sm:$0xff] (%p5267_p4), %v3701_v15  ;;  %v3735_v38 = vld [vmem:[%s9227_s24 + $0xb0] sm:$0xff] (%p5267_p4) }
 0x5f8   : > { %3626 = vst [vmem:[%s9227_s24 + $0x40] sm:$0xff] %v3516_v2 }
 0x5f9   : > { %3730 = vst [vmem:[%s9302_s9 + $0x118] sm:$0xff] (%p5267_p4), %v3729_v48 }
 0x5fa   : > { %3736 = vst [vmem:[%s9302_s9 + $0x130] sm:$0xff] (%p5267_p4), %v3735_v38 }
 0x5fb   : > { %v3503_v9 = vpop.f32.mrf.mxu3 }
 0x5fc   : > { %v3504_v22 = vadd.f32 %v3503_v9, %v9230_v29  ;;  %v3733_v0 = vld [vmem:[%s9227_s24 + $0xa8] sm:$0xff] (%p5267_p4) }
 0x5fd   : > { %v3517_v51 = vpop.f32.mrf.mxu0  ;;  %v3705_v32 = vld [vmem:[%s9227_s24 + $0x38] sm:$0xff] (%p5267_p4)  ;;  %3734 = vst [vmem:[%s9302_s9 + $0x128] sm:$0xff] (%p5267_p4), %v3733_v0 }
 0x5fe   : > { %3641 = vst [vmem:[%s9227_s24 + $0xb8] sm:$0xff] %v3504_v22  ;;  %v3518_v47 = vadd.f32 %v3517_v51, %v9230_v29 }
 0x5ff   : > { %v3707_v6 = vld [vmem:[%s9227_s24 + $0x40] sm:$0xff] (%p5267_p4)  ;;  %3706 = vst [vmem:[%s9302_s9 + $0x38] sm:$0xff] (%p5267_p4), %v3705_v32 }
 0x600   : > { %3642 = vst [vmem:[%s9227_s24 + $0xc0] sm:$0xff] %v3518_v47 }
 0x601   : > { %3708 = vst [vmem:[%s9302_s9 + $0x40] sm:$0xff] (%p5267_p4), %v3707_v6 }
 0x603   : > { %v3543_v37 = vpop.f32.mrf.mxu1  ;;  %v3557_v26 = vpop.f32.mrf.mxu3 }
 0x604   : > { %v3544_v52 = vadd.f32 %v3543_v37, %v9224_v1  ;;  %v3558_v41 = vadd.f32 %v3557_v26, %v9224_v1 }
 0x605   : > { %v3737_v10 = vld [vmem:[%s9227_s24 + $0xb8] sm:$0xff] (%p5267_p4) }
 0x606   : > { %3628 = vst [vmem:[%s9227_s24 + $0x50] sm:$0xff] %v3544_v52 }
 0x607   : > { %v3529_v46 = vpop.f32.mrf.mxu2  ;;  %3629 = vst [vmem:[%s9227_s24 + $0x58] sm:$0xff] %v3558_v41  ;;  %v3739_v3 = vld [vmem:[%s9227_s24 + $0xc0] sm:$0xff] (%p5267_p4) }
 0x608   : > { %v3530_v57 = vadd.f32 %v3529_v46, %v9224_v1  ;;  %3738 = vst [vmem:[%s9302_s9 + $0x138] sm:$0xff] (%p5267_p4), %v3737_v10 }
 0x609   : > { %3740 = vst [vmem:[%s9302_s9 + $0x140] sm:$0xff] (%p5267_p4), %v3739_v3 }
 0x60a   : > { %3627 = vst [vmem:[%s9227_s24 + $0x48] sm:$0xff] %v3530_v57 }
 0x60b   : > { %v3545_v43 = vpop.f32.mrf.mxu1  ;;  %v3559_v11 = vpop.f32.mrf.mxu3 }
 0x60c   : > { %v3546_v34 = vadd.f32 %v3545_v43, %v9230_v29  ;;  %v3560_v61 = vadd.f32 %v3559_v11, %v9230_v29 }
 0x60d   : > { %v3711_v14 = vld [vmem:[%s9227_s24 + $0x50] sm:$0xff] (%p5267_p4) }
 0x60e   : > { %3644 = vst [vmem:[%s9227_s24 + $0xd0] sm:$0xff] %v3546_v34  ;;  %v3713_v12 = vld [vmem:[%s9227_s24 + $0x58] sm:$0xff] (%p5267_p4) }
 0x60f   : > { %v3531_v60 = vpop.f32.mrf.mxu2  ;;  %3645 = vst [vmem:[%s9227_s24 + $0xd8] sm:$0xff] %v3560_v61 }
 0x610   : > { %v3532_v17 = vadd.f32 %v3531_v60, %v9230_v29  ;;  %3712 = vst [vmem:[%s9302_s9 + $0x50] sm:$0xff] (%p5267_p4), %v3711_v14 }
 0x611   : > { %v3709_v49 = vld [vmem:[%s9227_s24 + $0x48] sm:$0xff] (%p5267_p4)  ;;  %3714 = vst [vmem:[%s9302_s9 + $0x58] sm:$0xff] (%p5267_p4), %v3713_v12 }
 0x612   : > { %3643 = vst [vmem:[%s9227_s24 + $0xc8] sm:$0xff] %v3532_v17 }
 0x613   : > { %v3613_v33 = vpop.f32.mrf.mxu3  ;;  %3710 = vst [vmem:[%s9302_s9 + $0x48] sm:$0xff] (%p5267_p4), %v3709_v49 }
 0x614   : > { %v3614_v42 = vadd.f32 %v3613_v33, %v9224_v1 }
 0x615   : > { %v3743_v53 = vld [vmem:[%s9227_s24 + $0xd0] sm:$0xff] (%p5267_p4) }
 0x616   : > { %v3599_v7 = vpop.f32.mrf.mxu1  ;;  %3633 = vst [vmem:[%s9227_s24 + $0x78] sm:$0xff] %v3614_v42  ;;  %v3745_v5 = vld [vmem:[%s9227_s24 + $0xd8] sm:$0xff] (%p5267_p4) }
 0x617   : > { %v3600_v27 = vadd.f32 %v3599_v7, %v9224_v1  ;;  %3744 = vst [vmem:[%s9302_s9 + $0x150] sm:$0xff] (%p5267_p4), %v3743_v53 }
 0x618   : > { %3746 = vst [vmem:[%s9302_s9 + $0x158] sm:$0xff] (%p5267_p4), %v3745_v5 }
 0x619   : > { %3632 = vst [vmem:[%s9227_s24 + $0x70] sm:$0xff] %v3600_v27  ;;  %v3741_v40 = vld [vmem:[%s9227_s24 + $0xc8] sm:$0xff] (%p5267_p4) }
 0x61a   : > { %3742 = vst [vmem:[%s9302_s9 + $0x148] sm:$0xff] (%p5267_p4), %v3741_v40 }
 0x61b   : > { %v3571_v62 = vpop.f32.mrf.mxu0  ;;  %v3585_v55 = vpop.f32.mrf.mxu2 }
 0x61c   : > { %v3572_v35 = vadd.f32 %v3571_v62, %v9224_v1  ;;  %v3586_v13 = vadd.f32 %v3585_v55, %v9224_v1  ;;  %v3615_v23 = vpop.f32.mrf.mxu3  ;;  %v3691_v1 = vld [vmem:[%s9227_s24] sm:$0xff] (%p5267_p4) }
 0x61d   : > { %v3616_v24 = vadd.f32 %v3615_v23, %v9230_v29  ;;  %3692 = vst [vmem:[%s9302_s9] sm:$0xff] (%p5267_p4), %v3691_v1  ;;  %v3721_v59 = vld [vmem:[%s9227_s24 + $0x78] sm:$0xff] (%p5267_p4) }
 0x61e   : > { %3630 = vst [vmem:[%s9227_s24 + $0x60] sm:$0xff] %v3572_v35  ;;  %v3601_v20 = vpop.f32.mrf.mxu1 }
 0x61f   : > { %3631 = vst [vmem:[%s9227_s24 + $0x68] sm:$0xff] %v3586_v13  ;;  %v3602_v45 = vadd.f32 %v3601_v20, %v9230_v29 }
 0x620   : > { %3649 = vst [vmem:[%s9227_s24 + $0xf8] sm:$0xff] %v3616_v24  ;;  %v3719_v44 = vld [vmem:[%s9227_s24 + $0x70] sm:$0xff] (%p5267_p4) }
 0x621   : > { %3648 = vst [vmem:[%s9227_s24 + $0xf0] sm:$0xff] %v3602_v45 }
 0x622   : > { %3720 = vst [vmem:[%s9302_s9 + $0x70] sm:$0xff] (%p5267_p4), %v3719_v44 }
 0x623   : > { %v3573_v58 = vpop.f32.mrf.mxu0  ;;  %v3587_v16 = vpop.f32.mrf.mxu2  ;;  %3675 = sbr.rel (!%p5267_p4) target bundleno = 1584 (0x630), region = 104  ;;  %3722 = vst [vmem:[%s9302_s9 + $0x78] sm:$0xff] (%p5267_p4), %v3721_v59 }
 0x624   : > { %v3574_v30 = vadd.f32 %v3573_v58, %v9230_v29  ;;  %v3588_v18 = vadd.f32 %v3587_v16, %v9230_v29  ;;  %v3695_v29 = vld [vmem:[%s9227_s24 + $0x10] sm:$0xff] (%p5267_p4) }
 0x625   : > { %3696 = vst [vmem:[%s9302_s9 + $0x10] sm:$0xff] (%p5267_p4), %v3695_v29  ;;  %v3715_v50 = vld [vmem:[%s9227_s24 + $0x60] sm:$0xff] (%p5267_p4) }
 0x626   : > { %3646 = vst [vmem:[%s9227_s24 + $0xe0] sm:$0xff] %v3574_v30  ;;  %v3717_v56 = vld [vmem:[%s9227_s24 + $0x68] sm:$0xff] (%p5267_p4) }
 0x627   : > { %3647 = vst [vmem:[%s9227_s24 + $0xe8] sm:$0xff] %v3588_v18  ;;  %v3753_v2 = vld [vmem:[%s9227_s24 + $0xf8] sm:$0xff] (%p5267_p4) }
 0x628   : > { %3716 = vst [vmem:[%s9302_s9 + $0x60] sm:$0xff] %v3715_v50  ;;  %v3751_v39 = vld [vmem:[%s9227_s24 + $0xf0] sm:$0xff] }
 0x629   : > { %3718 = vst [vmem:[%s9302_s9 + $0x68] sm:$0xff] %v3717_v56 }
 0x62a   : > { %3752 = vst [vmem:[%s9302_s9 + $0x170] sm:$0xff] %v3751_v39 }
 0x62b   : > { %3754 = vst [vmem:[%s9302_s9 + $0x178] sm:$0xff] %v3753_v2 }
 0x62d   : > { %v3747_v63 = vld [vmem:[%s9227_s24 + $0xe0] sm:$0xff] }
 0x62e   : > { %v3749_v25 = vld [vmem:[%s9227_s24 + $0xe8] sm:$0xff]  ;;  %3748 = vst [vmem:[%s9302_s9 + $0x160] sm:$0xff] %v3747_v63 }
 0x62f   : > { %3750 = vst [vmem:[%s9302_s9 + $0x168] sm:$0xff] %v3749_v25 }
 0x630 PF: > { %s10200_s26 = sld [smem:[#allocation4_spill]] }
 0x631   : > { %s10201_s2 = sld [smem:[#allocation3_spill]] }
 0x632   : > { %s10202_s25 = sld [smem:[#allocation5_spill]] }
 0x636   : > { %p29_p9 = scmp.ge.s32.totalorder %s10200_s26, 4  }
 0x638   :  { %31 = sbr.rel (!%p29_p9) target bundleno = 13 (0xd), region = 187 }

</bundles_post_ra>
